<compile_context>
chip_gen: v5e
topology: v5e:2x2
jax: 0.10.0
libtpu: 0.0.40
codegen_flags: <defaults>
</compile_context>

<pallas_src>
import math
import functools

import jax
import jax.numpy as jnp
from jax.experimental import pallas as pl
from jax.experimental.pallas import tpu as pltpu


def _pair(v):
    return (v, v) if isinstance(v, int) else tuple(v)


def dcn_kernel(om_ref, y_ref, bias_ref, out_ref, *,
               KK, kw, H, W, W_out, sh, sw, ph, pw, dh, dw, TP):
    """One (image, P-tile) grid step of the modulated deformable conv.

    om_ref   (1, 3KK, TP)    f32  : [off_y(KK) | off_x(KK) | sigmoid(mask)(KK)]
    y_ref    (1, OC, KK*HW)  bf16 : per-tap projected inputs Y_k = W_k @ x
    bias_ref (OC, 1)         f32
    out_ref  (1, OC, TP)     f32
    """
    HW = H * W
    om = om_ref[0]                                   # (3KK, TP)
    y_all = y_ref[0]                                 # (OC, KK*HW) bf16

    # Output-pixel coordinates for this P tile, derived in-kernel.
    t = pl.program_id(1)
    p = t * TP + jax.lax.broadcasted_iota(jnp.int32, (1, TP), 1)
    p_f = p.astype(jnp.float32)
    ho = jnp.floor(p_f / float(W_out))
    wo = p_f - ho * float(W_out)
    # Exact small-int correction for any f32 division rounding.
    ho = jnp.where(wo >= float(W_out), ho + 1.0,
                   jnp.where(wo < 0.0, ho - 1.0, ho))
    wo = p_f - ho * float(W_out)

    # Input row / column index columns.
    yi = jax.lax.broadcasted_iota(jnp.int32, (H, 1), 0).astype(jnp.float32)
    xi = jax.lax.broadcasted_iota(jnp.int32, (W, 1), 0).astype(jnp.float32)

    acc = jnp.zeros(out_ref.shape[1:], jnp.float32)  # (OC, TP)
    for k in range(KK):                              # static unrolled tap loop
        i, j = k // kw, k % kw
        off_y = om[k:k + 1, :]                       # (1, TP) contiguous rows
        off_x = om[KK + k:KK + k + 1, :]
        m_k = om[2 * KK + k:2 * KK + k + 1, :]       # sigmoid applied upstream

        py = ho * float(sh) - float(ph) + float(i * dh) + off_y      # (1, TP)
        px = wo * float(sw) - float(pw) + float(j * dw) + off_x

        y0 = jnp.floor(py)
        x0 = jnp.floor(px)
        ly = py - y0
        lx = px - x0
        hy = 1.0 - ly
        hx = 1.0 - lx

        # Separable bilinear weights (f32 VPU math, safe on v5e); out-of-bounds
        # corners vanish because no input row/col matches.  Modulation mask is
        # folded into the x factor.
        wy = (hy * (yi == y0).astype(jnp.float32) +
              ly * (yi == y0 + 1.0).astype(jnp.float32))             # (H, TP)
        wx = ((hx * m_k) * (xi == x0).astype(jnp.float32) +
              (lx * m_k) * (xi == x0 + 1.0).astype(jnp.float32))     # (W, TP)

        bk = (wy[:, None, :] * wx[None, :, :]).reshape(HW, TP)       # (HW, TP)
        y_k = y_all[:, k * HW:(k + 1) * HW]                          # (OC, HW)

        # Per-tap MXU accumulation: bf16 operands, f32 accumulate (the repeated
        # acc += dot(...) also lets v7x keep the accumulation in the MRB).
        acc = acc + jnp.dot(y_k, bk.astype(jnp.bfloat16),
                            preferred_element_type=jnp.float32)

    out_ref[0] = acc + bias_ref[...]


def dcn_forward(x, params, kernel_size, stride, padding, dilation, tp=256):
    weight, bias, w_om, b_om = params
    N, C, H, W = x.shape
    kh, kw = kernel_size
    sh, sw = stride
    ph, pw = padding
    dh, dw = dilation
    assert (dh, dw) == (1, 1), \
        "offset conv uses dilation=1; shapes only match for dilation=1"
    KK = kh * kw
    OC = weight.shape[0]
    H_out = (H + 2 * ph - dh * (kh - 1) - 1) // sh + 1
    W_out = (W + 2 * pw - dw * (kw - 1) - 1) // sw + 1
    P = H_out * W_out
    HW = H * W

    TP = tp
    P_pad = ((P + TP - 1) // TP) * TP
    n_pt = P_pad // TP

    # ---- wrapper glue #1: offset/mask convolution (hoisted out of kernel) ---
    om = jax.lax.conv_general_dilated(
        x.astype(jnp.float32), w_om.astype(jnp.float32),
        window_strides=(sh, sw), padding=[(ph, ph), (pw, pw)],
        dimension_numbers=("NCHW", "OIHW", "NCHW"),
        precision=jax.lax.Precision.HIGHEST) + b_om[None, :, None, None]
    om = om.reshape(N, 3 * KK, P)
    # torch.chunk + cat((o1, o2)) keeps the first 2*KK channels in place, so
    # off_y(k)=om[2k], off_x(k)=om[2k+1], mask(k)=sigmoid(om[2KK+k]).
    # Re-pack into three contiguous (KK, P) blocks for aligned in-kernel reads.
    off_y = om[:, 0:2 * KK:2, :]
    off_x = om[:, 1:2 * KK:2, :]
    mask = jax.nn.sigmoid(om[:, 2 * KK:3 * KK, :])
    om_packed = jnp.concatenate([off_y, off_x, mask], axis=1)        # (N,3KK,P)
    om_packed = jnp.pad(om_packed, ((0, 0), (0, 0), (0, P_pad - P)))

    # ---- wrapper glue #2: per-tap projections Y_k = W_k @ x (hoisted) -------
    x_flat = x.reshape(N, C, HW).astype(jnp.float32)
    w_taps = weight.astype(jnp.float32).reshape(OC, C, KK)
    y_all = jnp.einsum('ock,nch->nokh', w_taps, x_flat,
                       precision=jax.lax.Precision.HIGHEST)          # (N,OC,KK,HW)
    y_all = y_all.reshape(N, OC, KK * HW).astype(jnp.bfloat16)

    bias_col = bias.reshape(OC, 1).astype(jnp.float32)

    kern = functools.partial(
        dcn_kernel, KK=KK, kw=kw, H=H, W=W, W_out=W_out,
        sh=sh, sw=sw, ph=ph, pw=pw, dh=dh, dw=dw, TP=TP)

    out = pl.pallas_call(
        kern,
        grid=(N, n_pt),
        in_specs=[
            pl.BlockSpec((1, 3 * KK, TP), lambda n, t: (n, 0, t)),   # offsets/mask
            pl.BlockSpec((1, OC, KK * HW), lambda n, t: (n, 0, 0)),  # Y (resident over t)
            pl.BlockSpec((OC, 1), lambda n, t: (0, 0)),              # main bias
        ],
        out_specs=pl.BlockSpec((1, OC, TP), lambda n, t: (n, 0, t)),
        out_shape=jax.ShapeDtypeStruct((N, OC, P_pad), jnp.float32),
        compiler_params=pltpu.CompilerParams(
            dimension_semantics=("parallel", "parallel")),
    )(om_packed, y_all, bias_col)

    return out[:, :, :P].reshape(N, OC, H_out, W_out)


def dcn_reference(x, params, kernel_size, stride, padding, dilation):
    """Pure-JAX reference of the full DCN forward (offset conv + modulated
    deformable conv)."""
    weight, bias, w_om, b_om = params
    N, C, H, W = x.shape
    OC = weight.shape[0]
    kh, kw = kernel_size
    sh, sw = stride
    ph, pw = padding
    dh, dw = dilation
    KK = kh * kw
    HW = H * W

    om = jax.lax.conv_general_dilated(
        x.astype(jnp.float32), w_om.astype(jnp.float32),
        window_strides=(sh, sw), padding=[(ph, ph), (pw, pw)],
        dimension_numbers=("NCHW", "OIHW", "NCHW"),
        precision=jax.lax.Precision.HIGHEST) + b_om[None, :, None, None]
    H_out, W_out = om.shape[2], om.shape[3]
    P = H_out * W_out
    om = om.reshape(N, 3 * KK, P)

    x_flat = x.reshape(N, C, HW).astype(jnp.float32)
    p = jnp.arange(P)
    ho = (p // W_out).astype(jnp.float32)
    wo = (p % W_out).astype(jnp.float32)

    out = jnp.zeros((N, OC, P), jnp.float32)
    for k in range(KK):
        i, j = k // kw, k % kw
        off_y = om[:, 2 * k, :]
        off_x = om[:, 2 * k + 1, :]
        m_k = jax.nn.sigmoid(om[:, 2 * KK + k, :])
        py = ho[None, :] * sh - ph + i * dh + off_y
        px = wo[None, :] * sw - pw + j * dw + off_x
        y0 = jnp.floor(py)
        x0 = jnp.floor(px)
        ly, lx = py - y0, px - x0
        hy, hx = 1.0 - ly, 1.0 - lx

        def gather(yi, xi, wgt):
            valid = ((yi >= 0) & (yi < H) & (xi >= 0) & (xi < W)).astype(jnp.float32)
            idx = (jnp.clip(yi, 0, H - 1) * W + jnp.clip(xi, 0, W - 1)).astype(jnp.int32)
            v = jnp.take_along_axis(
                x_flat, jnp.broadcast_to(idx[:, None, :], (N, C, P)), axis=2)
            return v * (wgt * valid)[:, None, :]

        val = (gather(y0, x0, hy * hx) + gather(y0, x0 + 1, hy * lx) +
               gather(y0 + 1, x0, ly * hx) + gather(y0 + 1, x0 + 1, ly * lx))
        val = val * m_k[:, None, :]
        out = out + jnp.einsum('ncp,oc->nop', val, weight[:, :, i, j].astype(jnp.float32),
                               precision=jax.lax.Precision.HIGHEST)
    out = out + bias[None, :, None]
    return out.reshape(N, OC, H_out, W_out)


if __name__ == "__main__":
    key = jax.random.PRNGKey(0)
    N, in_channels, H, W = 2, 4, 16, 16
    out_channels = 8
    kernel_size = (3, 3)
    stride = _pair(1)
    padding = _pair(1)
    dilation = _pair(1)
    kh, kw = kernel_size
    KK = kh * kw

    k1, k2, k3, k4 = jax.random.split(key, 4)
    # Main deform-conv weight/bias initialized as in the module's init_offset().
    stdv = 1.0 / math.sqrt(in_channels * kh * kw)
    weight = jax.random.uniform(k1, (out_channels, in_channels, kh, kw),
                                jnp.float32, -stdv, stdv)
    bias = jnp.zeros((out_channels,), jnp.float32)
    # NOTE: the PyTorch module zero-inits conv_offset_mask (offsets=0, mask=0.5),
    # which makes the deformable path degenerate. Small deterministic random
    # values actually exercise the sampling; forward semantics are unchanged.
    w_om = 0.1 * jax.random.normal(k2, (3 * KK, in_channels, kh, kw), jnp.float32)
    b_om = 0.05 * jax.random.normal(k3, (3 * KK,), jnp.float32)

    x = jax.random.normal(k4, (N, in_channels, H, W), jnp.float32)
    params = (weight, bias, w_om, b_om)

    out = dcn_forward(x, params, kernel_size, stride, padding, dilation)
    out = jax.block_until_ready(out)

    ref = dcn_reference(x, params, kernel_size, stride, padding, dilation)
    ref = jax.block_until_ready(ref)

    rel_err = float(jnp.max(jnp.abs(out - ref)) / (jnp.max(jnp.abs(ref)) + 1e-6))
    assert rel_err < 1e-2, f"mismatch vs reference: rel_err={rel_err}"
    print("KERNEL_OK")
</pallas_src>

<mosaic_0001>
module attributes {stable_mosaic.version = 11 : i64} {
  func.func @dcn_kernel(%arg0: i32, %arg1: i32, %arg2: memref<1x27x256xf32, #tpu.memory_space<vmem>>, %arg3: memref<1x8x2304xbf16, #tpu.memory_space<vmem>>, %arg4: memref<8x1xf32, #tpu.memory_space<vmem>>, %arg5: memref<1x8x256xf32, #tpu.memory_space<vmem>>) attributes {dimension_semantics = [#tpu.dimension_semantics<parallel>, #tpu.dimension_semantics<parallel>], iteration_bounds = array<i64: 2, 1>, scalar_prefetch = 0 : i64, scratch_operands = 0 : i64, tpu.core_type = #tpu.core_type<tc>, window_params = [{transform_indices = @transform_0, window_bounds = array<i64: 1, 27, 256>}, {transform_indices = @transform_1, window_bounds = array<i64: 1, 8, 2304>}, {pipeline_mode = #tpu.pipeline_mode<synchronous>, transform_indices = @transform_2, window_bounds = array<i64: 8, 1>}, {transform_indices = @transform_3, window_bounds = array<i64: 1, 8, 256>}]} {
    %c0 = arith.constant 0 : index
    %c0_0 = arith.constant 0 : index
    %c0_1 = arith.constant 0 : index
    %0 = vector.load %arg2[%c0, %c0_0, %c0_1] : memref<1x27x256xf32, #tpu.memory_space<vmem>>, vector<1x27x256xf32>
    %1 = vector.shape_cast %0 : vector<1x27x256xf32> to vector<27x256xf32>
    %c0_2 = arith.constant 0 : index
    %c0_3 = arith.constant 0 : index
    %c0_4 = arith.constant 0 : index
    %2 = vector.load %arg3[%c0_2, %c0_3, %c0_4] : memref<1x8x2304xbf16, #tpu.memory_space<vmem>>, vector<1x8x2304xbf16>
    %3 = vector.shape_cast %2 : vector<1x8x2304xbf16> to vector<8x2304xbf16>
    %c256_i32 = arith.constant 256 : i32
    %4 = arith.muli %arg1, %c256_i32 : i32
    %5 = tpu.iota {dimensions = array<i32: 1>} : vector<1x256xi32>
    %6 = vector.broadcast %4 : i32 to vector<1x256xi32>
    %7 = arith.addi %6, %5 : vector<1x256xi32>
    %8 = arith.sitofp %7 : vector<1x256xi32> to vector<1x256xf32>
    %cst = arith.constant 1.600000e+01 : f32
    %9 = vector.broadcast %cst : f32 to vector<1x256xf32>
    %10 = arith.divf %8, %9 : vector<1x256xf32>
    %11 = math.floor %10 : vector<1x256xf32>
    %cst_5 = arith.constant 1.600000e+01 : f32
    %12 = vector.broadcast %cst_5 : f32 to vector<1x256xf32>
    %13 = arith.mulf %11, %12 : vector<1x256xf32>
    %14 = arith.subf %8, %13 : vector<1x256xf32>
    %cst_6 = arith.constant 1.600000e+01 : f32
    %15 = vector.broadcast %cst_6 : f32 to vector<1x256xf32>
    %16 = arith.cmpf oge, %14, %15 : vector<1x256xf32>
    %cst_7 = arith.constant 1.000000e+00 : f32
    %17 = vector.broadcast %cst_7 : f32 to vector<1x256xf32>
    %18 = arith.addf %11, %17 : vector<1x256xf32>
    %cst_8 = arith.constant 0.000000e+00 : f32
    %19 = vector.broadcast %cst_8 : f32 to vector<1x256xf32>
    %20 = arith.cmpf olt, %14, %19 : vector<1x256xf32>
    %cst_9 = arith.constant 1.000000e+00 : f32
    %21 = vector.broadcast %cst_9 : f32 to vector<1x256xf32>
    %22 = arith.subf %11, %21 : vector<1x256xf32>
    %23 = arith.select %20, %22, %11 : vector<1x256xi1>, vector<1x256xf32>
    %24 = arith.select %16, %18, %23 : vector<1x256xi1>, vector<1x256xf32>
    %cst_10 = arith.constant 1.600000e+01 : f32
    %25 = vector.broadcast %cst_10 : f32 to vector<1x256xf32>
    %26 = arith.mulf %24, %25 : vector<1x256xf32>
    %27 = arith.subf %8, %26 : vector<1x256xf32>
    %28 = tpu.iota {dimensions = array<i32: 0>} : vector<16x1xi32>
    %29 = arith.sitofp %28 : vector<16x1xi32> to vector<16x1xf32>
    %30 = tpu.iota {dimensions = array<i32: 0>} : vector<16x1xi32>
    %31 = arith.sitofp %30 : vector<16x1xi32> to vector<16x1xf32>
    %cst_11 = arith.constant 0.000000e+00 : f32
    %32 = vector.broadcast %cst_11 : f32 to vector<8x256xf32>
    %33 = vector.extract_strided_slice %1 {offsets = [0, 0], sizes = [1, 256], strides = [1, 1]} : vector<27x256xf32> to vector<1x256xf32>
    %34 = vector.extract_strided_slice %1 {offsets = [9, 0], sizes = [1, 256], strides = [1, 1]} : vector<27x256xf32> to vector<1x256xf32>
    %35 = vector.extract_strided_slice %1 {offsets = [18, 0], sizes = [1, 256], strides = [1, 1]} : vector<27x256xf32> to vector<1x256xf32>
    %cst_12 = arith.constant 1.000000e+00 : f32
    %36 = vector.broadcast %cst_12 : f32 to vector<1x256xf32>
    %37 = arith.mulf %24, %36 : vector<1x256xf32>
    %cst_13 = arith.constant 1.000000e+00 : f32
    %38 = vector.broadcast %cst_13 : f32 to vector<1x256xf32>
    %39 = arith.subf %37, %38 : vector<1x256xf32>
    %cst_14 = arith.constant 0.000000e+00 : f32
    %40 = vector.broadcast %cst_14 : f32 to vector<1x256xf32>
    %41 = arith.addf %39, %40 : vector<1x256xf32>
    %42 = arith.addf %41, %33 : vector<1x256xf32>
    %cst_15 = arith.constant 1.000000e+00 : f32
    %43 = vector.broadcast %cst_15 : f32 to vector<1x256xf32>
    %44 = arith.mulf %27, %43 : vector<1x256xf32>
    %cst_16 = arith.constant 1.000000e+00 : f32
    %45 = vector.broadcast %cst_16 : f32 to vector<1x256xf32>
    %46 = arith.subf %44, %45 : vector<1x256xf32>
    %cst_17 = arith.constant 0.000000e+00 : f32
    %47 = vector.broadcast %cst_17 : f32 to vector<1x256xf32>
    %48 = arith.addf %46, %47 : vector<1x256xf32>
    %49 = arith.addf %48, %34 : vector<1x256xf32>
    %50 = math.floor %42 : vector<1x256xf32>
    %51 = math.floor %49 : vector<1x256xf32>
    %52 = arith.subf %42, %50 : vector<1x256xf32>
    %53 = arith.subf %49, %51 : vector<1x256xf32>
    %cst_18 = arith.constant 1.000000e+00 : f32
    %54 = vector.broadcast %cst_18 : f32 to vector<1x256xf32>
    %55 = arith.subf %54, %52 : vector<1x256xf32>
    %cst_19 = arith.constant 1.000000e+00 : f32
    %56 = vector.broadcast %cst_19 : f32 to vector<1x256xf32>
    %57 = arith.subf %56, %53 : vector<1x256xf32>
    %58 = vector.broadcast %29 : vector<16x1xf32> to vector<16x256xf32>
    %59 = vector.broadcast %50 : vector<1x256xf32> to vector<16x256xf32>
    %60 = arith.cmpf oeq, %58, %59 : vector<16x256xf32>
    %61 = arith.extui %60 : vector<16x256xi1> to vector<16x256xi32>
    %62 = arith.sitofp %61 : vector<16x256xi32> to vector<16x256xf32>
    %63 = vector.broadcast %55 : vector<1x256xf32> to vector<16x256xf32>
    %64 = arith.mulf %63, %62 : vector<16x256xf32>
    %cst_20 = arith.constant 1.000000e+00 : f32
    %65 = vector.broadcast %cst_20 : f32 to vector<1x256xf32>
    %66 = arith.addf %50, %65 : vector<1x256xf32>
    %67 = vector.broadcast %29 : vector<16x1xf32> to vector<16x256xf32>
    %68 = vector.broadcast %66 : vector<1x256xf32> to vector<16x256xf32>
    %69 = arith.cmpf oeq, %67, %68 : vector<16x256xf32>
    %70 = arith.extui %69 : vector<16x256xi1> to vector<16x256xi32>
    %71 = arith.sitofp %70 : vector<16x256xi32> to vector<16x256xf32>
    %72 = vector.broadcast %52 : vector<1x256xf32> to vector<16x256xf32>
    %73 = arith.mulf %72, %71 : vector<16x256xf32>
    %74 = arith.addf %64, %73 : vector<16x256xf32>
    %75 = arith.mulf %57, %35 : vector<1x256xf32>
    %76 = vector.broadcast %31 : vector<16x1xf32> to vector<16x256xf32>
    %77 = vector.broadcast %51 : vector<1x256xf32> to vector<16x256xf32>
    %78 = arith.cmpf oeq, %76, %77 : vector<16x256xf32>
    %79 = arith.extui %78 : vector<16x256xi1> to vector<16x256xi32>
    %80 = arith.sitofp %79 : vector<16x256xi32> to vector<16x256xf32>
    %81 = vector.broadcast %75 : vector<1x256xf32> to vector<16x256xf32>
    %82 = arith.mulf %81, %80 : vector<16x256xf32>
    %83 = arith.mulf %53, %35 : vector<1x256xf32>
    %cst_21 = arith.constant 1.000000e+00 : f32
    %84 = vector.broadcast %cst_21 : f32 to vector<1x256xf32>
    %85 = arith.addf %51, %84 : vector<1x256xf32>
    %86 = vector.broadcast %31 : vector<16x1xf32> to vector<16x256xf32>
    %87 = vector.broadcast %85 : vector<1x256xf32> to vector<16x256xf32>
    %88 = arith.cmpf oeq, %86, %87 : vector<16x256xf32>
    %89 = arith.extui %88 : vector<16x256xi1> to vector<16x256xi32>
    %90 = arith.sitofp %89 : vector<16x256xi32> to vector<16x256xf32>
    %91 = vector.broadcast %83 : vector<1x256xf32> to vector<16x256xf32>
    %92 = arith.mulf %91, %90 : vector<16x256xf32>
    %93 = arith.addf %82, %92 : vector<16x256xf32>
    %94 = vector.shape_cast %74 : vector<16x256xf32> to vector<16x1x256xf32>
    %95 = vector.shape_cast %93 : vector<16x256xf32> to vector<1x16x256xf32>
    %96 = vector.broadcast %94 : vector<16x1x256xf32> to vector<16x16x256xf32>
    %97 = vector.broadcast %95 : vector<1x16x256xf32> to vector<16x16x256xf32>
    %98 = arith.mulf %96, %97 : vector<16x16x256xf32>
    %99 = vector.shape_cast %98 : vector<16x16x256xf32> to vector<256x256xf32>
    %100 = vector.extract_strided_slice %3 {offsets = [0, 0], sizes = [8, 256], strides = [1, 1]} : vector<8x2304xbf16> to vector<8x256xbf16>
    %101 = arith.truncf %99 : vector<256x256xf32> to vector<256x256xbf16>
    %cst_22 = arith.constant dense<0.000000e+00> : vector<8x256xf32>
    %102 = tpu.matmul %100, %101, %cst_22 {dimension_numbers = #tpu.dot_dimension_numbers<[1], [0], [0], [1], [0, 0, 1, 1], [], []>} : vector<8x256xbf16>, vector<256x256xbf16>, vector<8x256xf32> -> vector<8x256xf32>
    %103 = arith.addf %32, %102 : vector<8x256xf32>
    %104 = vector.extract_strided_slice %1 {offsets = [1, 0], sizes = [1, 256], strides = [1, 1]} : vector<27x256xf32> to vector<1x256xf32>
    %105 = vector.extract_strided_slice %1 {offsets = [10, 0], sizes = [1, 256], strides = [1, 1]} : vector<27x256xf32> to vector<1x256xf32>
    %106 = vector.extract_strided_slice %1 {offsets = [19, 0], sizes = [1, 256], strides = [1, 1]} : vector<27x256xf32> to vector<1x256xf32>
    %cst_23 = arith.constant 1.000000e+00 : f32
    %107 = vector.broadcast %cst_23 : f32 to vector<1x256xf32>
    %108 = arith.mulf %24, %107 : vector<1x256xf32>
    %cst_24 = arith.constant 1.000000e+00 : f32
    %109 = vector.broadcast %cst_24 : f32 to vector<1x256xf32>
    %110 = arith.subf %108, %109 : vector<1x256xf32>
    %cst_25 = arith.constant 0.000000e+00 : f32
    %111 = vector.broadcast %cst_25 : f32 to vector<1x256xf32>
    %112 = arith.addf %110, %111 : vector<1x256xf32>
    %113 = arith.addf %112, %104 : vector<1x256xf32>
    %cst_26 = arith.constant 1.000000e+00 : f32
    %114 = vector.broadcast %cst_26 : f32 to vector<1x256xf32>
    %115 = arith.mulf %27, %114 : vector<1x256xf32>
    %cst_27 = arith.constant 1.000000e+00 : f32
    %116 = vector.broadcast %cst_27 : f32 to vector<1x256xf32>
    %117 = arith.subf %115, %116 : vector<1x256xf32>
    %cst_28 = arith.constant 1.000000e+00 : f32
    %118 = vector.broadcast %cst_28 : f32 to vector<1x256xf32>
    %119 = arith.addf %117, %118 : vector<1x256xf32>
    %120 = arith.addf %119, %105 : vector<1x256xf32>
    %121 = math.floor %113 : vector<1x256xf32>
    %122 = math.floor %120 : vector<1x256xf32>
    %123 = arith.subf %113, %121 : vector<1x256xf32>
    %124 = arith.subf %120, %122 : vector<1x256xf32>
    %cst_29 = arith.constant 1.000000e+00 : f32
    %125 = vector.broadcast %cst_29 : f32 to vector<1x256xf32>
    %126 = arith.subf %125, %123 : vector<1x256xf32>
    %cst_30 = arith.constant 1.000000e+00 : f32
    %127 = vector.broadcast %cst_30 : f32 to vector<1x256xf32>
    %128 = arith.subf %127, %124 : vector<1x256xf32>
    %129 = vector.broadcast %29 : vector<16x1xf32> to vector<16x256xf32>
    %130 = vector.broadcast %121 : vector<1x256xf32> to vector<16x256xf32>
    %131 = arith.cmpf oeq, %129, %130 : vector<16x256xf32>
    %132 = arith.extui %131 : vector<16x256xi1> to vector<16x256xi32>
    %133 = arith.sitofp %132 : vector<16x256xi32> to vector<16x256xf32>
    %134 = vector.broadcast %126 : vector<1x256xf32> to vector<16x256xf32>
    %135 = arith.mulf %134, %133 : vector<16x256xf32>
    %cst_31 = arith.constant 1.000000e+00 : f32
    %136 = vector.broadcast %cst_31 : f32 to vector<1x256xf32>
    %137 = arith.addf %121, %136 : vector<1x256xf32>
    %138 = vector.broadcast %29 : vector<16x1xf32> to vector<16x256xf32>
    %139 = vector.broadcast %137 : vector<1x256xf32> to vector<16x256xf32>
    %140 = arith.cmpf oeq, %138, %139 : vector<16x256xf32>
    %141 = arith.extui %140 : vector<16x256xi1> to vector<16x256xi32>
    %142 = arith.sitofp %141 : vector<16x256xi32> to vector<16x256xf32>
    %143 = vector.broadcast %123 : vector<1x256xf32> to vector<16x256xf32>
    %144 = arith.mulf %143, %142 : vector<16x256xf32>
    %145 = arith.addf %135, %144 : vector<16x256xf32>
    %146 = arith.mulf %128, %106 : vector<1x256xf32>
    %147 = vector.broadcast %31 : vector<16x1xf32> to vector<16x256xf32>
    %148 = vector.broadcast %122 : vector<1x256xf32> to vector<16x256xf32>
    %149 = arith.cmpf oeq, %147, %148 : vector<16x256xf32>
    %150 = arith.extui %149 : vector<16x256xi1> to vector<16x256xi32>
    %151 = arith.sitofp %150 : vector<16x256xi32> to vector<16x256xf32>
    %152 = vector.broadcast %146 : vector<1x256xf32> to vector<16x256xf32>
    %153 = arith.mulf %152, %151 : vector<16x256xf32>
    %154 = arith.mulf %124, %106 : vector<1x256xf32>
    %cst_32 = arith.constant 1.000000e+00 : f32
    %155 = vector.broadcast %cst_32 : f32 to vector<1x256xf32>
    %156 = arith.addf %122, %155 : vector<1x256xf32>
    %157 = vector.broadcast %31 : vector<16x1xf32> to vector<16x256xf32>
    %158 = vector.broadcast %156 : vector<1x256xf32> to vector<16x256xf32>
    %159 = arith.cmpf oeq, %157, %158 : vector<16x256xf32>
    %160 = arith.extui %159 : vector<16x256xi1> to vector<16x256xi32>
    %161 = arith.sitofp %160 : vector<16x256xi32> to vector<16x256xf32>
    %162 = vector.broadcast %154 : vector<1x256xf32> to vector<16x256xf32>
    %163 = arith.mulf %162, %161 : vector<16x256xf32>
    %164 = arith.addf %153, %163 : vector<16x256xf32>
    %165 = vector.shape_cast %145 : vector<16x256xf32> to vector<16x1x256xf32>
    %166 = vector.shape_cast %164 : vector<16x256xf32> to vector<1x16x256xf32>
    %167 = vector.broadcast %165 : vector<16x1x256xf32> to vector<16x16x256xf32>
    %168 = vector.broadcast %166 : vector<1x16x256xf32> to vector<16x16x256xf32>
    %169 = arith.mulf %167, %168 : vector<16x16x256xf32>
    %170 = vector.shape_cast %169 : vector<16x16x256xf32> to vector<256x256xf32>
    %171 = vector.extract_strided_slice %3 {offsets = [0, 256], sizes = [8, 256], strides = [1, 1]} : vector<8x2304xbf16> to vector<8x256xbf16>
    %172 = arith.truncf %170 : vector<256x256xf32> to vector<256x256xbf16>
    %cst_33 = arith.constant dense<0.000000e+00> : vector<8x256xf32>
    %173 = tpu.matmul %171, %172, %cst_33 {dimension_numbers = #tpu.dot_dimension_numbers<[1], [0], [0], [1], [0, 0, 1, 1], [], []>} : vector<8x256xbf16>, vector<256x256xbf16>, vector<8x256xf32> -> vector<8x256xf32>
    %174 = arith.addf %103, %173 : vector<8x256xf32>
    %175 = vector.extract_strided_slice %1 {offsets = [2, 0], sizes = [1, 256], strides = [1, 1]} : vector<27x256xf32> to vector<1x256xf32>
    %176 = vector.extract_strided_slice %1 {offsets = [11, 0], sizes = [1, 256], strides = [1, 1]} : vector<27x256xf32> to vector<1x256xf32>
    %177 = vector.extract_strided_slice %1 {offsets = [20, 0], sizes = [1, 256], strides = [1, 1]} : vector<27x256xf32> to vector<1x256xf32>
    %cst_34 = arith.constant 1.000000e+00 : f32
    %178 = vector.broadcast %cst_34 : f32 to vector<1x256xf32>
    %179 = arith.mulf %24, %178 : vector<1x256xf32>
    %cst_35 = arith.constant 1.000000e+00 : f32
    %180 = vector.broadcast %cst_35 : f32 to vector<1x256xf32>
    %181 = arith.subf %179, %180 : vector<1x256xf32>
    %cst_36 = arith.constant 0.000000e+00 : f32
    %182 = vector.broadcast %cst_36 : f32 to vector<1x256xf32>
    %183 = arith.addf %181, %182 : vector<1x256xf32>
    %184 = arith.addf %183, %175 : vector<1x256xf32>
    %cst_37 = arith.constant 1.000000e+00 : f32
    %185 = vector.broadcast %cst_37 : f32 to vector<1x256xf32>
    %186 = arith.mulf %27, %185 : vector<1x256xf32>
    %cst_38 = arith.constant 1.000000e+00 : f32
    %187 = vector.broadcast %cst_38 : f32 to vector<1x256xf32>
    %188 = arith.subf %186, %187 : vector<1x256xf32>
    %cst_39 = arith.constant 2.000000e+00 : f32
    %189 = vector.broadcast %cst_39 : f32 to vector<1x256xf32>
    %190 = arith.addf %188, %189 : vector<1x256xf32>
    %191 = arith.addf %190, %176 : vector<1x256xf32>
    %192 = math.floor %184 : vector<1x256xf32>
    %193 = math.floor %191 : vector<1x256xf32>
    %194 = arith.subf %184, %192 : vector<1x256xf32>
    %195 = arith.subf %191, %193 : vector<1x256xf32>
    %cst_40 = arith.constant 1.000000e+00 : f32
    %196 = vector.broadcast %cst_40 : f32 to vector<1x256xf32>
    %197 = arith.subf %196, %194 : vector<1x256xf32>
    %cst_41 = arith.constant 1.000000e+00 : f32
    %198 = vector.broadcast %cst_41 : f32 to vector<1x256xf32>
    %199 = arith.subf %198, %195 : vector<1x256xf32>
    %200 = vector.broadcast %29 : vector<16x1xf32> to vector<16x256xf32>
    %201 = vector.broadcast %192 : vector<1x256xf32> to vector<16x256xf32>
    %202 = arith.cmpf oeq, %200, %201 : vector<16x256xf32>
    %203 = arith.extui %202 : vector<16x256xi1> to vector<16x256xi32>
    %204 = arith.sitofp %203 : vector<16x256xi32> to vector<16x256xf32>
    %205 = vector.broadcast %197 : vector<1x256xf32> to vector<16x256xf32>
    %206 = arith.mulf %205, %204 : vector<16x256xf32>
    %cst_42 = arith.constant 1.000000e+00 : f32
    %207 = vector.broadcast %cst_42 : f32 to vector<1x256xf32>
    %208 = arith.addf %192, %207 : vector<1x256xf32>
    %209 = vector.broadcast %29 : vector<16x1xf32> to vector<16x256xf32>
    %210 = vector.broadcast %208 : vector<1x256xf32> to vector<16x256xf32>
    %211 = arith.cmpf oeq, %209, %210 : vector<16x256xf32>
    %212 = arith.extui %211 : vector<16x256xi1> to vector<16x256xi32>
    %213 = arith.sitofp %212 : vector<16x256xi32> to vector<16x256xf32>
    %214 = vector.broadcast %194 : vector<1x256xf32> to vector<16x256xf32>
    %215 = arith.mulf %214, %213 : vector<16x256xf32>
    %216 = arith.addf %206, %215 : vector<16x256xf32>
    %217 = arith.mulf %199, %177 : vector<1x256xf32>
    %218 = vector.broadcast %31 : vector<16x1xf32> to vector<16x256xf32>
    %219 = vector.broadcast %193 : vector<1x256xf32> to vector<16x256xf32>
    %220 = arith.cmpf oeq, %218, %219 : vector<16x256xf32>
    %221 = arith.extui %220 : vector<16x256xi1> to vector<16x256xi32>
    %222 = arith.sitofp %221 : vector<16x256xi32> to vector<16x256xf32>
    %223 = vector.broadcast %217 : vector<1x256xf32> to vector<16x256xf32>
    %224 = arith.mulf %223, %222 : vector<16x256xf32>
    %225 = arith.mulf %195, %177 : vector<1x256xf32>
    %cst_43 = arith.constant 1.000000e+00 : f32
    %226 = vector.broadcast %cst_43 : f32 to vector<1x256xf32>
    %227 = arith.addf %193, %226 : vector<1x256xf32>
    %228 = vector.broadcast %31 : vector<16x1xf32> to vector<16x256xf32>
    %229 = vector.broadcast %227 : vector<1x256xf32> to vector<16x256xf32>
    %230 = arith.cmpf oeq, %228, %229 : vector<16x256xf32>
    %231 = arith.extui %230 : vector<16x256xi1> to vector<16x256xi32>
    %232 = arith.sitofp %231 : vector<16x256xi32> to vector<16x256xf32>
    %233 = vector.broadcast %225 : vector<1x256xf32> to vector<16x256xf32>
    %234 = arith.mulf %233, %232 : vector<16x256xf32>
    %235 = arith.addf %224, %234 : vector<16x256xf32>
    %236 = vector.shape_cast %216 : vector<16x256xf32> to vector<16x1x256xf32>
    %237 = vector.shape_cast %235 : vector<16x256xf32> to vector<1x16x256xf32>
    %238 = vector.broadcast %236 : vector<16x1x256xf32> to vector<16x16x256xf32>
    %239 = vector.broadcast %237 : vector<1x16x256xf32> to vector<16x16x256xf32>
    %240 = arith.mulf %238, %239 : vector<16x16x256xf32>
    %241 = vector.shape_cast %240 : vector<16x16x256xf32> to vector<256x256xf32>
    %242 = vector.extract_strided_slice %3 {offsets = [0, 512], sizes = [8, 256], strides = [1, 1]} : vector<8x2304xbf16> to vector<8x256xbf16>
    %243 = arith.truncf %241 : vector<256x256xf32> to vector<256x256xbf16>
    %cst_44 = arith.constant dense<0.000000e+00> : vector<8x256xf32>
    %244 = tpu.matmul %242, %243, %cst_44 {dimension_numbers = #tpu.dot_dimension_numbers<[1], [0], [0], [1], [0, 0, 1, 1], [], []>} : vector<8x256xbf16>, vector<256x256xbf16>, vector<8x256xf32> -> vector<8x256xf32>
    %245 = arith.addf %174, %244 : vector<8x256xf32>
    %246 = vector.extract_strided_slice %1 {offsets = [3, 0], sizes = [1, 256], strides = [1, 1]} : vector<27x256xf32> to vector<1x256xf32>
    %247 = vector.extract_strided_slice %1 {offsets = [12, 0], sizes = [1, 256], strides = [1, 1]} : vector<27x256xf32> to vector<1x256xf32>
    %248 = vector.extract_strided_slice %1 {offsets = [21, 0], sizes = [1, 256], strides = [1, 1]} : vector<27x256xf32> to vector<1x256xf32>
    %cst_45 = arith.constant 1.000000e+00 : f32
    %249 = vector.broadcast %cst_45 : f32 to vector<1x256xf32>
    %250 = arith.mulf %24, %249 : vector<1x256xf32>
    %cst_46 = arith.constant 1.000000e+00 : f32
    %251 = vector.broadcast %cst_46 : f32 to vector<1x256xf32>
    %252 = arith.subf %250, %251 : vector<1x256xf32>
    %cst_47 = arith.constant 1.000000e+00 : f32
    %253 = vector.broadcast %cst_47 : f32 to vector<1x256xf32>
    %254 = arith.addf %252, %253 : vector<1x256xf32>
    %255 = arith.addf %254, %246 : vector<1x256xf32>
    %cst_48 = arith.constant 1.000000e+00 : f32
    %256 = vector.broadcast %cst_48 : f32 to vector<1x256xf32>
    %257 = arith.mulf %27, %256 : vector<1x256xf32>
    %cst_49 = arith.constant 1.000000e+00 : f32
    %258 = vector.broadcast %cst_49 : f32 to vector<1x256xf32>
    %259 = arith.subf %257, %258 : vector<1x256xf32>
    %cst_50 = arith.constant 0.000000e+00 : f32
    %260 = vector.broadcast %cst_50 : f32 to vector<1x256xf32>
    %261 = arith.addf %259, %260 : vector<1x256xf32>
    %262 = arith.addf %261, %247 : vector<1x256xf32>
    %263 = math.floor %255 : vector<1x256xf32>
    %264 = math.floor %262 : vector<1x256xf32>
    %265 = arith.subf %255, %263 : vector<1x256xf32>
    %266 = arith.subf %262, %264 : vector<1x256xf32>
    %cst_51 = arith.constant 1.000000e+00 : f32
    %267 = vector.broadcast %cst_51 : f32 to vector<1x256xf32>
    %268 = arith.subf %267, %265 : vector<1x256xf32>
    %cst_52 = arith.constant 1.000000e+00 : f32
    %269 = vector.broadcast %cst_52 : f32 to vector<1x256xf32>
    %270 = arith.subf %269, %266 : vector<1x256xf32>
    %271 = vector.broadcast %29 : vector<16x1xf32> to vector<16x256xf32>
    %272 = vector.broadcast %263 : vector<1x256xf32> to vector<16x256xf32>
    %273 = arith.cmpf oeq, %271, %272 : vector<16x256xf32>
    %274 = arith.extui %273 : vector<16x256xi1> to vector<16x256xi32>
    %275 = arith.sitofp %274 : vector<16x256xi32> to vector<16x256xf32>
    %276 = vector.broadcast %268 : vector<1x256xf32> to vector<16x256xf32>
    %277 = arith.mulf %276, %275 : vector<16x256xf32>
    %cst_53 = arith.constant 1.000000e+00 : f32
    %278 = vector.broadcast %cst_53 : f32 to vector<1x256xf32>
    %279 = arith.addf %263, %278 : vector<1x256xf32>
    %280 = vector.broadcast %29 : vector<16x1xf32> to vector<16x256xf32>
    %281 = vector.broadcast %279 : vector<1x256xf32> to vector<16x256xf32>
    %282 = arith.cmpf oeq, %280, %281 : vector<16x256xf32>
    %283 = arith.extui %282 : vector<16x256xi1> to vector<16x256xi32>
    %284 = arith.sitofp %283 : vector<16x256xi32> to vector<16x256xf32>
    %285 = vector.broadcast %265 : vector<1x256xf32> to vector<16x256xf32>
    %286 = arith.mulf %285, %284 : vector<16x256xf32>
    %287 = arith.addf %277, %286 : vector<16x256xf32>
    %288 = arith.mulf %270, %248 : vector<1x256xf32>
    %289 = vector.broadcast %31 : vector<16x1xf32> to vector<16x256xf32>
    %290 = vector.broadcast %264 : vector<1x256xf32> to vector<16x256xf32>
    %291 = arith.cmpf oeq, %289, %290 : vector<16x256xf32>
    %292 = arith.extui %291 : vector<16x256xi1> to vector<16x256xi32>
    %293 = arith.sitofp %292 : vector<16x256xi32> to vector<16x256xf32>
    %294 = vector.broadcast %288 : vector<1x256xf32> to vector<16x256xf32>
    %295 = arith.mulf %294, %293 : vector<16x256xf32>
    %296 = arith.mulf %266, %248 : vector<1x256xf32>
    %cst_54 = arith.constant 1.000000e+00 : f32
    %297 = vector.broadcast %cst_54 : f32 to vector<1x256xf32>
    %298 = arith.addf %264, %297 : vector<1x256xf32>
    %299 = vector.broadcast %31 : vector<16x1xf32> to vector<16x256xf32>
    %300 = vector.broadcast %298 : vector<1x256xf32> to vector<16x256xf32>
    %301 = arith.cmpf oeq, %299, %300 : vector<16x256xf32>
    %302 = arith.extui %301 : vector<16x256xi1> to vector<16x256xi32>
    %303 = arith.sitofp %302 : vector<16x256xi32> to vector<16x256xf32>
    %304 = vector.broadcast %296 : vector<1x256xf32> to vector<16x256xf32>
    %305 = arith.mulf %304, %303 : vector<16x256xf32>
    %306 = arith.addf %295, %305 : vector<16x256xf32>
    %307 = vector.shape_cast %287 : vector<16x256xf32> to vector<16x1x256xf32>
    %308 = vector.shape_cast %306 : vector<16x256xf32> to vector<1x16x256xf32>
    %309 = vector.broadcast %307 : vector<16x1x256xf32> to vector<16x16x256xf32>
    %310 = vector.broadcast %308 : vector<1x16x256xf32> to vector<16x16x256xf32>
    %311 = arith.mulf %309, %310 : vector<16x16x256xf32>
    %312 = vector.shape_cast %311 : vector<16x16x256xf32> to vector<256x256xf32>
    %313 = vector.extract_strided_slice %3 {offsets = [0, 768], sizes = [8, 256], strides = [1, 1]} : vector<8x2304xbf16> to vector<8x256xbf16>
    %314 = arith.truncf %312 : vector<256x256xf32> to vector<256x256xbf16>
    %cst_55 = arith.constant dense<0.000000e+00> : vector<8x256xf32>
    %315 = tpu.matmul %313, %314, %cst_55 {dimension_numbers = #tpu.dot_dimension_numbers<[1], [0], [0], [1], [0, 0, 1, 1], [], []>} : vector<8x256xbf16>, vector<256x256xbf16>, vector<8x256xf32> -> vector<8x256xf32>
    %316 = arith.addf %245, %315 : vector<8x256xf32>
    %317 = vector.extract_strided_slice %1 {offsets = [4, 0], sizes = [1, 256], strides = [1, 1]} : vector<27x256xf32> to vector<1x256xf32>
    %318 = vector.extract_strided_slice %1 {offsets = [13, 0], sizes = [1, 256], strides = [1, 1]} : vector<27x256xf32> to vector<1x256xf32>
    %319 = vector.extract_strided_slice %1 {offsets = [22, 0], sizes = [1, 256], strides = [1, 1]} : vector<27x256xf32> to vector<1x256xf32>
    %cst_56 = arith.constant 1.000000e+00 : f32
    %320 = vector.broadcast %cst_56 : f32 to vector<1x256xf32>
    %321 = arith.mulf %24, %320 : vector<1x256xf32>
    %cst_57 = arith.constant 1.000000e+00 : f32
    %322 = vector.broadcast %cst_57 : f32 to vector<1x256xf32>
    %323 = arith.subf %321, %322 : vector<1x256xf32>
    %cst_58 = arith.constant 1.000000e+00 : f32
    %324 = vector.broadcast %cst_58 : f32 to vector<1x256xf32>
    %325 = arith.addf %323, %324 : vector<1x256xf32>
    %326 = arith.addf %325, %317 : vector<1x256xf32>
    %cst_59 = arith.constant 1.000000e+00 : f32
    %327 = vector.broadcast %cst_59 : f32 to vector<1x256xf32>
    %328 = arith.mulf %27, %327 : vector<1x256xf32>
    %cst_60 = arith.constant 1.000000e+00 : f32
    %329 = vector.broadcast %cst_60 : f32 to vector<1x256xf32>
    %330 = arith.subf %328, %329 : vector<1x256xf32>
    %cst_61 = arith.constant 1.000000e+00 : f32
    %331 = vector.broadcast %cst_61 : f32 to vector<1x256xf32>
    %332 = arith.addf %330, %331 : vector<1x256xf32>
    %333 = arith.addf %332, %318 : vector<1x256xf32>
    %334 = math.floor %326 : vector<1x256xf32>
    %335 = math.floor %333 : vector<1x256xf32>
    %336 = arith.subf %326, %334 : vector<1x256xf32>
    %337 = arith.subf %333, %335 : vector<1x256xf32>
    %cst_62 = arith.constant 1.000000e+00 : f32
    %338 = vector.broadcast %cst_62 : f32 to vector<1x256xf32>
    %339 = arith.subf %338, %336 : vector<1x256xf32>
    %cst_63 = arith.constant 1.000000e+00 : f32
    %340 = vector.broadcast %cst_63 : f32 to vector<1x256xf32>
    %341 = arith.subf %340, %337 : vector<1x256xf32>
    %342 = vector.broadcast %29 : vector<16x1xf32> to vector<16x256xf32>
    %343 = vector.broadcast %334 : vector<1x256xf32> to vector<16x256xf32>
    %344 = arith.cmpf oeq, %342, %343 : vector<16x256xf32>
    %345 = arith.extui %344 : vector<16x256xi1> to vector<16x256xi32>
    %346 = arith.sitofp %345 : vector<16x256xi32> to vector<16x256xf32>
    %347 = vector.broadcast %339 : vector<1x256xf32> to vector<16x256xf32>
    %348 = arith.mulf %347, %346 : vector<16x256xf32>
    %cst_64 = arith.constant 1.000000e+00 : f32
    %349 = vector.broadcast %cst_64 : f32 to vector<1x256xf32>
    %350 = arith.addf %334, %349 : vector<1x256xf32>
    %351 = vector.broadcast %29 : vector<16x1xf32> to vector<16x256xf32>
    %352 = vector.broadcast %350 : vector<1x256xf32> to vector<16x256xf32>
    %353 = arith.cmpf oeq, %351, %352 : vector<16x256xf32>
    %354 = arith.extui %353 : vector<16x256xi1> to vector<16x256xi32>
    %355 = arith.sitofp %354 : vector<16x256xi32> to vector<16x256xf32>
    %356 = vector.broadcast %336 : vector<1x256xf32> to vector<16x256xf32>
    %357 = arith.mulf %356, %355 : vector<16x256xf32>
    %358 = arith.addf %348, %357 : vector<16x256xf32>
    %359 = arith.mulf %341, %319 : vector<1x256xf32>
    %360 = vector.broadcast %31 : vector<16x1xf32> to vector<16x256xf32>
    %361 = vector.broadcast %335 : vector<1x256xf32> to vector<16x256xf32>
    %362 = arith.cmpf oeq, %360, %361 : vector<16x256xf32>
    %363 = arith.extui %362 : vector<16x256xi1> to vector<16x256xi32>
    %364 = arith.sitofp %363 : vector<16x256xi32> to vector<16x256xf32>
    %365 = vector.broadcast %359 : vector<1x256xf32> to vector<16x256xf32>
    %366 = arith.mulf %365, %364 : vector<16x256xf32>
    %367 = arith.mulf %337, %319 : vector<1x256xf32>
    %cst_65 = arith.constant 1.000000e+00 : f32
    %368 = vector.broadcast %cst_65 : f32 to vector<1x256xf32>
    %369 = arith.addf %335, %368 : vector<1x256xf32>
    %370 = vector.broadcast %31 : vector<16x1xf32> to vector<16x256xf32>
    %371 = vector.broadcast %369 : vector<1x256xf32> to vector<16x256xf32>
    %372 = arith.cmpf oeq, %370, %371 : vector<16x256xf32>
    %373 = arith.extui %372 : vector<16x256xi1> to vector<16x256xi32>
    %374 = arith.sitofp %373 : vector<16x256xi32> to vector<16x256xf32>
    %375 = vector.broadcast %367 : vector<1x256xf32> to vector<16x256xf32>
    %376 = arith.mulf %375, %374 : vector<16x256xf32>
    %377 = arith.addf %366, %376 : vector<16x256xf32>
    %378 = vector.shape_cast %358 : vector<16x256xf32> to vector<16x1x256xf32>
    %379 = vector.shape_cast %377 : vector<16x256xf32> to vector<1x16x256xf32>
    %380 = vector.broadcast %378 : vector<16x1x256xf32> to vector<16x16x256xf32>
    %381 = vector.broadcast %379 : vector<1x16x256xf32> to vector<16x16x256xf32>
    %382 = arith.mulf %380, %381 : vector<16x16x256xf32>
    %383 = vector.shape_cast %382 : vector<16x16x256xf32> to vector<256x256xf32>
    %384 = vector.extract_strided_slice %3 {offsets = [0, 1024], sizes = [8, 256], strides = [1, 1]} : vector<8x2304xbf16> to vector<8x256xbf16>
    %385 = arith.truncf %383 : vector<256x256xf32> to vector<256x256xbf16>
    %cst_66 = arith.constant dense<0.000000e+00> : vector<8x256xf32>
    %386 = tpu.matmul %384, %385, %cst_66 {dimension_numbers = #tpu.dot_dimension_numbers<[1], [0], [0], [1], [0, 0, 1, 1], [], []>} : vector<8x256xbf16>, vector<256x256xbf16>, vector<8x256xf32> -> vector<8x256xf32>
    %387 = arith.addf %316, %386 : vector<8x256xf32>
    %388 = vector.extract_strided_slice %1 {offsets = [5, 0], sizes = [1, 256], strides = [1, 1]} : vector<27x256xf32> to vector<1x256xf32>
    %389 = vector.extract_strided_slice %1 {offsets = [14, 0], sizes = [1, 256], strides = [1, 1]} : vector<27x256xf32> to vector<1x256xf32>
    %390 = vector.extract_strided_slice %1 {offsets = [23, 0], sizes = [1, 256], strides = [1, 1]} : vector<27x256xf32> to vector<1x256xf32>
    %cst_67 = arith.constant 1.000000e+00 : f32
    %391 = vector.broadcast %cst_67 : f32 to vector<1x256xf32>
    %392 = arith.mulf %24, %391 : vector<1x256xf32>
    %cst_68 = arith.constant 1.000000e+00 : f32
    %393 = vector.broadcast %cst_68 : f32 to vector<1x256xf32>
    %394 = arith.subf %392, %393 : vector<1x256xf32>
    %cst_69 = arith.constant 1.000000e+00 : f32
    %395 = vector.broadcast %cst_69 : f32 to vector<1x256xf32>
    %396 = arith.addf %394, %395 : vector<1x256xf32>
    %397 = arith.addf %396, %388 : vector<1x256xf32>
    %cst_70 = arith.constant 1.000000e+00 : f32
    %398 = vector.broadcast %cst_70 : f32 to vector<1x256xf32>
    %399 = arith.mulf %27, %398 : vector<1x256xf32>
    %cst_71 = arith.constant 1.000000e+00 : f32
    %400 = vector.broadcast %cst_71 : f32 to vector<1x256xf32>
    %401 = arith.subf %399, %400 : vector<1x256xf32>
    %cst_72 = arith.constant 2.000000e+00 : f32
    %402 = vector.broadcast %cst_72 : f32 to vector<1x256xf32>
    %403 = arith.addf %401, %402 : vector<1x256xf32>
    %404 = arith.addf %403, %389 : vector<1x256xf32>
    %405 = math.floor %397 : vector<1x256xf32>
    %406 = math.floor %404 : vector<1x256xf32>
    %407 = arith.subf %397, %405 : vector<1x256xf32>
    %408 = arith.subf %404, %406 : vector<1x256xf32>
    %cst_73 = arith.constant 1.000000e+00 : f32
    %409 = vector.broadcast %cst_73 : f32 to vector<1x256xf32>
    %410 = arith.subf %409, %407 : vector<1x256xf32>
    %cst_74 = arith.constant 1.000000e+00 : f32
    %411 = vector.broadcast %cst_74 : f32 to vector<1x256xf32>
    %412 = arith.subf %411, %408 : vector<1x256xf32>
    %413 = vector.broadcast %29 : vector<16x1xf32> to vector<16x256xf32>
    %414 = vector.broadcast %405 : vector<1x256xf32> to vector<16x256xf32>
    %415 = arith.cmpf oeq, %413, %414 : vector<16x256xf32>
    %416 = arith.extui %415 : vector<16x256xi1> to vector<16x256xi32>
    %417 = arith.sitofp %416 : vector<16x256xi32> to vector<16x256xf32>
    %418 = vector.broadcast %410 : vector<1x256xf32> to vector<16x256xf32>
    %419 = arith.mulf %418, %417 : vector<16x256xf32>
    %cst_75 = arith.constant 1.000000e+00 : f32
    %420 = vector.broadcast %cst_75 : f32 to vector<1x256xf32>
    %421 = arith.addf %405, %420 : vector<1x256xf32>
    %422 = vector.broadcast %29 : vector<16x1xf32> to vector<16x256xf32>
    %423 = vector.broadcast %421 : vector<1x256xf32> to vector<16x256xf32>
    %424 = arith.cmpf oeq, %422, %423 : vector<16x256xf32>
    %425 = arith.extui %424 : vector<16x256xi1> to vector<16x256xi32>
    %426 = arith.sitofp %425 : vector<16x256xi32> to vector<16x256xf32>
    %427 = vector.broadcast %407 : vector<1x256xf32> to vector<16x256xf32>
    %428 = arith.mulf %427, %426 : vector<16x256xf32>
    %429 = arith.addf %419, %428 : vector<16x256xf32>
    %430 = arith.mulf %412, %390 : vector<1x256xf32>
    %431 = vector.broadcast %31 : vector<16x1xf32> to vector<16x256xf32>
    %432 = vector.broadcast %406 : vector<1x256xf32> to vector<16x256xf32>
    %433 = arith.cmpf oeq, %431, %432 : vector<16x256xf32>
    %434 = arith.extui %433 : vector<16x256xi1> to vector<16x256xi32>
    %435 = arith.sitofp %434 : vector<16x256xi32> to vector<16x256xf32>
    %436 = vector.broadcast %430 : vector<1x256xf32> to vector<16x256xf32>
    %437 = arith.mulf %436, %435 : vector<16x256xf32>
    %438 = arith.mulf %408, %390 : vector<1x256xf32>
    %cst_76 = arith.constant 1.000000e+00 : f32
    %439 = vector.broadcast %cst_76 : f32 to vector<1x256xf32>
    %440 = arith.addf %406, %439 : vector<1x256xf32>
    %441 = vector.broadcast %31 : vector<16x1xf32> to vector<16x256xf32>
    %442 = vector.broadcast %440 : vector<1x256xf32> to vector<16x256xf32>
    %443 = arith.cmpf oeq, %441, %442 : vector<16x256xf32>
    %444 = arith.extui %443 : vector<16x256xi1> to vector<16x256xi32>
    %445 = arith.sitofp %444 : vector<16x256xi32> to vector<16x256xf32>
    %446 = vector.broadcast %438 : vector<1x256xf32> to vector<16x256xf32>
    %447 = arith.mulf %446, %445 : vector<16x256xf32>
    %448 = arith.addf %437, %447 : vector<16x256xf32>
    %449 = vector.shape_cast %429 : vector<16x256xf32> to vector<16x1x256xf32>
    %450 = vector.shape_cast %448 : vector<16x256xf32> to vector<1x16x256xf32>
    %451 = vector.broadcast %449 : vector<16x1x256xf32> to vector<16x16x256xf32>
    %452 = vector.broadcast %450 : vector<1x16x256xf32> to vector<16x16x256xf32>
    %453 = arith.mulf %451, %452 : vector<16x16x256xf32>
    %454 = vector.shape_cast %453 : vector<16x16x256xf32> to vector<256x256xf32>
    %455 = vector.extract_strided_slice %3 {offsets = [0, 1280], sizes = [8, 256], strides = [1, 1]} : vector<8x2304xbf16> to vector<8x256xbf16>
    %456 = arith.truncf %454 : vector<256x256xf32> to vector<256x256xbf16>
    %cst_77 = arith.constant dense<0.000000e+00> : vector<8x256xf32>
    %457 = tpu.matmul %455, %456, %cst_77 {dimension_numbers = #tpu.dot_dimension_numbers<[1], [0], [0], [1], [0, 0, 1, 1], [], []>} : vector<8x256xbf16>, vector<256x256xbf16>, vector<8x256xf32> -> vector<8x256xf32>
    %458 = arith.addf %387, %457 : vector<8x256xf32>
    %459 = vector.extract_strided_slice %1 {offsets = [6, 0], sizes = [1, 256], strides = [1, 1]} : vector<27x256xf32> to vector<1x256xf32>
    %460 = vector.extract_strided_slice %1 {offsets = [15, 0], sizes = [1, 256], strides = [1, 1]} : vector<27x256xf32> to vector<1x256xf32>
    %461 = vector.extract_strided_slice %1 {offsets = [24, 0], sizes = [1, 256], strides = [1, 1]} : vector<27x256xf32> to vector<1x256xf32>
    %cst_78 = arith.constant 1.000000e+00 : f32
    %462 = vector.broadcast %cst_78 : f32 to vector<1x256xf32>
    %463 = arith.mulf %24, %462 : vector<1x256xf32>
    %cst_79 = arith.constant 1.000000e+00 : f32
    %464 = vector.broadcast %cst_79 : f32 to vector<1x256xf32>
    %465 = arith.subf %463, %464 : vector<1x256xf32>
    %cst_80 = arith.constant 2.000000e+00 : f32
    %466 = vector.broadcast %cst_80 : f32 to vector<1x256xf32>
    %467 = arith.addf %465, %466 : vector<1x256xf32>
    %468 = arith.addf %467, %459 : vector<1x256xf32>
    %cst_81 = arith.constant 1.000000e+00 : f32
    %469 = vector.broadcast %cst_81 : f32 to vector<1x256xf32>
    %470 = arith.mulf %27, %469 : vector<1x256xf32>
    %cst_82 = arith.constant 1.000000e+00 : f32
    %471 = vector.broadcast %cst_82 : f32 to vector<1x256xf32>
    %472 = arith.subf %470, %471 : vector<1x256xf32>
    %cst_83 = arith.constant 0.000000e+00 : f32
    %473 = vector.broadcast %cst_83 : f32 to vector<1x256xf32>
    %474 = arith.addf %472, %473 : vector<1x256xf32>
    %475 = arith.addf %474, %460 : vector<1x256xf32>
    %476 = math.floor %468 : vector<1x256xf32>
    %477 = math.floor %475 : vector<1x256xf32>
    %478 = arith.subf %468, %476 : vector<1x256xf32>
    %479 = arith.subf %475, %477 : vector<1x256xf32>
    %cst_84 = arith.constant 1.000000e+00 : f32
    %480 = vector.broadcast %cst_84 : f32 to vector<1x256xf32>
    %481 = arith.subf %480, %478 : vector<1x256xf32>
    %cst_85 = arith.constant 1.000000e+00 : f32
    %482 = vector.broadcast %cst_85 : f32 to vector<1x256xf32>
    %483 = arith.subf %482, %479 : vector<1x256xf32>
    %484 = vector.broadcast %29 : vector<16x1xf32> to vector<16x256xf32>
    %485 = vector.broadcast %476 : vector<1x256xf32> to vector<16x256xf32>
    %486 = arith.cmpf oeq, %484, %485 : vector<16x256xf32>
    %487 = arith.extui %486 : vector<16x256xi1> to vector<16x256xi32>
    %488 = arith.sitofp %487 : vector<16x256xi32> to vector<16x256xf32>
    %489 = vector.broadcast %481 : vector<1x256xf32> to vector<16x256xf32>
    %490 = arith.mulf %489, %488 : vector<16x256xf32>
    %cst_86 = arith.constant 1.000000e+00 : f32
    %491 = vector.broadcast %cst_86 : f32 to vector<1x256xf32>
    %492 = arith.addf %476, %491 : vector<1x256xf32>
    %493 = vector.broadcast %29 : vector<16x1xf32> to vector<16x256xf32>
    %494 = vector.broadcast %492 : vector<1x256xf32> to vector<16x256xf32>
    %495 = arith.cmpf oeq, %493, %494 : vector<16x256xf32>
    %496 = arith.extui %495 : vector<16x256xi1> to vector<16x256xi32>
    %497 = arith.sitofp %496 : vector<16x256xi32> to vector<16x256xf32>
    %498 = vector.broadcast %478 : vector<1x256xf32> to vector<16x256xf32>
    %499 = arith.mulf %498, %497 : vector<16x256xf32>
    %500 = arith.addf %490, %499 : vector<16x256xf32>
    %501 = arith.mulf %483, %461 : vector<1x256xf32>
    %502 = vector.broadcast %31 : vector<16x1xf32> to vector<16x256xf32>
    %503 = vector.broadcast %477 : vector<1x256xf32> to vector<16x256xf32>
    %504 = arith.cmpf oeq, %502, %503 : vector<16x256xf32>
    %505 = arith.extui %504 : vector<16x256xi1> to vector<16x256xi32>
    %506 = arith.sitofp %505 : vector<16x256xi32> to vector<16x256xf32>
    %507 = vector.broadcast %501 : vector<1x256xf32> to vector<16x256xf32>
    %508 = arith.mulf %507, %506 : vector<16x256xf32>
    %509 = arith.mulf %479, %461 : vector<1x256xf32>
    %cst_87 = arith.constant 1.000000e+00 : f32
    %510 = vector.broadcast %cst_87 : f32 to vector<1x256xf32>
    %511 = arith.addf %477, %510 : vector<1x256xf32>
    %512 = vector.broadcast %31 : vector<16x1xf32> to vector<16x256xf32>
    %513 = vector.broadcast %511 : vector<1x256xf32> to vector<16x256xf32>
    %514 = arith.cmpf oeq, %512, %513 : vector<16x256xf32>
    %515 = arith.extui %514 : vector<16x256xi1> to vector<16x256xi32>
    %516 = arith.sitofp %515 : vector<16x256xi32> to vector<16x256xf32>
    %517 = vector.broadcast %509 : vector<1x256xf32> to vector<16x256xf32>
    %518 = arith.mulf %517, %516 : vector<16x256xf32>
    %519 = arith.addf %508, %518 : vector<16x256xf32>
    %520 = vector.shape_cast %500 : vector<16x256xf32> to vector<16x1x256xf32>
    %521 = vector.shape_cast %519 : vector<16x256xf32> to vector<1x16x256xf32>
    %522 = vector.broadcast %520 : vector<16x1x256xf32> to vector<16x16x256xf32>
    %523 = vector.broadcast %521 : vector<1x16x256xf32> to vector<16x16x256xf32>
    %524 = arith.mulf %522, %523 : vector<16x16x256xf32>
    %525 = vector.shape_cast %524 : vector<16x16x256xf32> to vector<256x256xf32>
    %526 = vector.extract_strided_slice %3 {offsets = [0, 1536], sizes = [8, 256], strides = [1, 1]} : vector<8x2304xbf16> to vector<8x256xbf16>
    %527 = arith.truncf %525 : vector<256x256xf32> to vector<256x256xbf16>
    %cst_88 = arith.constant dense<0.000000e+00> : vector<8x256xf32>
    %528 = tpu.matmul %526, %527, %cst_88 {dimension_numbers = #tpu.dot_dimension_numbers<[1], [0], [0], [1], [0, 0, 1, 1], [], []>} : vector<8x256xbf16>, vector<256x256xbf16>, vector<8x256xf32> -> vector<8x256xf32>
    %529 = arith.addf %458, %528 : vector<8x256xf32>
    %530 = vector.extract_strided_slice %1 {offsets = [7, 0], sizes = [1, 256], strides = [1, 1]} : vector<27x256xf32> to vector<1x256xf32>
    %531 = vector.extract_strided_slice %1 {offsets = [16, 0], sizes = [1, 256], strides = [1, 1]} : vector<27x256xf32> to vector<1x256xf32>
    %532 = vector.extract_strided_slice %1 {offsets = [25, 0], sizes = [1, 256], strides = [1, 1]} : vector<27x256xf32> to vector<1x256xf32>
    %cst_89 = arith.constant 1.000000e+00 : f32
    %533 = vector.broadcast %cst_89 : f32 to vector<1x256xf32>
    %534 = arith.mulf %24, %533 : vector<1x256xf32>
    %cst_90 = arith.constant 1.000000e+00 : f32
    %535 = vector.broadcast %cst_90 : f32 to vector<1x256xf32>
    %536 = arith.subf %534, %535 : vector<1x256xf32>
    %cst_91 = arith.constant 2.000000e+00 : f32
    %537 = vector.broadcast %cst_91 : f32 to vector<1x256xf32>
    %538 = arith.addf %536, %537 : vector<1x256xf32>
    %539 = arith.addf %538, %530 : vector<1x256xf32>
    %cst_92 = arith.constant 1.000000e+00 : f32
    %540 = vector.broadcast %cst_92 : f32 to vector<1x256xf32>
    %541 = arith.mulf %27, %540 : vector<1x256xf32>
    %cst_93 = arith.constant 1.000000e+00 : f32
    %542 = vector.broadcast %cst_93 : f32 to vector<1x256xf32>
    %543 = arith.subf %541, %542 : vector<1x256xf32>
    %cst_94 = arith.constant 1.000000e+00 : f32
    %544 = vector.broadcast %cst_94 : f32 to vector<1x256xf32>
    %545 = arith.addf %543, %544 : vector<1x256xf32>
    %546 = arith.addf %545, %531 : vector<1x256xf32>
    %547 = math.floor %539 : vector<1x256xf32>
    %548 = math.floor %546 : vector<1x256xf32>
    %549 = arith.subf %539, %547 : vector<1x256xf32>
    %550 = arith.subf %546, %548 : vector<1x256xf32>
    %cst_95 = arith.constant 1.000000e+00 : f32
    %551 = vector.broadcast %cst_95 : f32 to vector<1x256xf32>
    %552 = arith.subf %551, %549 : vector<1x256xf32>
    %cst_96 = arith.constant 1.000000e+00 : f32
    %553 = vector.broadcast %cst_96 : f32 to vector<1x256xf32>
    %554 = arith.subf %553, %550 : vector<1x256xf32>
    %555 = vector.broadcast %29 : vector<16x1xf32> to vector<16x256xf32>
    %556 = vector.broadcast %547 : vector<1x256xf32> to vector<16x256xf32>
    %557 = arith.cmpf oeq, %555, %556 : vector<16x256xf32>
    %558 = arith.extui %557 : vector<16x256xi1> to vector<16x256xi32>
    %559 = arith.sitofp %558 : vector<16x256xi32> to vector<16x256xf32>
    %560 = vector.broadcast %552 : vector<1x256xf32> to vector<16x256xf32>
    %561 = arith.mulf %560, %559 : vector<16x256xf32>
    %cst_97 = arith.constant 1.000000e+00 : f32
    %562 = vector.broadcast %cst_97 : f32 to vector<1x256xf32>
    %563 = arith.addf %547, %562 : vector<1x256xf32>
    %564 = vector.broadcast %29 : vector<16x1xf32> to vector<16x256xf32>
    %565 = vector.broadcast %563 : vector<1x256xf32> to vector<16x256xf32>
    %566 = arith.cmpf oeq, %564, %565 : vector<16x256xf32>
    %567 = arith.extui %566 : vector<16x256xi1> to vector<16x256xi32>
    %568 = arith.sitofp %567 : vector<16x256xi32> to vector<16x256xf32>
    %569 = vector.broadcast %549 : vector<1x256xf32> to vector<16x256xf32>
    %570 = arith.mulf %569, %568 : vector<16x256xf32>
    %571 = arith.addf %561, %570 : vector<16x256xf32>
    %572 = arith.mulf %554, %532 : vector<1x256xf32>
    %573 = vector.broadcast %31 : vector<16x1xf32> to vector<16x256xf32>
    %574 = vector.broadcast %548 : vector<1x256xf32> to vector<16x256xf32>
    %575 = arith.cmpf oeq, %573, %574 : vector<16x256xf32>
    %576 = arith.extui %575 : vector<16x256xi1> to vector<16x256xi32>
    %577 = arith.sitofp %576 : vector<16x256xi32> to vector<16x256xf32>
    %578 = vector.broadcast %572 : vector<1x256xf32> to vector<16x256xf32>
    %579 = arith.mulf %578, %577 : vector<16x256xf32>
    %580 = arith.mulf %550, %532 : vector<1x256xf32>
    %cst_98 = arith.constant 1.000000e+00 : f32
    %581 = vector.broadcast %cst_98 : f32 to vector<1x256xf32>
    %582 = arith.addf %548, %581 : vector<1x256xf32>
    %583 = vector.broadcast %31 : vector<16x1xf32> to vector<16x256xf32>
    %584 = vector.broadcast %582 : vector<1x256xf32> to vector<16x256xf32>
    %585 = arith.cmpf oeq, %583, %584 : vector<16x256xf32>
    %586 = arith.extui %585 : vector<16x256xi1> to vector<16x256xi32>
    %587 = arith.sitofp %586 : vector<16x256xi32> to vector<16x256xf32>
    %588 = vector.broadcast %580 : vector<1x256xf32> to vector<16x256xf32>
    %589 = arith.mulf %588, %587 : vector<16x256xf32>
    %590 = arith.addf %579, %589 : vector<16x256xf32>
    %591 = vector.shape_cast %571 : vector<16x256xf32> to vector<16x1x256xf32>
    %592 = vector.shape_cast %590 : vector<16x256xf32> to vector<1x16x256xf32>
    %593 = vector.broadcast %591 : vector<16x1x256xf32> to vector<16x16x256xf32>
    %594 = vector.broadcast %592 : vector<1x16x256xf32> to vector<16x16x256xf32>
    %595 = arith.mulf %593, %594 : vector<16x16x256xf32>
    %596 = vector.shape_cast %595 : vector<16x16x256xf32> to vector<256x256xf32>
    %597 = vector.extract_strided_slice %3 {offsets = [0, 1792], sizes = [8, 256], strides = [1, 1]} : vector<8x2304xbf16> to vector<8x256xbf16>
    %598 = arith.truncf %596 : vector<256x256xf32> to vector<256x256xbf16>
    %cst_99 = arith.constant dense<0.000000e+00> : vector<8x256xf32>
    %599 = tpu.matmul %597, %598, %cst_99 {dimension_numbers = #tpu.dot_dimension_numbers<[1], [0], [0], [1], [0, 0, 1, 1], [], []>} : vector<8x256xbf16>, vector<256x256xbf16>, vector<8x256xf32> -> vector<8x256xf32>
    %600 = arith.addf %529, %599 : vector<8x256xf32>
    %601 = vector.extract_strided_slice %1 {offsets = [8, 0], sizes = [1, 256], strides = [1, 1]} : vector<27x256xf32> to vector<1x256xf32>
    %602 = vector.extract_strided_slice %1 {offsets = [17, 0], sizes = [1, 256], strides = [1, 1]} : vector<27x256xf32> to vector<1x256xf32>
    %603 = vector.extract_strided_slice %1 {offsets = [26, 0], sizes = [1, 256], strides = [1, 1]} : vector<27x256xf32> to vector<1x256xf32>
    %cst_100 = arith.constant 1.000000e+00 : f32
    %604 = vector.broadcast %cst_100 : f32 to vector<1x256xf32>
    %605 = arith.mulf %24, %604 : vector<1x256xf32>
    %cst_101 = arith.constant 1.000000e+00 : f32
    %606 = vector.broadcast %cst_101 : f32 to vector<1x256xf32>
    %607 = arith.subf %605, %606 : vector<1x256xf32>
    %cst_102 = arith.constant 2.000000e+00 : f32
    %608 = vector.broadcast %cst_102 : f32 to vector<1x256xf32>
    %609 = arith.addf %607, %608 : vector<1x256xf32>
    %610 = arith.addf %609, %601 : vector<1x256xf32>
    %cst_103 = arith.constant 1.000000e+00 : f32
    %611 = vector.broadcast %cst_103 : f32 to vector<1x256xf32>
    %612 = arith.mulf %27, %611 : vector<1x256xf32>
    %cst_104 = arith.constant 1.000000e+00 : f32
    %613 = vector.broadcast %cst_104 : f32 to vector<1x256xf32>
    %614 = arith.subf %612, %613 : vector<1x256xf32>
    %cst_105 = arith.constant 2.000000e+00 : f32
    %615 = vector.broadcast %cst_105 : f32 to vector<1x256xf32>
    %616 = arith.addf %614, %615 : vector<1x256xf32>
    %617 = arith.addf %616, %602 : vector<1x256xf32>
    %618 = math.floor %610 : vector<1x256xf32>
    %619 = math.floor %617 : vector<1x256xf32>
    %620 = arith.subf %610, %618 : vector<1x256xf32>
    %621 = arith.subf %617, %619 : vector<1x256xf32>
    %cst_106 = arith.constant 1.000000e+00 : f32
    %622 = vector.broadcast %cst_106 : f32 to vector<1x256xf32>
    %623 = arith.subf %622, %620 : vector<1x256xf32>
    %cst_107 = arith.constant 1.000000e+00 : f32
    %624 = vector.broadcast %cst_107 : f32 to vector<1x256xf32>
    %625 = arith.subf %624, %621 : vector<1x256xf32>
    %626 = vector.broadcast %29 : vector<16x1xf32> to vector<16x256xf32>
    %627 = vector.broadcast %618 : vector<1x256xf32> to vector<16x256xf32>
    %628 = arith.cmpf oeq, %626, %627 : vector<16x256xf32>
    %629 = arith.extui %628 : vector<16x256xi1> to vector<16x256xi32>
    %630 = arith.sitofp %629 : vector<16x256xi32> to vector<16x256xf32>
    %631 = vector.broadcast %623 : vector<1x256xf32> to vector<16x256xf32>
    %632 = arith.mulf %631, %630 : vector<16x256xf32>
    %cst_108 = arith.constant 1.000000e+00 : f32
    %633 = vector.broadcast %cst_108 : f32 to vector<1x256xf32>
    %634 = arith.addf %618, %633 : vector<1x256xf32>
    %635 = vector.broadcast %29 : vector<16x1xf32> to vector<16x256xf32>
    %636 = vector.broadcast %634 : vector<1x256xf32> to vector<16x256xf32>
    %637 = arith.cmpf oeq, %635, %636 : vector<16x256xf32>
    %638 = arith.extui %637 : vector<16x256xi1> to vector<16x256xi32>
    %639 = arith.sitofp %638 : vector<16x256xi32> to vector<16x256xf32>
    %640 = vector.broadcast %620 : vector<1x256xf32> to vector<16x256xf32>
    %641 = arith.mulf %640, %639 : vector<16x256xf32>
    %642 = arith.addf %632, %641 : vector<16x256xf32>
    %643 = arith.mulf %625, %603 : vector<1x256xf32>
    %644 = vector.broadcast %31 : vector<16x1xf32> to vector<16x256xf32>
    %645 = vector.broadcast %619 : vector<1x256xf32> to vector<16x256xf32>
    %646 = arith.cmpf oeq, %644, %645 : vector<16x256xf32>
    %647 = arith.extui %646 : vector<16x256xi1> to vector<16x256xi32>
    %648 = arith.sitofp %647 : vector<16x256xi32> to vector<16x256xf32>
    %649 = vector.broadcast %643 : vector<1x256xf32> to vector<16x256xf32>
    %650 = arith.mulf %649, %648 : vector<16x256xf32>
    %651 = arith.mulf %621, %603 : vector<1x256xf32>
    %cst_109 = arith.constant 1.000000e+00 : f32
    %652 = vector.broadcast %cst_109 : f32 to vector<1x256xf32>
    %653 = arith.addf %619, %652 : vector<1x256xf32>
    %654 = vector.broadcast %31 : vector<16x1xf32> to vector<16x256xf32>
    %655 = vector.broadcast %653 : vector<1x256xf32> to vector<16x256xf32>
    %656 = arith.cmpf oeq, %654, %655 : vector<16x256xf32>
    %657 = arith.extui %656 : vector<16x256xi1> to vector<16x256xi32>
    %658 = arith.sitofp %657 : vector<16x256xi32> to vector<16x256xf32>
    %659 = vector.broadcast %651 : vector<1x256xf32> to vector<16x256xf32>
    %660 = arith.mulf %659, %658 : vector<16x256xf32>
    %661 = arith.addf %650, %660 : vector<16x256xf32>
    %662 = vector.shape_cast %642 : vector<16x256xf32> to vector<16x1x256xf32>
    %663 = vector.shape_cast %661 : vector<16x256xf32> to vector<1x16x256xf32>
    %664 = vector.broadcast %662 : vector<16x1x256xf32> to vector<16x16x256xf32>
    %665 = vector.broadcast %663 : vector<1x16x256xf32> to vector<16x16x256xf32>
    %666 = arith.mulf %664, %665 : vector<16x16x256xf32>
    %667 = vector.shape_cast %666 : vector<16x16x256xf32> to vector<256x256xf32>
    %668 = vector.extract_strided_slice %3 {offsets = [0, 2048], sizes = [8, 256], strides = [1, 1]} : vector<8x2304xbf16> to vector<8x256xbf16>
    %669 = arith.truncf %667 : vector<256x256xf32> to vector<256x256xbf16>
    %cst_110 = arith.constant dense<0.000000e+00> : vector<8x256xf32>
    %670 = tpu.matmul %668, %669, %cst_110 {dimension_numbers = #tpu.dot_dimension_numbers<[1], [0], [0], [1], [0, 0, 1, 1], [], []>} : vector<8x256xbf16>, vector<256x256xbf16>, vector<8x256xf32> -> vector<8x256xf32>
    %671 = arith.addf %600, %670 : vector<8x256xf32>
    %c0_111 = arith.constant 0 : index
    %c0_112 = arith.constant 0 : index
    %672 = vector.load %arg4[%c0_111, %c0_112] : memref<8x1xf32, #tpu.memory_space<vmem>>, vector<8x1xf32>
    %673 = vector.broadcast %672 : vector<8x1xf32> to vector<8x256xf32>
    %674 = arith.addf %671, %673 : vector<8x256xf32>
    %c0_113 = arith.constant 0 : index
    %c0_114 = arith.constant 0 : index
    %c0_115 = arith.constant 0 : index
    %675 = vector.load %arg5[%c0_113, %c0_114, %c0_115] : memref<1x8x256xf32, #tpu.memory_space<vmem>>, vector<1x8x256xf32>
    %676 = vector.shape_cast %675 : vector<1x8x256xf32> to vector<8x256xf32>
    %677 = vector.shape_cast %674 : vector<8x256xf32> to vector<1x8x256xf32>
    tpu.vector_store %arg5[%c0_113, %c0_114, %c0_115], %677 {strides = array<i32>} : memref<1x8x256xf32, #tpu.memory_space<vmem>>, vector<1x8x256xf32>,
    return
  }
  func.func @transform_0(%arg0: i32, %arg1: i32) -> (i32, i32, i32) {
    %c0_i32 = arith.constant 0 : i32
    %c0_i32_0 = arith.constant 0 : i32
    return %arg0, %c0_i32, %arg1 : i32, i32, i32
  }
  func.func @transform_1(%arg0: i32, %arg1: i32) -> (i32, i32, i32) {
    %c0_i32 = arith.constant 0 : i32
    %c0_i32_0 = arith.constant 0 : i32
    %c0_i32_1 = arith.constant 0 : i32
    return %arg0, %c0_i32, %c0_i32_0 : i32, i32, i32
  }
  func.func @transform_2(%arg0: i32, %arg1: i32) -> (i32, i32) {
    %c0_i32 = arith.constant 0 : i32
    %c0_i32_0 = arith.constant 0 : i32
    %c0_i32_1 = arith.constant 0 : i32
    return %c0_i32, %c0_i32_0 : i32, i32
  }
  func.func @transform_3(%arg0: i32, %arg1: i32) -> (i32, i32, i32) {
    %c0_i32 = arith.constant 0 : i32
    %c0_i32_0 = arith.constant 0 : i32
    return %arg0, %c0_i32, %arg1 : i32, i32, i32
  }
}

</mosaic_0001>

<bundles_post_ra>
// kernel: tpu_custom_call.1
= control target key start
LH: loop header
LB: loop body
LE: loop exit
PB: predicated region body
PF: predicated region fallthrough
CT: control target
= control target key end

     0   :  { %8 = vsyncpa [#allocation3], 0  ;;  %s6434_s0 = inlined_call_operand.vmem [shape: f32[2,27,256], index: 0, kind: input, shape index: {}]   ;;  %s6435_s1 = inlined_call_operand.vmem [shape: bf16[2,8,2304], index: 1, kind: input, shape index: {}]   ;;  %s6436_s2 = inlined_call_operand.vmem [shape: f32[8,1], index: 2, kind: input, shape index: {}]   ;;  %s6437_s3 = inlined_call_operand.hbm [shape: f32[2,8,256], index: 3, kind: output, shape index: {}]  }
   0x1   :  { %10 = vsyncpa [#allocation3 + $0x1], 0  ;;  %s3985_s12 = smov 0   ;;  %s3987_s13 = smov 0  }
   0x2   :  { %s3989_s14 = smov 0   ;;  %s3991_s15 = smov 0  }
   0x3   :  { %s3993_s16 = smov 0   ;;  %s3995_s17 = smov 0  }
   0x4 LB: > { %s3650_s18 = sadd.s32 4294967295, %s3960_s17   ;;  %s3651_s19 = sadd.s32 4294967294, %s3960_s17   ;;  %s3960_s17 = sphi %s3995_s17, %s16_s17   ;;  %s3956_s16 = sphi %s3993_s16, %s6678_s16   ;;  %s3952_s15 = sphi %s3991_s15, %s6677_s15   ;;  %s3948_s14 = sphi %s3989_s14, %s6676_s14   ;;  %s3944_s13 = sphi %s3987_s13, %s6675_s13   ;;  %s3940_s12 = sphi %s3985_s12, %s6674_s12  }
   0x5   : > { %s28_s20 = sadd.s32 1, %s3956_s16  ;;  %s112_s21 = sadd.s32 1, %s3948_s14 }
   0x6   : > { %p30_p0 = scmp.ge.s32.totalorder %s28_s20, 2  ;;  %p122_p1 = scmp.ne.s32.totalorder %s3948_s14, %s3944_s13 }
   0x7   : > { %p123_p2 = scmp.eq.s32.totalorder %s3650_s18, 1  ;;  %p128_p3 = scmp.ne.s32.totalorder %s3944_s13, %s3940_s12 }
   0x8   : > { %s6680_s20 = smov (%p30_p0, %s28_s20), 0  ;;  %p129_p5 = scmp.eq.s32.totalorder %s3651_s19, 1 }
   0x9   : > { %p4025_p4 = por %p123_p2, %p122_p1  ;;  %s107_s23 = ssub.s32 %s3956_s16, %s6680_s20 }
   0xa   : > { %p3654_p6 = scmp.ge.s32.totalorder %s3960_s17, 1  ;;  %p110_p7 = scmp.eq.s32.totalorder %s107_s23, 0 }
   0xb   : > { %p4032_p8 = por %p129_p5, %p128_p3  ;;  %p171_p9 = scmp.lt.s32.totalorder %s3960_s17, 3 }
   0xc   : > { %s4038_s25 = scalar_select %p110_p7, %s3948_s14, %s112_s21  }
   0xd   : > { %p172_p10 = pnand %p3654_p6, %p171_p9 }
   0xf   : > { %175 = sbr.rel (%p172_p10) target bundleno = 777 (0x309), region = 32 }
  0x14   : > { %v238_v0 = vlaneseq  ;;  %v3962_v1 = vmov 16.0   ;;  %p205_p11 = scmp.lt.s32.totalorder %s3952_s15, 1  ;;  %vm434_vm14 = vcmask 1046528   ;;  %s201_s10 = sand.u32 1, %s3944_s13  }
  0x15   : > { %3876 = vrcp.f32 %v3962_v1  ;;  %s3655_s11 = sshll.u32 %s201_s10, 4  ;;  %s3815_s18 = sshll.u32 %s3952_s15, 4 }
  0x16   : > { %v239_v2 = vand.u32 127, %v238_v0  ;;  %s4042_s26 = scalar_select %p205_p11, %s3952_s15, 1  ;;  %v278_v43 = vshrl.u32 %v238_v0, 7 }
  0x17   : > { %s3557_s23 = scalar_lea.hbm %s6437_s3, %s3815_s18  ;;  %s3544_s15 = scalar_lea.sflag [#allocation3], %s201_s10 }
  0x18   : > { %v240_v5 = vadd.s32 128, %v239_v2  ;;  %v244_v8 = vcvt.s32.f32 %v239_v2  ;;  %s3814_s27 = sshll.u32 %s4042_s26, 6  ;;  %v279_v49 = vadd.s32 8, %v278_v43  ;;  %v4106_v57 = vcvt.s32.f32 %v278_v43  ;;  %s3816_s4 = smul.u32 72, %s4042_s26 }
  0x19   : > { %s4048_s30 = scalar_lea.vmem %s6434_s0, %s3814_s27  ;;  %s203_s26 = scalar_lea.vmem [#allocation2], %s3655_s11 }
  0x1a   : > { %v245_v9 = vcvt.s32.f32 %v240_v5  ;;  %v4053_v33 = vld [vmem:[%s4048_s30] sm:$0xff]  ;;  %v4058_v35 = vld [vmem:[%s4048_s30 + $0x8] sm:$0xff]  ;;  %v4065_v38 = vld [vmem:[%s4048_s30 + $0x10] sm:$0xff]  ;;  %v4113_v61 = vcvt.s32.f32 %v279_v49  ;;  %s4840_s7 = scalar_lea.vmem %s6435_s1, %s3816_s4  ;;  %s3559_s27 = sshll.u32 %s203_s26, 4  ;;  %s3560_s27 = int_to_ptr.vmem [resolvable:$true] %s3559_s27 }
  0x1b   : > { %v3877_v3 = vpop.eup %3876  ;;  %6513 = vst [vmem:[#allocation6_spill] sm:$0xff] %v4053_v33  ;;  %v4068_v39 = vld [vmem:[%s4048_s30 + $0x18] sm:$0xff]  ;;  %v4090_v51 = vld [vmem:[%s4048_s30 + $0x20] sm:$0xff]  ;;  %v4101_v55 = vld [vmem:[%s4048_s30 + $0x28] sm:$0xff]  ;;  %s3561_s28 = sshll.u32 %s3557_s23, 4  ;;  %s3902_s6 = scalar_lea.hbm %s6437_s3, 32  ;;  %s3562_s28 = int_to_ptr.hbm [resolvable:$true] %s3561_s28 }
  0x1c   : > { %v247_v4 = vmul.f32 16.0, %v3877_v3  ;;  %vm251_vm0 = vweird.f32 %v3877_v3  ;;  %6515 = vst [vmem:[#allocation8_spill] sm:$0xff] %v4058_v35  ;;  %v4119_v63 = vrot.slane %v4090_v51, 1  ;;  %v4123_v1 = vrot.slane %v4101_v55, 1  ;;  %s3896_s29 = sshra.s32 %s3562_s28, 4  ;;  %s3897_s29 = int_to_ptr.hbm [resolvable:$true] %s3896_s29 }
  0x1d   : > { %6519 = vst [vmem:[#allocation12_spill] sm:$0xff] %v4090_v51  ;;  %p3903_p1 = scmp.lt.s32.totalorder %s3897_s29, %s6437_s3 }
  0x1e   : > { %v248_v6 = vsub.f32 1.0, %v247_v4  ;;  %6521 = vst [vmem:[#allocation14_spill] sm:$0xff] %v4101_v55 }
  0x20   : > { %v249_v7 = vmul.f32 %v3877_v3, %v248_v6 }
  0x22   : > { %v250_v10 = vadd.f32 %v3877_v3, %v249_v7 }
  0x24   : > { %v252_v11 = vsel %vm251_vm0, %v3877_v3, %v250_v10 }
  0x25   : > { %v253_v12 = vmul.f32 %v252_v11, %v244_v8  ;;  %v254_v13 = vmul.f32 %v252_v11, %v245_v9 }
  0x27   : > { %v255_v14 = vfloor.f32 %v253_v12  ;;  %v256_v15 = vfloor.f32 %v254_v13 }
  0x29   : > { %v257_v16 = vmul.f32 16.0, %v255_v14  ;;  %v258_v17 = vmul.f32 16.0, %v256_v15  ;;  %v3659_v18 = vadd.f32 -1.0, %v255_v14  ;;  %v3660_v19 = vadd.f32 -1.0, %v256_v15 }
  0x2a   : > { %v263_v22 = vadd.f32 1.0, %v255_v14  ;;  %v264_v23 = vadd.f32 1.0, %v256_v15 }
  0x2b   : > { %v259_v20 = vsub.f32 %v244_v8, %v257_v16  ;;  %v260_v21 = vsub.f32 %v245_v9, %v258_v17  ;;  %v6452_v17 = vmov 0.0  }
  0x2d   : > { %vm261_vm1 = vcmp.ge.f32.partialorder %v259_v20, 16.0  ;;  %vm262_vm2 = vcmp.ge.f32.partialorder %v260_v21, 16.0  ;;  %vm265_vm3 = vcmp.lt.f32.partialorder %v259_v20, 0.0  ;;  %vm266_vm4 = vcmp.lt.f32.partialorder %v260_v21, 0.0 }
  0x2e   : > { %v269_v24 = vsel %vm265_vm3, %v3659_v18, %v255_v14  ;;  %v270_v25 = vsel %vm266_vm4, %v3660_v19, %v256_v15 }
  0x2f   : > { %v271_v26 = vsel %vm261_vm1, %v263_v22, %v269_v24  ;;  %v272_v27 = vsel %vm262_vm2, %v264_v23, %v270_v25 }
  0x30   : > { %v273_v28 = vmul.f32 16.0, %v271_v26  ;;  %v274_v29 = vmul.f32 16.0, %v272_v27  ;;  %v4050_v32 = vadd.f32 -1.0, %v271_v26  ;;  %v4055_v34 = vadd.f32 -1.0, %v272_v27 }
  0x32   : > { %v275_v30 = vsub.f32 %v244_v8, %v273_v28  ;;  %v276_v31 = vsub.f32 %v245_v9, %v274_v29  ;;  %6512 = vst [vmem:[#allocation5_spill] sm:$0xff] %v4050_v32  ;;  %v286_v40 = vadd.f32 %v4050_v32, %v4053_v33  ;;  %v287_v44 = vadd.f32 %v4055_v34, %v4058_v35 }
  0x33   : > { %6514 = vst [vmem:[#allocation7_spill] sm:$0xff] %v4055_v34 }
  0x34   : > { %v4060_v36 = vadd.f32 -1.0, %v275_v30  ;;  %v4062_v37 = vadd.f32 -1.0, %v276_v31  ;;  %v4085_v48 = vfloor.f32 %v286_v40  ;;  %v4087_v50 = vfloor.f32 %v287_v44 }
  0x36   : > { %v292_v41 = vadd.f32 %v4060_v36, %v4065_v38  ;;  %v293_v42 = vadd.f32 %v4062_v37, %v4068_v39  ;;  %v4081_v46 = vadd.f32 1.0, %v4060_v36  ;;  %6517 = vst [vmem:[#allocation10_spill] sm:$0xff] %v4085_v48  ;;  %v4096_v53 = vadd.f32 1.0, %v4062_v37 }
  0x37   : > { %6518 = vst [vmem:[#allocation11_spill] sm:$0xff] %v4087_v50  ;;  %v4109_v58 = vsub.f32 %v286_v40, %v4085_v48  ;;  %v4116_v62 = vsub.f32 %v287_v44, %v4087_v50  ;;  %v4131_v5 = vadd.f32 1.0, %v4085_v48  ;;  %v4134_v6 = vadd.f32 1.0, %v4087_v50 }
  0x38   : > { %v4078_v45 = vfloor.f32 %v292_v41  ;;  %6516 = vst [vmem:[#allocation9_spill] sm:$0xff] %v4081_v46  ;;  %v4083_v47 = vfloor.f32 %v293_v42  ;;  %v614_v54 = vadd.f32 %v4081_v46, %v4065_v38  ;;  %v615_v2 = vadd.f32 %v4096_v53, %v4068_v39 }
  0x39   : > { %6520 = vst [vmem:[#allocation13_spill] sm:$0xff] %v4096_v53  ;;  %v6440_v7 = vperm.slane %v4087_v50, 1  ;;  %v4138_v8 = vsub.f32 1.0, %v4109_v58  ;;  %v4146_v10 = vsub.f32 1.0, %v4116_v62  ;;  %v6441_v11 = vperm.slane %v4085_v48, 1 }
  0x3a   : > { %v4093_v52 = vsub.f32 %v292_v41, %v4078_v45  ;;  %v4104_v56 = vsub.f32 %v293_v42, %v4083_v47  ;;  %6522 = vst [vmem:[#allocation15_spill] sm:$0xff] %v4109_v58  ;;  %v360_v59 = vperm.slane %v4078_v45, 1  ;;  %v361_v60 = vperm.slane %v4083_v47, 1 }
  0x3b   : > { %6523 = vst [vmem:[#allocation16_spill] sm:$0xff] %v4116_v62  ;;  %v4127_v3 = vfloor.f32 %v614_v54  ;;  %v4143_v9 = vadd.f32 1.0, %v4078_v45  ;;  %v4157_v13 = vadd.f32 1.0, %v4083_v47  ;;  %v4159_v14 = vfloor.f32 %v615_v2 }
  0x3c   : > { %v6447_v0 = vsub.f32 1.0, %v4093_v52  ;;  %v6443_v4 = vsub.f32 1.0, %v4104_v56  ;;  %6524 = vst [vmem:[#allocation17_spill] sm:$0xff] %v4131_v5  ;;  %vm362_vm5 = vcmp.eq.f32.partialorder %v4106_v57, %v360_v59  ;;  %vm363_vm6 = vcmp.eq.f32.partialorder %v4106_v57, %v361_v60 }
  0x3d   : > { %6525 = vst [vmem:[#allocation18_spill] sm:$0xff] %v4134_v6  ;;  %vm364_vm7 = vcmp.eq.f32.partialorder %v4113_v61, %v360_v59  ;;  %vm365_vm8 = vcmp.eq.f32.partialorder %v4113_v61, %v361_v60  ;;  %v618_v15 = vsub.f32 %v614_v54, %v4127_v3  ;;  %v3673_v18 = vsel %vm362_vm5, 1.0, %v6452_v17 }
  0x3e   : > { %6526 = vst [vmem:[#allocation19_spill] sm:$0xff] %v4138_v8  ;;  %v4154_v12 = vmul.f32 %v4119_v63, %v6447_v0  ;;  %v4165_v16 = vmul.f32 %v4123_v1, %v6443_v4  ;;  %v3674_v19 = vsel %vm363_vm6, 1.0, %v6452_v17  ;;  %vm625_vm9 = vcmp.eq.f32.partialorder %v4106_v57, %v6440_v7 }
  0x3f   : > { %6527 = vst [vmem:[#allocation20_spill] sm:$0xff] %v4146_v10  ;;  %v3675_v20 = vsel %vm364_vm7, 1.0, %v6452_v17  ;;  %v3676_v21 = vsel %vm365_vm8, 1.0, %v6452_v17  ;;  %v4176_v22 = vmul.f32 %v4119_v63, %v4093_v52  ;;  %v384_v23 = vperm.slane %v4143_v9, 1 }
  0x40   : > { %v4181_v24 = vmul.f32 %v4123_v1, %v4104_v56  ;;  %v6442_v25 = vperm.slane %v4146_v10, 1  ;;  %v6439_v26 = vperm.slane %v4131_v5, 1  ;;  %v6438_v27 = vperm.slane %v4134_v6, 1 }
  0x41   : > { %v374_v28 = vperm.slane %v4154_v12, 1  ;;  %v385_v29 = vperm.slane %v4157_v13, 1  ;;  %v620_v30 = vsub.f32 1.0, %v618_v15  ;;  %v3682_v31 = vsel %vm625_vm9, 1.0, %v6452_v17 }
  0x42   : > { %v375_v40 = vperm.slane %v4165_v16, 1  ;;  %vm624_vm10 = vcmp.eq.f32.partialorder %v4106_v57, %v6441_v11  ;;  %vm644_vm11 = vcmp.eq.f32.partialorder %v4106_v57, %v6439_v26  ;;  %vm645_vm12 = vcmp.eq.f32.partialorder %v4106_v57, %v6438_v27 }
  0x43   : > { %vm4200_vm13 = vcmp.eq.f32.partialorder %v4106_v57, %v384_v23  ;;  %v4205_v42 = vsub.f32 %v615_v2, %v4159_v14  ;;  %v3686_v43 = vsel %vm645_vm12, 1.0, %v6452_v17  ;;  %v6444_v44 = vperm.slane %v4116_v62, 1 }
  0x44   : > { %v6446_v49 = vperm.slane %v4138_v8, 1  ;;  %v639_v54 = vmul.f32 %v3682_v31, %v6442_v25  ;;  %v6445_v59 = vperm.slane %v4109_v58, 1  ;;  %v668_v60 = vperm.slane %v4127_v3, 2 }
  0x45   : > { %v3681_v27 = vsel %vm624_vm10, 1.0, %v6452_v17  ;;  %v3685_v26 = vsel %vm644_vm11, 1.0, %v6452_v17  ;;  %v659_v2 = vmul.f32 %v3686_v43, %v6444_v44  ;;  %v4219_v7 = vmul.f32 %v620_v30, %v4119_v63 }
  0x46   : > { %v4221_v11 = vmul.f32 %v3673_v18, %v374_v28  ;;  %vm387_vm15 = vcmp.eq.f32.partialorder %v4106_v57, %v385_v29  ;;  %vm388_vm0 = vcmp.eq.f32.partialorder %v4113_v61, %v384_v23  ;;  %vm4226_vm1 = vcmp.eq.f32.partialorder %v4113_v61, %v385_v29 }
  0x47   : > { %v4230_v25 = vmul.f32 %v3674_v19, %v375_v40  ;;  %v4232_v4 = vmul.f32 %v3675_v20, %v374_v28  ;;  %vm670_vm2 = vcmp.eq.f32.partialorder %v4106_v57, %v668_v60  ;;  %v4236_v30 = vmul.f32 %v618_v15, %v4119_v63 }
  0x48   : > { %v638_v18 = vmul.f32 %v3681_v27, %v6446_v49  ;;  %v658_v23 = vmul.f32 %v3685_v26, %v6445_v59  ;;  %v663_v43 = vadd.f32 %v659_v2, %v639_v54  ;;  %vm672_vm3 = vcmp.eq.f32.partialorder %v4113_v61, %v668_v60 }
  0x49   : > { %v4243_v29 = vmul.f32 %v3676_v21, %v375_v40  ;;  %v3677_v19 = vsel %vm4200_vm13, 1.0, %v6452_v17  ;;  %v682_v20 = vperm.slane %v4219_v7, 2  ;;  %v4250_v15 = vadd.f32 1.0, %v4127_v3 }
  0x4a   : > { %v3678_v28 = vsel %vm387_vm15, 1.0, %v6452_v17  ;;  %v3679_v27 = vsel %vm388_vm0, 1.0, %v6452_v17  ;;  %v398_v26 = vperm.slane %v4176_v22, 1  ;;  %v3689_v54 = vsel %vm670_vm2, 1.0, %v6452_v17 }
  0x4b   : > { %v3691_v40 = vsel %vm672_vm3, 1.0, %v6452_v17  ;;  %v692_v41 = vperm.slane %v4250_v15, 2  ;;  %v706_v60 = vperm.slane %v4236_v30, 2  ;;  %v4260_v2 = vadd.f32 %v658_v23, %v638_v18 }
  0x4c   : > { %v4262_v44 = vrot.slane %v663_v43, 7  ;;  %v4265_v59 = vadd.f32 2.0, %v4060_v36  ;;  %v4268_v49 = vadd.f32 2.0, %v4062_v37  ;;  %v621_v0 = vsub.f32 1.0, %v4205_v42 }
  0x4d   : > { %6532 = vst [vmem:[#allocation21_spill] sm:$0xff] %v4260_v2  ;;  %v684_v62 = vmul.f32 %v3689_v54, %v682_v20  ;;  %vm694_vm4 = vcmp.eq.f32.partialorder %v4106_v57, %v692_v41  ;;  %vm696_vm5 = vcmp.eq.f32.partialorder %v4113_v61, %v692_v41  ;;  %v4276_v18 = vsel %vm4226_vm1, 1.0, %v6452_v17 }
  0x4e   : > { %6533 = vst [vmem:[#allocation22_spill] sm:$0xff] %v4262_v44  ;;  %v686_v23 = vmul.f32 %v3691_v40, %v682_v20  ;;  %v3693_v43 = vsel %vm694_vm4, 1.0, %v6452_v17  ;;  %v3695_v36 = vsel %vm696_vm5, 1.0, %v6452_v17  ;;  %v4280_v21 = vmul.f32 %v3677_v19, %v398_v26 }
  0x4f   : > { %6534 = vst [vmem:[#allocation23_spill] sm:$0xff] %v4265_v59  ;;  %v4283_v37 = vadd.f32 1.0, %v4159_v14  ;;  %v708_v54 = vmul.f32 %v3693_v43, %v706_v60  ;;  %v710_v58 = vmul.f32 %v3695_v36, %v706_v60  ;;  %v4288_v41 = vsel %vm434_vm14, %v4262_v44, %v4260_v2 }
  0x50   : > { %6535 = vst [vmem:[#allocation24_spill] sm:$0xff] %v4268_v49  ;;  %v1032_v31 = vadd.f32 %v4265_v59, %v4065_v38  ;;  %v1033_v20 = vadd.f32 %v4268_v49, %v4068_v39  ;;  %v1447_v40 = vperm.slane %v4078_v45, 4  ;;  %v6537_v19 = vperm.slane %v4181_v24, 1 }
  0x51   : > { %6536 = vst [vmem:[#allocation25_spill] sm:$0xff] %v4288_v41  ;;  %v4299_v6 = vmul.f32 %v3679_v27, %v398_v26  ;;  %v4302_v60 = vmul.f32 %v621_v0, %v4123_v1  ;;  %v4304_v43 = vadd.f32 %v708_v54, %v684_v62  ;;  %v4306_v36 = vadd.f32 %v710_v58, %v686_v23 }
  0x52   : > { %v4297_v17 = vmul.f32 %v3678_v28, %v6537_v19  ;;  %v6460_v38 = vrot.slane %v4288_v41, 7  ;;  %v4309_v2 = vfloor.f32 %v1032_v31  ;;  %v4311_v39 = vfloor.f32 %v1033_v20 }
  0x53   : > { %6538 = vst [vmem:[#allocation26_spill] sm:$0xff] %v4304_v43  ;;  %v4316_v28 = vmul.f32 %v4205_v42, %v4123_v1  ;;  %v1448_v0 = vperm.slane %v4083_v47, 4  ;;  %vm4326_vm6 = vcmp.eq.f32.partialorder %v4106_v57, %v1447_v40  ;;  %vm4338_vm7 = vcmp.eq.f32.partialorder %v4113_v61, %v1447_v40 }
  0x54   : > { %6539 = vst [vmem:[#allocation27_spill] sm:$0xff] %v4306_v36  ;;  %v766_v58 = vperm.slane %v6460_v38, 0  ;;  %v1036_v62 = vsub.f32 %v1032_v31, %v4309_v2  ;;  %v1037_v26 = vsub.f32 %v1033_v20, %v4311_v39  ;;  %v1086_v23 = vperm.slane %v4309_v2, 3 }
  0x55   : > { %v1087_v42 = vperm.slane %v4311_v39, 3  ;;  %v4332_v19 = vadd.f32 1.0, %v4309_v2  ;;  %v4335_v27 = vadd.f32 1.0, %v4311_v39  ;;  %vm4370_vm12 = vcmp.eq.f32.partialorder %v4106_v57, %v1448_v0 }
  0x56   : > { %v844_v20 = vmul.f32 %v766_v58, %v4304_v43  ;;  %v846_v38 = vmul.f32 %v766_v58, %v4306_v36  ;;  %v1038_v44 = vsub.f32 1.0, %v1036_v62  ;;  %v1039_v41 = vsub.f32 1.0, %v1037_v26 }
  0x57   : > { %vm1088_vm8 = vcmp.eq.f32.partialorder %v4106_v57, %v1086_v23  ;;  %vm1089_vm9 = vcmp.eq.f32.partialorder %v4106_v57, %v1087_v42  ;;  %vm1090_vm10 = vcmp.eq.f32.partialorder %v4113_v61, %v1086_v23  ;;  %vm1091_vm11 = vcmp.eq.f32.partialorder %v4113_v61, %v1087_v42 }
  0x58   : > { %v894_v5 = vpack.c.bf16 %v846_v38, %v844_v20  ;;  %v4349_v40 = vmul.f32 %v1038_v44, %v4119_v63  ;;  %v4352_v10 = vmul.f32 %v1039_v41, %v4123_v1  ;;  %v6544_v43 = vmov 0.0  }
  0x59   : > { %v3705_v8 = vsel %vm1088_vm8, 1.0, %v6544_v43  ;;  %v3706_v58 = vsel %vm1089_vm9, 1.0, %v6544_v43  ;;  %v3707_v36 = vsel %vm1090_vm10, 1.0, %v6544_v43  ;;  %v3708_v50 = vsel %vm1091_vm11, 1.0, %v6544_v43 }
  0x5a   : > { %v4359_v48 = vmul.f32 %v1036_v62, %v4119_v63  ;;  %919 = vmatpush.bf16.msra.mxu0 %v894_v5  ;;  %v1100_v38 = vperm.slane %v4349_v40, 3  ;;  %v1101_v44 = vperm.slane %v4352_v10, 3  ;;  %v4364_v23 = vmul.f32 %v1037_v26, %v4123_v1 }
  0x5b   : > { %v1110_v41 = vperm.slane %v4332_v19, 3  ;;  %v1111_v42 = vperm.slane %v4335_v27, 3  ;;  %vm4375_vm13 = vcmp.eq.f32.partialorder %v4113_v61, %v1448_v0  ;;  %v1462_v55 = vperm.slane %v4165_v16, 4 }
  0x5c   : > { %v1124_v20 = vperm.slane %v4359_v48, 3  ;;  %v1102_v5 = vmul.f32 %v3705_v8, %v1100_v38  ;;  %v1103_v62 = vmul.f32 %v3706_v58, %v1101_v44  ;;  %v1104_v1 = vmul.f32 %v3707_v36, %v1100_v38 }
  0x5d   : > { %v1105_v26 = vmul.f32 %v3708_v50, %v1101_v44  ;;  %vm1112_vm15 = vcmp.eq.f32.partialorder %v4106_v57, %v1110_v41  ;;  %vm1113_vm0 = vcmp.eq.f32.partialorder %v4106_v57, %v1111_v42  ;;  %vm1114_vm1 = vcmp.eq.f32.partialorder %v4113_v61, %v1110_v41 }
  0x5e   : > { %vm1115_vm2 = vcmp.eq.f32.partialorder %v4113_v61, %v1111_v42  ;;  %v3709_v59 = vsel %vm1112_vm15, 1.0, %v6544_v43  ;;  %v3710_v35 = vsel %vm1113_vm0, 1.0, %v6544_v43  ;;  %v3711_v0 = vsel %vm1114_vm1, 1.0, %v6544_v43 }
  0x5f   : > { %v3712_v53 = vsel %vm1115_vm2, 1.0, %v6544_v43  ;;  %v1125_v8 = vperm.slane %v4364_v23, 3  ;;  %v1126_v36 = vmul.f32 %v3709_v59, %v1124_v20  ;;  %v1128_v50 = vmul.f32 %v3711_v0, %v1124_v20 }
  0x60   : > { %v3721_v58 = vsel %vm4326_vm6, 1.0, %v6544_v43  ;;  %v3722_v38 = vsel %vm4370_vm12, 1.0, %v6544_v43  ;;  %v3723_v44 = vsel %vm4338_vm7, 1.0, %v6544_v43  ;;  %v3724_v41 = vsel %vm4375_vm13, 1.0, %v6544_v43 }
  0x61   : > { %v1461_v42 = vperm.slane %v4154_v12, 4  ;;  %v1127_v59 = vmul.f32 %v3710_v35, %v1125_v8  ;;  %v1129_v20 = vmul.f32 %v3712_v53, %v1125_v8  ;;  %v4401_v0 = vadd.f32 %v1126_v36, %v1102_v5 }
  0x62   : > { %v4403_v54 = vadd.f32 %v1128_v50, %v1104_v1  ;;  %v1467_v46 = vperm.slane %v4143_v9, 4  ;;  %v1468_v63 = vperm.slane %v4157_v13, 4  ;;  %v1481_v12 = vperm.slane %v4176_v22, 4 }
  0x63   : > { %v1463_v49 = vmul.f32 %v3721_v58, %v1461_v42  ;;  %v1465_v33 = vmul.f32 %v3723_v44, %v1461_v42  ;;  %v4407_v31 = vadd.f32 %v1127_v59, %v1103_v62  ;;  %v4409_v51 = vadd.f32 %v1129_v20, %v1105_v26 }
  0x64   : > { %v1464_v35 = vmul.f32 %v3722_v38, %v1462_v55  ;;  %v1466_v53 = vmul.f32 %v3724_v41, %v1462_v55  ;;  %vm1469_vm3 = vcmp.eq.f32.partialorder %v4106_v57, %v1467_v46  ;;  %vm1471_vm4 = vcmp.eq.f32.partialorder %v4113_v61, %v1467_v46 }
  0x65   : > { %6549 = vst [vmem:[#allocation28_spill] sm:$0xff] %v4407_v31  ;;  %vm1470_vm5 = vcmp.eq.f32.partialorder %v4106_v57, %v1468_v63  ;;  %vm1472_vm6 = vcmp.eq.f32.partialorder %v4113_v61, %v1468_v63  ;;  %v3725_v16 = vsel %vm1469_vm3, 1.0, %v6544_v43  ;;  %v3727_v5 = vsel %vm1471_vm4, 1.0, %v6544_v43 }
  0x66   : > { %6550 = vst [vmem:[#allocation29_spill] sm:$0xff] %v4409_v51  ;;  %v3726_v62 = vsel %vm1470_vm5, 1.0, %v6544_v43  ;;  %v3728_v1 = vsel %vm1472_vm6, 1.0, %v6544_v43  ;;  %v1482_v22 = vperm.slane %v4181_v24, 4  ;;  %v1483_v26 = vmul.f32 %v3725_v16, %v1481_v12 }
  0x67   : > { %v1485_v55 = vmul.f32 %v3727_v5, %v1481_v12  ;;  %v1792_v8 = vperm.slane %v4127_v3, 5  ;;  %v1793_v46 = vperm.slane %v4159_v14, 5  ;;  %v1806_v36 = vperm.slane %v4219_v7, 5 }
  0x68   : > { %v1484_v50 = vmul.f32 %v3726_v62, %v1482_v22  ;;  %v1486_v58 = vmul.f32 %v3728_v1, %v1482_v22  ;;  %v4425_v38 = vadd.f32 %v1483_v26, %v1463_v49  ;;  %v1807_v44 = vperm.slane %v4302_v60, 5 }
  0x69   : > { %v4428_v41 = vadd.f32 %v1485_v55, %v1465_v33  ;;  %vm1794_vm7 = vcmp.eq.f32.partialorder %v4106_v57, %v1792_v8  ;;  %vm1795_vm8 = vcmp.eq.f32.partialorder %v4106_v57, %v1793_v46  ;;  %vm1796_vm9 = vcmp.eq.f32.partialorder %v4113_v61, %v1792_v8 }
  0x6a   : > { %6551 = vst [vmem:[#allocation30_spill] sm:$0xff] %v4425_v38  ;;  %v4433_v42 = vadd.f32 %v1484_v50, %v1464_v35  ;;  %v4435_v3 = vadd.f32 %v1486_v58, %v1466_v53  ;;  %vm1797_vm10 = vcmp.eq.f32.partialorder %v4113_v61, %v1793_v46  ;;  %v3737_v7 = vsel %vm1794_vm7, 1.0, %v6544_v43 }
  0x6b   : > { %6552 = vst [vmem:[#allocation31_spill] sm:$0xff] %v4428_v41  ;;  %v3738_v59 = vsel %vm1795_vm8, 1.0, %v6544_v43  ;;  %v3739_v20 = vsel %vm1796_vm9, 1.0, %v6544_v43  ;;  %v3740_v33 = vsel %vm1797_vm10, 1.0, %v6544_v43  ;;  %v1808_v49 = vmul.f32 %v3737_v7, %v1806_v36 }
  0x6c   : > { %6553 = vst [vmem:[#allocation32_spill] sm:$0xff] %v4433_v42  ;;  %v1809_v63 = vmul.f32 %v3738_v59, %v1807_v44  ;;  %v1810_v12 = vmul.f32 %v3739_v20, %v1806_v36  ;;  %v1811_v16 = vmul.f32 %v3740_v33, %v1807_v44  ;;  %v1812_v5 = vperm.slane %v4250_v15, 5 }
  0x6d   : > { %6554 = vst [vmem:[#allocation33_spill] sm:$0xff] %v4435_v3  ;;  %v1813_v35 = vperm.slane %v4283_v37, 5  ;;  %v1826_v53 = vperm.slane %v4236_v30, 5  ;;  %v1827_v62 = vperm.slane %v4316_v28, 5  ;;  %v2137_v1 = vperm.slane %v4309_v2, 6 }
  0x6e   : > { %vm1814_vm11 = vcmp.eq.f32.partialorder %v4106_v57, %v1812_v5  ;;  %vm1816_vm12 = vcmp.eq.f32.partialorder %v4113_v61, %v1812_v5  ;;  %v2138_v22 = vperm.slane %v4311_v39, 6  ;;  %v2151_v26 = vperm.slane %v4349_v40, 6 }
  0x6f   : > { %v6555_v55 = vperm.slane %v4159_v14, 2  ;;  %vm1815_vm15 = vcmp.eq.f32.partialorder %v4106_v57, %v1813_v35  ;;  %vm1817_vm0 = vcmp.eq.f32.partialorder %v4113_v61, %v1813_v35  ;;  %v3741_v30 = vsel %vm1814_vm11, 1.0, %v6544_v43 }
  0x70   : > { %v3743_v2 = vsel %vm1816_vm12, 1.0, %v6544_v43  ;;  %v3742_v8 = vsel %vm1815_vm15, 1.0, %v6544_v43  ;;  %v3744_v39 = vsel %vm1817_vm0, 1.0, %v6544_v43  ;;  %v1828_v40 = vmul.f32 %v3741_v30, %v1826_v53 }
  0x71   : > { %vm4454_vm13 = vcmp.eq.f32.partialorder %v4106_v57, %v6555_v55  ;;  %v1830_v46 = vmul.f32 %v3743_v2, %v1826_v53  ;;  %v1829_v36 = vmul.f32 %v3742_v8, %v1827_v62  ;;  %v1831_v50 = vmul.f32 %v3744_v39, %v1827_v62  ;;  %v226_v8 = vld [vmem:[%s4048_s30 + $0x30] sm:$0x7]  ;;  %v227_v39 = vld [vmem:[%s4048_s30 + $0x38] sm:$0x7] }
  0x72   : > { %vm2139_vm1 = vcmp.eq.f32.partialorder %v4106_v57, %v2137_v1  ;;  %vm2140_vm2 = vcmp.eq.f32.partialorder %v4106_v57, %v2138_v22  ;;  %v6558_v58 = vmov %v6555_v55  ;;  %v4473_v7 = vadd.f32 %v1828_v40, %v1808_v49 }
  0x73   : > { %vm4469_vm3 = vcmp.eq.f32.partialorder %v4113_v61, %v6558_v58  ;;  %v4475_v59 = vadd.f32 %v1830_v46, %v1810_v12  ;;  %vm2141_vm4 = vcmp.eq.f32.partialorder %v4113_v61, %v2137_v1  ;;  %vm2142_vm5 = vcmp.eq.f32.partialorder %v4113_v61, %v2138_v22 }
  0x74   : > { %6561 = vst [vmem:[#allocation34_spill] sm:$0xff] %v4473_v7  ;;  %v4479_v20 = vadd.f32 %v1829_v36, %v1809_v63  ;;  %v4481_v33 = vadd.f32 %v1831_v50, %v1811_v16  ;;  %v3753_v5 = vsel %vm2139_vm1, 1.0, %v6544_v43  ;;  %v3754_v14 = vsel %vm2140_vm2, 1.0, %v6544_v43 }
  0x75   : > { %6562 = vst [vmem:[#allocation35_spill] sm:$0xff] %v4475_v59  ;;  %v3755_v35 = vsel %vm2141_vm4, 1.0, %v6544_v43  ;;  %v3756_v53 = vsel %vm2142_vm5, 1.0, %v6544_v43  ;;  %v2152_v49 = vperm.slane %v4352_v10, 6  ;;  %v2153_v12 = vmul.f32 %v3753_v5, %v2151_v26  ;;  %v6614_v59 = vld [vmem:[#allocation16_spill] sm:$0xff] }
  0x76   : > { %6563 = vst [vmem:[#allocation36_spill] sm:$0xff] %v4479_v20  ;;  %v2155_v62 = vmul.f32 %v3755_v35, %v2151_v26  ;;  %v2157_v1 = vperm.slane %v4332_v19, 6  ;;  %v2158_v63 = vperm.slane %v4335_v27, 6  ;;  %v2171_v16 = vperm.slane %v4359_v48, 6 }
  0x77   : > { %6564 = vst [vmem:[#allocation37_spill] sm:$0xff] %v4481_v33  ;;  %v6565_v22 = vperm.slane %v4283_v37, 2  ;;  %v2154_v30 = vmul.f32 %v3754_v14, %v2152_v49  ;;  %v2156_v2 = vmul.f32 %v3756_v53, %v2152_v49  ;;  %v2172_v10 = vperm.slane %v4364_v23, 6 }
  0x78   : > { %vm2159_vm7 = vcmp.eq.f32.partialorder %v4106_v57, %v2157_v1  ;;  %vm2160_vm8 = vcmp.eq.f32.partialorder %v4106_v57, %v2158_v63  ;;  %vm2161_vm9 = vcmp.eq.f32.partialorder %v4113_v61, %v2157_v1  ;;  %vm2162_vm10 = vcmp.eq.f32.partialorder %v4113_v61, %v2158_v63 }
  0x79   : > { %vm4494_vm6 = vcmp.eq.f32.partialorder %v4106_v57, %v6565_v22  ;;  %v3757_v48 = vsel %vm2159_vm7, 1.0, %v6544_v43  ;;  %v3758_v27 = vsel %vm2160_vm8, 1.0, %v6544_v43  ;;  %v3759_v19 = vsel %vm2161_vm9, 1.0, %v6544_v43 }
  0x7a   : > { %v3760_v26 = vsel %vm2162_vm10, 1.0, %v6544_v43  ;;  %v2173_v40 = vmul.f32 %v3757_v48, %v2171_v16  ;;  %v2174_v23 = vmul.f32 %v3758_v27, %v2172_v10  ;;  %v2175_v46 = vmul.f32 %v3759_v19, %v2171_v16  ;;  %v6576_v27 = vld [vmem:[#allocation12_spill] sm:$0xff] }
  0x7b   : > { %v2176_v36 = vmul.f32 %v3760_v26, %v2172_v10  ;;  %v3690_v50 = vsel %vm4454_vm13, 1.0, %v6544_v43  ;;  %v683_v58 = vperm.slane %v4302_v60, 2  ;;  %v3694_v5 = vsel %vm4494_vm6, 1.0, %v6544_v43 }
  0x7c   : > { %v707_v14 = vperm.slane %v4316_v28, 2  ;;  %v4517_v35 = vadd.f32 %v2173_v40, %v2153_v12  ;;  %v4519_v53 = vadd.f32 %v2174_v23, %v2154_v30  ;;  %v4521_v49 = vadd.f32 %v2175_v46, %v2155_v62  ;;  %v6579_v46 = vld [vmem:[#allocation14_spill] sm:$0xff] }
  0x7d   : > { %v4523_v1 = vadd.f32 %v2176_v36, %v2156_v2  ;;  %v6572_v63 = vperm.slane %v4181_v24, 1  ;;  %v6573_v60 = vmov %v6565_v22  ;;  %v4531_v16 = vrot.slane %v226_v8, 1  ;;  %v6578_v8 = vld [vmem:[#allocation6_spill] sm:$0xff]  ;;  %v6580_v36 = vld [vmem:[#allocation13_spill] sm:$0xff] }
  0x7e   : > { %6568 = vst [vmem:[#allocation38_spill] sm:$0xff] %v4517_v35  ;;  %vm697_vm11 = vcmp.eq.f32.partialorder %v4113_v61, %v6573_v60  ;;  %v4533_v22 = vrot.slane %v227_v39, 1  ;;  %v4537_v28 = vadd.f32 %v4280_v21, %v4221_v11  ;;  %v3692_v12 = vsel %vm4469_vm3, 1.0, %v6544_v43 }
  0x7f   : > { %6569 = vst [vmem:[#allocation39_spill] sm:$0xff] %v4519_v53  ;;  %v403_v15 = vmul.f32 %v4276_v18, %v6572_v63  ;;  %v685_v62 = vmul.f32 %v3690_v50, %v683_v58  ;;  %v709_v24 = vmul.f32 %v3694_v5, %v707_v14  ;;  %v1391_v18 = vadd.f32 1.0, %v4050_v32  ;;  %v6581_v5 = vld [vmem:[#allocation8_spill] sm:$0xff] }
  0x80   : > { %6570 = vst [vmem:[#allocation40_spill] sm:$0xff] %v4521_v49  ;;  %v2502_v37 = vperm.slane %v4078_v45, 7  ;;  %v4546_v55 = vadd.f32 %v4297_v17, %v4230_v25  ;;  %v4550_v30 = vadd.f32 %v4299_v6, %v4232_v4  ;;  %v3696_v11 = vsel %vm697_vm11, 1.0, %v6544_v43 }
  0x81   : > { %6571 = vst [vmem:[#allocation41_spill] sm:$0xff] %v4523_v1  ;;  %v2503_v21 = vperm.slane %v4083_v47, 7  ;;  %v4555_v44 = vadd.f32 %v403_v15, %v4243_v29  ;;  %v687_v2 = vmul.f32 %v3692_v12, %v683_v58  ;;  %v6574_v10 = vsub.f32 1.0, %v4093_v52  ;;  %v6577_v47 = vld [vmem:[#allocation9_spill] sm:$0xff] }
  0x82   : > { %v6575_v48 = vsub.f32 1.0, %v4104_v56  ;;  %v1392_v25 = vadd.f32 1.0, %v4055_v34  ;;  %v2524_v4 = vperm.slane %v4143_v9, 7  ;;  %v2525_v6 = vperm.slane %v4157_v13, 7 }
  0x83   : > { %v2500_v45 = vmul.f32 %v4531_v16, %v6574_v10  ;;  %v2805_v19 = vadd.f32 %v6577_v47, %v6576_v27  ;;  %v711_v29 = vmul.f32 %v3696_v11, %v707_v14  ;;  %v4568_v26 = vadd.f32 %v709_v24, %v685_v62 }
  0x84   : > { %v2501_v17 = vmul.f32 %v4533_v22, %v6575_v48  ;;  %v4571_v39 = vadd.f32 %v1391_v18, %v6578_v8  ;;  %vm2504_vm12 = vcmp.eq.f32.partialorder %v4106_v57, %v2502_v37  ;;  %vm2505_vm13 = vcmp.eq.f32.partialorder %v4106_v57, %v2503_v21 }
  0x85   : > { %vm2506_vm15 = vcmp.eq.f32.partialorder %v4113_v61, %v2502_v37  ;;  %v2522_v9 = vmul.f32 %v4531_v16, %v4093_v52  ;;  %v2523_v13 = vmul.f32 %v4533_v22, %v4104_v56  ;;  %vm2507_vm0 = vcmp.eq.f32.partialorder %v4113_v61, %v2503_v21 }
  0x86   : > { %v2516_v40 = vperm.slane %v2500_v45, 7  ;;  %v2517_v23 = vperm.slane %v2501_v17, 7  ;;  %v2806_v50 = vadd.f32 %v6580_v36, %v6579_v46  ;;  %vm2526_vm1 = vcmp.eq.f32.partialorder %v4106_v57, %v2524_v4 }
  0x87   : > { %vm2527_vm2 = vcmp.eq.f32.partialorder %v4106_v57, %v2525_v6  ;;  %vm2528_vm3 = vcmp.eq.f32.partialorder %v4113_v61, %v2524_v4  ;;  %v2807_v58 = vfloor.f32 %v2805_v19  ;;  %v4587_v14 = vadd.f32 %v1392_v25, %v6581_v5  ;;  %v6582_v25 = vld [vmem:[#allocation23_spill] sm:$0xff] }
  0x88   : > { %v3769_v52 = vsel %vm2504_vm12, 1.0, %v6544_v43  ;;  %v3770_v56 = vsel %vm2505_vm13, 1.0, %v6544_v43  ;;  %vm2529_vm4 = vcmp.eq.f32.partialorder %v4113_v61, %v2525_v6  ;;  %v3771_v63 = vsel %vm2506_vm15, 1.0, %v6544_v43  ;;  %v6583_v6 = vld [vmem:[#allocation24_spill] sm:$0xff] }
  0x89   : > { %v3772_v15 = vsel %vm2507_vm0, 1.0, %v6544_v43  ;;  %v2538_v60 = vperm.slane %v2522_v9, 7  ;;  %v2539_v12 = vperm.slane %v2523_v13, 7  ;;  %v3773_v62 = vsel %vm2526_vm1, 1.0, %v6544_v43 }
  0x8a   : > { %v3774_v24 = vsel %vm2527_vm2, 1.0, %v6544_v43  ;;  %v3775_v18 = vsel %vm2528_vm3, 1.0, %v6544_v43  ;;  %v2808_v37 = vfloor.f32 %v2806_v50  ;;  %v2518_v11 = vmul.f32 %v3769_v52, %v2516_v40 }
  0x8b   : > { %v2519_v21 = vmul.f32 %v3770_v56, %v2517_v23  ;;  %v3776_v10 = vsel %vm2529_vm4, 1.0, %v6544_v43  ;;  %v2809_v45 = vsub.f32 %v2805_v19, %v2807_v58  ;;  %v2520_v48 = vmul.f32 %v3771_v63, %v2516_v40 }
  0x8c   : > { %v2859_v17 = vperm.slane %v2807_v58, 0  ;;  %v3166_v4 = vadd.f32 %v6582_v25, %v6576_v27  ;;  %v3167_v47 = vadd.f32 %v6583_v6, %v6579_v46  ;;  %v2540_v8 = vmul.f32 %v3773_v62, %v2538_v60  ;;  %v6584_v27 = vld [vmem:[#allocation10_spill] sm:$0xff] }
  0x8d   : > { %v2541_v9 = vmul.f32 %v3774_v24, %v2539_v12  ;;  %v2542_v13 = vmul.f32 %v3775_v18, %v2538_v60  ;;  %v2860_v36 = vperm.slane %v2808_v37, 0  ;;  %v4602_v5 = vadd.f32 %v711_v29, %v687_v2 }
  0x8e   : > { %v2521_v1 = vmul.f32 %v3772_v15, %v2517_v23  ;;  %v2543_v52 = vmul.f32 %v3776_v10, %v2539_v12  ;;  %v2810_v56 = vsub.f32 %v2806_v50, %v2808_v37  ;;  %v4605_v53 = vfloor.f32 %v4571_v39  ;;  %v6588_v50 = vld [vmem:[#allocation11_spill] sm:$0xff] }
  0x8f   : > { %v4608_v19 = vfloor.f32 %v4587_v14  ;;  %v2811_v40 = vsub.f32 1.0, %v2809_v45  ;;  %v6585_v63 = vperm.slane %v6584_v27, 1  ;;  %vm2861_vm6 = vcmp.eq.f32.partialorder %v4106_v57, %v2859_v17 }
  0x90   : > { %v4618_v2 = vadd.f32 1.0, %v2807_v58  ;;  %v3170_v29 = vfloor.f32 %v3166_v4  ;;  %v3171_v23 = vfloor.f32 %v3167_v47  ;;  %v6589_v15 = vperm.slane %v6588_v50, 1 }
  0x91   : > { %vm4613_vm5 = vcmp.eq.f32.partialorder %v4113_v61, %v6585_v63  ;;  %v4627_v12 = vadd.f32 %v2540_v8, %v2518_v11  ;;  %v4629_v62 = vadd.f32 %v2541_v9, %v2519_v21  ;;  %v4631_v24 = vadd.f32 %v2542_v13, %v2520_v48 }
  0x92   : > { %vm4623_vm7 = vcmp.eq.f32.partialorder %v4113_v61, %v6589_v15  ;;  %vm2862_vm8 = vcmp.eq.f32.partialorder %v4106_v57, %v2860_v36  ;;  %v4634_v18 = vadd.f32 %v2543_v52, %v2521_v1  ;;  %v2812_v58 = vsub.f32 1.0, %v2810_v56 }
  0x93   : > { %6592 = vst [vmem:[#allocation12_spill] sm:$0xff] %v4627_v12  ;;  %vm2863_vm9 = vcmp.eq.f32.partialorder %v4113_v61, %v2859_v17  ;;  %vm2864_vm10 = vcmp.eq.f32.partialorder %v4113_v61, %v2860_v36  ;;  %v4639_v10 = vmul.f32 %v2811_v40, %v4531_v16  ;;  %v4642_v25 = vsel %vm2861_vm6, 1.0, %v6544_v43 }
  0x94   : > { %6593 = vst [vmem:[#allocation9_spill] sm:$0xff] %v4629_v62  ;;  %v4645_v11 = vmul.f32 %v2809_v45, %v4531_v16  ;;  %v4647_v21 = vadd.f32 1.0, %v2808_v37  ;;  %v4650_v48 = vsel %vm2862_vm8, 1.0, %v6544_v43  ;;  %v3174_v1 = vsub.f32 %v3166_v4, %v3170_v29 }
  0x95   : > { %6594 = vst [vmem:[#allocation6_spill] sm:$0xff] %v4631_v24  ;;  %v3175_v6 = vsub.f32 %v3167_v47, %v3171_v23  ;;  %v3228_v8 = vperm.slane %v3170_v29, 1  ;;  %v4653_v17 = vsel %vm2863_vm9, 1.0, %v6544_v43  ;;  %v4656_v9 = vsel %vm2864_vm10, 1.0, %v6544_v43 }
  0x96   : > { %6595 = vst [vmem:[#allocation14_spill] sm:$0xff] %v4634_v18  ;;  %v4659_v13 = vmul.f32 %v2810_v56, %v4533_v22  ;;  %v3229_v36 = vperm.slane %v3171_v23, 1  ;;  %v4662_v45 = vmul.f32 %v2812_v58, %v4533_v22  ;;  %v3178_v37 = vsub.f32 1.0, %v3174_v1 }
  0x97   : > { %6596 = vst [vmem:[#allocation13_spill] sm:$0xff] %v4650_v48  ;;  %v3179_v52 = vsub.f32 1.0, %v3175_v6  ;;  %vm3230_vm11 = vcmp.eq.f32.partialorder %v4106_v57, %v3228_v8  ;;  %vm3232_vm13 = vcmp.eq.f32.partialorder %v4113_v61, %v3228_v8  ;;  %v3248_v58 = vmul.f32 %v3174_v1, %v4531_v16 }
  0x98   : > { %6597 = vst [vmem:[#allocation8_spill] sm:$0xff] %v4656_v9  ;;  %vm3231_vm12 = vcmp.eq.f32.partialorder %v4106_v57, %v3229_v36  ;;  %vm3233_vm15 = vcmp.eq.f32.partialorder %v4113_v61, %v3229_v36  ;;  %v3801_v4 = vsel %vm3230_vm11, 1.0, %v6544_v43  ;;  %v3226_v47 = vmul.f32 %v3178_v37, %v4531_v16 }
  0x99   : > { %v3227_v56 = vmul.f32 %v3179_v52, %v4533_v22  ;;  %v3802_v40 = vsel %vm3231_vm12, 1.0, %v6544_v43  ;;  %v3803_v63 = vsel %vm3232_vm13, 1.0, %v6544_v43  ;;  %v3804_v15 = vsel %vm3233_vm15, 1.0, %v6544_v43 }
  0x9a   : > { %v3249_v18 = vmul.f32 %v3175_v6, %v4533_v22  ;;  %v3250_v62 = vadd.f32 1.0, %v3170_v29  ;;  %v3242_v8 = vperm.slane %v3226_v47, 1  ;;  %v3251_v36 = vadd.f32 1.0, %v3171_v23  ;;  %v6598_v29 = vld [vmem:[#allocation19_spill] sm:$0xff]  ;;  %v6600_v6 = vld [vmem:[#allocation20_spill] sm:$0xff] }
  0x9b   : > { %v3243_v24 = vperm.slane %v3227_v56, 1  ;;  %v3683_v37 = vsel %vm4613_vm5, 1.0, %v6544_v43  ;;  %v3266_v52 = vperm.slane %v3248_v58, 1  ;;  %v3684_v35 = vsel %vm4623_vm7, 1.0, %v6544_v43  ;;  %v6602_v56 = vld [vmem:[#allocation17_spill] sm:$0xff] }
  0x9c   : > { %v3252_v12 = vperm.slane %v3250_v62, 1  ;;  %v3267_v49 = vperm.slane %v3249_v18, 1  ;;  %v3244_v34 = vmul.f32 %v3801_v4, %v3242_v8  ;;  %v3246_v16 = vmul.f32 %v3803_v63, %v3242_v8 }
  0x9d   : > { %v3245_v32 = vmul.f32 %v3802_v40, %v3243_v24  ;;  %v3247_v1 = vmul.f32 %v3804_v15, %v3243_v24  ;;  %v3253_v22 = vperm.slane %v3251_v36, 1  ;;  %v6599_v23 = vperm.slane %v6598_v29, 1  ;;  %v6604_v15 = vld [vmem:[#allocation18_spill] sm:$0xff] }
  0x9e   : > { %vm3254_vm0 = vcmp.eq.f32.partialorder %v4106_v57, %v3252_v12  ;;  %vm3256_vm1 = vcmp.eq.f32.partialorder %v4113_v61, %v3252_v12  ;;  %v6601_v47 = vperm.slane %v6600_v6, 1  ;;  %v6603_v4 = vperm.slane %v6602_v56, 1 }
  0x9f   : > { %v640_v46 = vmul.f32 %v3683_v37, %v6599_v23  ;;  %v3805_v62 = vsel %vm3254_vm0, 1.0, %v6544_v43  ;;  %v3807_v18 = vsel %vm3256_vm1, 1.0, %v6544_v43  ;;  %vm3255_vm3 = vcmp.eq.f32.partialorder %v4106_v57, %v3253_v22 }
  0xa0   : > { %v641_v60 = vmul.f32 %v3684_v35, %v6601_v47  ;;  %vm646_vm2 = vcmp.eq.f32.partialorder %v4113_v61, %v6603_v4  ;;  %vm3257_vm4 = vcmp.eq.f32.partialorder %v4113_v61, %v3253_v22  ;;  %v3268_v24 = vmul.f32 %v3805_v62, %v3266_v52  ;;  %v6608_v62 = vld [vmem:[#allocation15_spill] sm:$0xff]  ;;  %v6610_v47 = vld [vmem:[#allocation25_spill] sm:$0xff] }
  0xa1   : > { %v3270_v12 = vmul.f32 %v3807_v18, %v3266_v52  ;;  %v3806_v40 = vsel %vm3255_vm3, 1.0, %v6544_v43  ;;  %v3808_v63 = vsel %vm3257_vm4, 1.0, %v6544_v43  ;;  %v6605_v58 = vperm.slane %v6604_v15, 1 }
  0xa2   : > { %v3687_v35 = vsel %vm646_vm2, 1.0, %v6544_v43  ;;  %v3269_v8 = vmul.f32 %v3806_v40, %v3267_v49  ;;  %v3271_v36 = vmul.f32 %v3808_v63, %v3267_v49  ;;  %v4701_v37 = vadd.f32 %v3268_v24, %v3244_v34  ;;  %v6616_v34 = vld [vmem:[#allocation22_spill] sm:$0xff]  ;;  %v6617_v24 = vld [vmem:[#allocation21_spill] sm:$0xff] }
  0xa3   : > { %vm647_vm5 = vcmp.eq.f32.partialorder %v4113_v61, %v6605_v58  ;;  %v4703_v23 = vadd.f32 %v3270_v12, %v3246_v16  ;;  %v6609_v52 = vperm.slane %v6608_v62, 1  ;;  %v6611_v4 = vrot.slane %v6610_v47, 7 }
  0xa4   : > { %6606 = vst [vmem:[#allocation23_spill] sm:$0xff] %v4701_v37  ;;  %v3688_v22 = vsel %vm647_vm5, 1.0, %v6544_v43  ;;  %vm431_vm6 = vcmask 1046534   ;;  %v4710_v20 = vadd.f32 %v3269_v8, %v3245_v32  ;;  %v4712_v58 = vadd.f32 %v3271_v36, %v3247_v1 }
  0xa5   : > { %6607 = vst [vmem:[#allocation24_spill] sm:$0xff] %v4703_v23  ;;  %v660_v18 = vmul.f32 %v3687_v35, %v6609_v52  ;;  %v767_v33 = vperm.slane %v6611_v4, 1  ;;  %v6615_v40 = vperm.slane %v6614_v59, 1  ;;  %v733_v16 = vsel %vm431_vm6, %v6617_v24, %v6616_v34 }
  0xa6   : > { %6612 = vst [vmem:[#allocation10_spill] sm:$0xff] %v4710_v20  ;;  %v734_v52 = vrot.slane %v733_v16, 6  ;;  %vm428_vm7 = vcmask 1045509   ;;  %vm425_vm8 = vcmask 1044484   ;;  %vm422_vm9 = vcmask 1043459  }
  0xa7   : > { %6613 = vst [vmem:[#allocation11_spill] sm:$0xff] %v4712_v58  ;;  %v661_v49 = vmul.f32 %v3688_v22, %v6615_v40  ;;  %v4719_v12 = vadd.f32 %v660_v18, %v640_v46  ;;  %v845_v63 = vmul.f32 %v767_v33, %v4568_v26  ;;  %v847_v35 = vmul.f32 %v767_v33, %v4602_v5  ;;  %v6619_v40 = vld [vmem:[#allocation27_spill] sm:$0xff] }
  0xa8   : > { %v764_v1 = vperm.slane %v734_v52, 0  ;;  %v765_v8 = vperm.slane %v734_v52, 1  ;;  %v731_v36 = vsel %vm428_vm7, %v6617_v24, %v6616_v34  ;;  %v729_v18 = vsel %vm425_vm8, %v6617_v24, %v6616_v34 }
  0xa9   : > { %v665_v47 = vadd.f32 %v661_v49, %v641_v60  ;;  %v895_v32 = vpack.c.bf16 %v847_v35, %v845_v63  ;;  %v732_v46 = vrot.slane %v731_v36, 5  ;;  %v4734_v33 = vsel %vm422_vm9, %v6617_v24, %v6616_v34  ;;  %v6618_v60 = vld [vmem:[#allocation26_spill] sm:$0xff] }
  0xaa   : > { %v840_v4 = vmul.f32 %v764_v1, %v6618_v60  ;;  %v842_v49 = vmul.f32 %v764_v1, %v6619_v40  ;;  %v841_v16 = vmul.f32 %v765_v8, %v4568_v26  ;;  %v843_v63 = vmul.f32 %v765_v8, %v4602_v5 }
  0xab   : > { %v4726_v22 = vrot.slane %v665_v47, 7  ;;  %945 = vmatpush.bf16.msra.mxu2 %v895_v32  ;;  %v762_v47 = vperm.slane %v732_v46, 0  ;;  %v763_v7 = vperm.slane %v732_v46, 1  ;;  %v730_v31 = vrot.slane %v729_v18, 4 }
  0xac   : > { %v892_v58 = vpack.c.bf16 %v842_v49, %v840_v4  ;;  %v893_v20 = vpack.c.bf16 %v843_v63, %v841_v16  ;;  %vm419_vm10 = vcmask 1042434   ;;  %vm416_vm11 = vcmask 1041409  }
  0xad   : > { %v750_v35 = vsel %vm434_vm14, %v4726_v22, %v4719_v12  ;;  %v748_v52 = vsel %vm431_vm6, %v4719_v12, %v4726_v22  ;;  %v746_v32 = vsel %vm428_vm7, %v4719_v12, %v4726_v22  ;;  %v836_v23 = vmul.f32 %v762_v47, %v6618_v60 }
  0xae   : > { %v751_v36 = vrot.slane %v750_v35, 7  ;;  %v749_v1 = vrot.slane %v748_v52, 6  ;;  %v838_v8 = vmul.f32 %v762_v47, %v6619_v40  ;;  %v747_v37 = vrot.slane %v746_v32, 5  ;;  %920 = vmatpush.bf16.msra.mxu0 %v892_v58 }
  0xaf   : > { %946 = vmatpush.bf16.msra.mxu2 %v893_v20  ;;  %v837_v51 = vmul.f32 %v763_v7, %v4568_v26  ;;  %v839_v4 = vmul.f32 %v763_v7, %v4602_v5  ;;  %vm414_vm12 = vcmask 1040384  }
  0xb0   : > { %v782_v3 = vperm.slane %v751_v36, 0  ;;  %v783_v42 = vperm.slane %v751_v36, 1  ;;  %v780_v41 = vperm.slane %v749_v1, 0  ;;  %v781_v38 = vperm.slane %v749_v1, 1 }
  0xb1   : > { %v890_v9 = vpack.c.bf16 %v838_v8, %v836_v23  ;;  %v778_v48 = vperm.slane %v747_v37, 0  ;;  %v891_v1 = vpack.c.bf16 %v839_v4, %v837_v51  ;;  %v779_v8 = vperm.slane %v747_v37, 1 }
  0xb2   : > { %v876_v49 = vmul.f32 %v782_v3, %v6618_v60  ;;  %v878_v16 = vmul.f32 %v782_v3, %v6619_v40  ;;  %v877_v63 = vmul.f32 %v783_v42, %v4568_v26  ;;  %v879_v46 = vmul.f32 %v783_v42, %v4602_v5 }
  0xb3   : > { %v872_v35 = vmul.f32 %v780_v41, %v6618_v60  ;;  %v874_v58 = vmul.f32 %v780_v41, %v6619_v40  ;;  %v873_v20 = vmul.f32 %v781_v38, %v4568_v26  ;;  %v875_v23 = vmul.f32 %v781_v38, %v4602_v5  ;;  %921 = vmatpush.bf16.msra.mxu0 %v890_v9 }
  0xb4   : > { %v910_v52 = vpack.c.bf16 %v878_v16, %v876_v49  ;;  %v911_v47 = vpack.c.bf16 %v879_v46, %v877_v63  ;;  %v868_v7 = vmul.f32 %v778_v48, %v6618_v60  ;;  %v870_v32 = vmul.f32 %v778_v48, %v6619_v40  ;;  %947 = vmatpush.bf16.msra.mxu2 %v891_v1 }
  0xb5   : > { %v908_v3 = vpack.c.bf16 %v874_v58, %v872_v35  ;;  %v909_v36 = vpack.c.bf16 %v875_v23, %v873_v20  ;;  %v744_v41 = vsel %vm425_vm8, %v4719_v12, %v4726_v22  ;;  %v728_v38 = vrot.slane %v4734_v33, 3 }
  0xb6   : > { %932 = vmatpush.bf16.msra.mxu1 %v910_v52  ;;  %958 = vmatpush.bf16.msra.mxu3 %v911_v47  ;;  %v906_v42 = vpack.c.bf16 %v870_v32, %v868_v7  ;;  %v869_v9 = vmul.f32 %v779_v8, %v4568_v26  ;;  %v871_v49 = vmul.f32 %v779_v8, %v4602_v5  ;;  %v745_v48 = vrot.slane %v744_v41, 4 }
  0xb7   : > { %v742_v51 = vsel %vm422_vm9, %v4719_v12, %v4726_v22  ;;  %v760_v37 = vperm.slane %v730_v31, 0  ;;  %v761_v4 = vperm.slane %v730_v31, 1  ;;  %v758_v16 = vperm.slane %v728_v38, 0 }
  0xb8   : > { %v743_v18 = vrot.slane %v742_v51, 3  ;;  %v907_v63 = vpack.c.bf16 %v871_v49, %v869_v9  ;;  %v776_v46 = vperm.slane %v745_v48, 0  ;;  %v777_v35 = vperm.slane %v745_v48, 1 }
  0xb9   : > { %v759_v58 = vperm.slane %v728_v38, 1  ;;  %v832_v33 = vmul.f32 %v760_v37, %v6618_v60  ;;  %v834_v20 = vmul.f32 %v760_v37, %v6619_v40  ;;  %v833_v23 = vmul.f32 %v761_v4, %v4568_v26 }
  0xba   : > { %933 = vmatpush.bf16.msra.mxu1 %v908_v3  ;;  %959 = vmatpush.bf16.msra.mxu3 %v909_v36  ;;  %v774_v52 = vperm.slane %v743_v18, 0  ;;  %v864_v47 = vmul.f32 %v776_v46, %v6618_v60  ;;  %v866_v7 = vmul.f32 %v776_v46, %v6619_v40  ;;  %v835_v31 = vmul.f32 %v761_v4, %v4602_v5 }
  0xbb   : > { %v865_v32 = vmul.f32 %v777_v35, %v4568_v26  ;;  %v888_v1 = vpack.c.bf16 %v834_v20, %v832_v33  ;;  %v867_v8 = vmul.f32 %v777_v35, %v4602_v5  ;;  %v828_v3 = vmul.f32 %v758_v16, %v6618_v60 }
  0xbc   : > { %v830_v36 = vmul.f32 %v758_v16, %v6619_v40  ;;  %v904_v41 = vpack.c.bf16 %v866_v7, %v864_v47  ;;  %v889_v38 = vpack.c.bf16 %v835_v31, %v833_v23  ;;  %v860_v9 = vmul.f32 %v774_v52, %v6618_v60 }
  0xbd   : > { %v862_v49 = vmul.f32 %v774_v52, %v6619_v40  ;;  %v905_v48 = vpack.c.bf16 %v867_v8, %v865_v32  ;;  %v829_v37 = vmul.f32 %v759_v58, %v4568_v26  ;;  %v775_v4 = vperm.slane %v743_v18, 1  ;;  %922 = vmatpush.bf16.msra.mxu0 %v888_v1 }
  0xbe   : > { %934 = vmatpush.bf16.msra.mxu1 %v906_v42  ;;  %960 = vmatpush.bf16.msra.mxu3 %v907_v63  ;;  %v886_v51 = vpack.c.bf16 %v830_v36, %v828_v3  ;;  %v831_v35 = vmul.f32 %v759_v58, %v4602_v5  ;;  %v725_v42 = vsel %vm419_vm10, %v6617_v24, %v6616_v34 }
  0xbf   : > { %948 = vmatpush.bf16.msra.mxu2 %v889_v38  ;;  %v902_v46 = vpack.c.bf16 %v862_v49, %v860_v9  ;;  %v861_v16 = vmul.f32 %v775_v4, %v4568_v26  ;;  %v863_v33 = vmul.f32 %v775_v4, %v4602_v5  ;;  %v740_v63 = vsel %vm419_vm10, %v4719_v12, %v4726_v22 }
  0xc0   : > { %v887_v18 = vpack.c.bf16 %v831_v35, %v829_v37  ;;  %v726_v20 = vrot.slane %v725_v42, 2  ;;  %v741_v23 = vrot.slane %v740_v63, 2  ;;  %v723_v58 = vsel %vm416_vm11, %v6617_v24, %v6616_v34 }
  0xc1   : > { %v903_v52 = vpack.c.bf16 %v863_v33, %v861_v16  ;;  %v724_v47 = vrot.slane %v723_v58, 1  ;;  %v738_v7 = vsel %vm416_vm11, %v4719_v12, %v4726_v22  ;;  %923 = vmatpush.bf16.msra.mxu0 %v886_v51 }
  0xc2   : > { %935 = vmatpush.bf16.msra.mxu1 %v904_v41  ;;  %961 = vmatpush.bf16.msra.mxu3 %v905_v48  ;;  %v756_v31 = vperm.slane %v726_v20, 0  ;;  %v772_v32 = vperm.slane %v741_v23, 0  ;;  %v757_v1 = vperm.slane %v726_v20, 1  ;;  %v773_v8 = vperm.slane %v741_v23, 1 }
  0xc3   : > { %949 = vmatpush.bf16.msra.mxu2 %v887_v18  ;;  %v754_v3 = vperm.slane %v724_v47, 0  ;;  %v739_v36 = vrot.slane %v738_v7, 1  ;;  %v755_v38 = vperm.slane %v724_v47, 1  ;;  %v722_v41 = vsel %vm414_vm12, %v6617_v24, %v6616_v34 }
  0xc4   : > { %v824_v9 = vmul.f32 %v756_v31, %v6618_v60  ;;  %v826_v49 = vmul.f32 %v756_v31, %v6619_v40  ;;  %v856_v48 = vmul.f32 %v772_v32, %v6618_v60  ;;  %v858_v51 = vmul.f32 %v772_v32, %v6619_v40 }
  0xc5   : > { %v825_v37 = vmul.f32 %v757_v1, %v4568_v26  ;;  %v827_v4 = vmul.f32 %v757_v1, %v4602_v5  ;;  %v857_v35 = vmul.f32 %v773_v8, %v4568_v26  ;;  %v770_v16 = vperm.slane %v739_v36, 0 }
  0xc6   : > { %936 = vmatpush.bf16.msra.mxu1 %v902_v46  ;;  %962 = vmatpush.bf16.msra.mxu3 %v903_v52  ;;  %v884_v33 = vpack.c.bf16 %v826_v49, %v824_v9  ;;  %v900_v42 = vpack.c.bf16 %v858_v51, %v856_v48  ;;  %v859_v34 = vmul.f32 %v773_v8, %v4602_v5  ;;  %v771_v47 = vperm.slane %v739_v36, 1 }
  0xc7   : > { %v820_v24 = vmul.f32 %v754_v3, %v6618_v60  ;;  %v885_v63 = vpack.c.bf16 %v827_v4, %v825_v37  ;;  %v822_v18 = vmul.f32 %v754_v3, %v6619_v40  ;;  %v852_v20 = vmul.f32 %v770_v16, %v6618_v60 }
  0xc8   : > { %v854_v46 = vmul.f32 %v770_v16, %v6619_v40  ;;  %924 = vmatpush.bf16.msra.mxu0 %v884_v33  ;;  %v901_v23 = vpack.c.bf16 %v859_v34, %v857_v35  ;;  %v821_v58 = vmul.f32 %v755_v38, %v4568_v26  ;;  %v823_v52 = vmul.f32 %v755_v38, %v4602_v5 }
  0xc9   : > { %950 = vmatpush.bf16.msra.mxu2 %v885_v63  ;;  %v882_v7 = vpack.c.bf16 %v822_v18, %v820_v24  ;;  %v752_v32 = vperm.slane %v722_v41, 0  ;;  %v737_v1 = vsel %vm414_vm12, %v4719_v12, %v4726_v22  ;;  %v853_v3 = vmul.f32 %v771_v47, %v4568_v26 }
  0xca   : > { %937 = vmatpush.bf16.msra.mxu1 %v900_v42  ;;  %v898_v31 = vpack.c.bf16 %v854_v46, %v852_v20  ;;  %963 = vmatpush.bf16.msra.mxu3 %v901_v23  ;;  %v883_v8 = vpack.c.bf16 %v823_v52, %v821_v58  ;;  %v855_v9 = vmul.f32 %v771_v47, %v4602_v5  ;;  %v768_v49 = vperm.slane %v737_v1, 0 }
  0xcb   : > { %v816_v38 = vmul.f32 %v752_v32, %v6618_v60  ;;  %v818_v36 = vmul.f32 %v752_v32, %v6619_v40  ;;  %v753_v48 = vperm.slane %v722_v41, 1  ;;  %v769_v51 = vperm.slane %v737_v1, 1 }
  0xcc   : > { %925 = vmatpush.bf16.msra.mxu0 %v882_v7  ;;  %v899_v37 = vpack.c.bf16 %v855_v9, %v853_v3  ;;  %v848_v4 = vmul.f32 %v768_v49, %v6618_v60  ;;  %v850_v12 = vmul.f32 %v768_v49, %v6619_v40  ;;  %v306_v22 = vperm.slane %v6584_v27, 0  ;;  %v229_v7 = vld [vmem:[%s4840_s7 + $0x8] sm:$0xff] }
  0xcd   : > { %951 = vmatpush.bf16.msra.mxu2 %v883_v8  ;;  %v880_v35 = vpack.c.bf16 %v818_v36, %v816_v38  ;;  %v817_v16 = vmul.f32 %v753_v48, %v4568_v26  ;;  %v819_v33 = vmul.f32 %v753_v48, %v4602_v5  ;;  %v307_v42 = vperm.slane %v6588_v50, 0 }
  0xce   : > { %938 = vmatpush.bf16.msra.mxu1 %v898_v31  ;;  %964 = vmatpush.bf16.msra.mxu3 %v899_v37  ;;  %v896_v41 = vpack.c.bf16 %v850_v12, %v848_v4  ;;  %v849_v34 = vmul.f32 %v769_v51, %v4568_v26  ;;  %v851_v24 = vmul.f32 %v769_v51, %v4602_v5  ;;  %v320_v63 = vperm.slane %v6598_v29, 0 }
  0xcf   : > { %vm308_vm13 = vcmp.eq.f32.partialorder %v4106_v57, %v306_v22  ;;  %v881_v60 = vpack.c.bf16 %v819_v33, %v817_v16  ;;  %vm309_vm15 = vcmp.eq.f32.partialorder %v4106_v57, %v307_v42  ;;  %v321_v5 = vperm.slane %v6600_v6, 0 }
  0xd0   : > { %v3665_v40 = vsel %vm308_vm13, 1.0, %v6544_v43  ;;  %926 = vmatpush.bf16.msra.mxu0 %v880_v35  ;;  %v897_v18 = vpack.c.bf16 %v851_v24, %v849_v34  ;;  %v3666_v26 = vsel %vm309_vm15, 1.0, %v6544_v43  ;;  %v328_v20 = vperm.slane %v6602_v56, 0 }
  0xd1   : > { %952 = vmatpush.bf16.msra.mxu2 %v881_v60  ;;  %v322_v46 = vmul.f32 %v3665_v40, %v320_v63  ;;  %v329_v23 = vperm.slane %v6604_v15, 0  ;;  %v342_v58 = vperm.slane %v6608_v62, 0  ;;  %v343_v52 = vperm.slane %v6614_v59, 0 }
  0xd2   : > { %939 = vmatpush.bf16.msra.mxu1 %v896_v41  ;;  %965 = vmatpush.bf16.msra.mxu3 %v897_v18  ;;  %v323_v47 = vmul.f32 %v3666_v26, %v321_v5  ;;  %vm330_vm0 = vcmp.eq.f32.partialorder %v4106_v57, %v328_v20  ;;  %vm310_vm1 = vcmp.eq.f32.partialorder %v4113_v61, %v306_v22  ;;  %v913_v36 = vunpack.c.l.b16 %v229_v7 }
  0xd3   : > { %vm311_vm2 = vcmp.eq.f32.partialorder %v4113_v61, %v307_v42  ;;  %vm331_vm3 = vcmp.eq.f32.partialorder %v4106_v57, %v329_v23  ;;  %v3669_v31 = vsel %vm330_vm0, 1.0, %v6544_v43  ;;  %v3667_v32 = vsel %vm310_vm1, 1.0, %v6544_v43 }
  0xd4   : > { %v3668_v1 = vsel %vm311_vm2, 1.0, %v6544_v43  ;;  %v3670_v8 = vsel %vm331_vm3, 1.0, %v6544_v43  ;;  %v344_v3 = vmul.f32 %v3669_v31, %v342_v58  ;;  %v324_v9 = vmul.f32 %v3667_v32, %v320_v63 }
  0xd5   : > { %v325_v49 = vmul.f32 %v3668_v1, %v321_v5  ;;  %v345_v38 = vmul.f32 %v3670_v8, %v343_v52  ;;  %vm332_vm4 = vcmp.eq.f32.partialorder %v4113_v61, %v328_v20  ;;  %vm333_vm5 = vcmp.eq.f32.partialorder %v4113_v61, %v329_v23 }
  0xd6   : > { %v4859_v48 = vadd.f32 %v344_v3, %v322_v46  ;;  %v3671_v51 = vsel %vm332_vm4, 1.0, %v6544_v43  ;;  %v3672_v37 = vsel %vm333_vm5, 1.0, %v6544_v43  ;;  %v914_v4 = vunpack.c.h.b16 %v229_v7 }
  0xd7   : > { %v349_v12 = vadd.f32 %v345_v38, %v323_v47  ;;  %v346_v22 = vmul.f32 %v3671_v51, %v342_v58  ;;  %v347_v35 = vmul.f32 %v3672_v37, %v343_v52  ;;  %v915_v16 = vpack.c.b16 %v913_v36, %v913_v36 }
  0xd8   : > { %v2873_v33 = vperm.slane %v4639_v10, 0  ;;  %v2883_v42 = vperm.slane %v4618_v2, 0  ;;  %v2884_v41 = vperm.slane %v4647_v21, 0  ;;  %v916_v34 = vpack.c.b16 %v914_v4, %v914_v4  ;;  %v6635_v2 = vld [vmem:[#allocation8_spill] sm:$0xff] }
  0xd9   : > { %v4867_v60 = vrot.slane %v349_v12, 7  ;;  %v4869_v40 = vadd.f32 %v346_v22, %v324_v9  ;;  %v351_v63 = vadd.f32 %v347_v35, %v325_v49  ;;  %953 = vmatmul.bf16.vlgmr.msra.gmra.mxu2 %v915_v16  ;;  %927 = vmatmul.bf16.vlgmr.msra.gmra.mxu0 %v915_v16  ;;  %v1040_v5 = vperm.slane %v6584_v27, 2 }
  0xda   : > { %966 = vmatmul.bf16.vlgmr.msra.gmra.mxu3 %v916_v34  ;;  %940 = vmatmul.bf16.vlgmr.msra.gmra.mxu1 %v916_v34  ;;  %v1041_v20 = vperm.slane %v6588_v50, 2  ;;  %v1401_v10 = vperm.slane %v4605_v53, 3 }
  0xdb   : > { %v435_v46 = vsel %vm434_vm14, %v4867_v60, %v4859_v48  ;;  %v4878_v23 = vrot.slane %v351_v63, 7  ;;  %v432_v58 = vsel %vm431_vm6, %v4859_v48, %v4867_v60  ;;  %v429_v52 = vsel %vm428_vm7, %v4859_v48, %v4867_v60 }
  0xdc   : > { %v436_v47 = vrot.slane %v435_v46, 7  ;;  %v433_v7 = vrot.slane %v432_v58, 6  ;;  %v430_v31 = vrot.slane %v429_v52, 5  ;;  %v4889_v32 = vsel %vm425_vm8, %v4859_v48, %v4867_v60 }
  0xdd   : > { %v450_v1 = vsel %vm434_vm14, %v4878_v23, %v4869_v40  ;;  %v448_v8 = vsel %vm431_vm6, %v4869_v40, %v4878_v23  ;;  %v446_v3 = vsel %vm428_vm7, %v4869_v40, %v4878_v23  ;;  %v427_v9 = vrot.slane %v4889_v32, 4 }
  0xde   : > { %v466_v49 = vperm.slane %v436_v47, 0  ;;  %v451_v38 = vrot.slane %v450_v1, 7  ;;  %v467_v36 = vperm.slane %v436_v47, 1  ;;  %v464_v51 = vperm.slane %v433_v7, 0 }
  0xdf   : > { %v449_v37 = vrot.slane %v448_v8, 6  ;;  %v465_v4 = vperm.slane %v433_v7, 1  ;;  %v462_v12 = vperm.slane %v430_v31, 0  ;;  %v447_v22 = vrot.slane %v446_v3, 5 }
  0xe0   : > { %v544_v35 = vmul.f32 %v466_v49, %v4537_v28  ;;  %v546_v16 = vmul.f32 %v466_v49, %v4550_v30  ;;  %v482_v34 = vperm.slane %v451_v38, 0  ;;  %v545_v63 = vmul.f32 %v467_v36, %v4546_v55 }
  0xe1   : > { %v547_v46 = vmul.f32 %v467_v36, %v4555_v44  ;;  %v483_v58 = vperm.slane %v451_v38, 1  ;;  %v540_v52 = vmul.f32 %v464_v51, %v4537_v28  ;;  %v542_v32 = vmul.f32 %v464_v51, %v4550_v30 }
  0xe2   : > { %v594_v47 = vpack.c.bf16 %v546_v16, %v544_v35  ;;  %v576_v1 = vmul.f32 %v482_v34, %v4537_v28  ;;  %v578_v7 = vmul.f32 %v482_v34, %v4550_v30  ;;  %v480_v8 = vperm.slane %v449_v37, 0 }
  0xe3   : > { %v595_v3 = vpack.c.bf16 %v547_v46, %v545_v63  ;;  %v577_v26 = vmul.f32 %v483_v58, %v4546_v55  ;;  %v579_v49 = vmul.f32 %v483_v58, %v4555_v44  ;;  %v592_v24 = vpack.c.bf16 %v542_v32, %v540_v52 }
  0xe4   : > { %978 = vmatpush.bf16.msrb.mxu0 %v594_v47  ;;  %v610_v18 = vpack.c.bf16 %v578_v7, %v576_v1  ;;  %v572_v38 = vmul.f32 %v480_v8, %v4537_v28  ;;  %v574_v36 = vmul.f32 %v480_v8, %v4550_v30  ;;  %v541_v51 = vmul.f32 %v465_v4, %v4546_v55 }
  0xe5   : > { %1004 = vmatpush.bf16.msrb.mxu2 %v595_v3  ;;  %v611_v35 = vpack.c.bf16 %v579_v49, %v577_v26  ;;  %v543_v16 = vmul.f32 %v465_v4, %v4555_v44  ;;  %v481_v34 = vperm.slane %v449_v37, 1  ;;  %v536_v63 = vmul.f32 %v462_v12, %v4537_v28 }
  0xe6   : > { %991 = vmatpush.bf16.msrb.mxu1 %v610_v18  ;;  %v608_v46 = vpack.c.bf16 %v574_v36, %v572_v38  ;;  %v538_v58 = vmul.f32 %v462_v12, %v4550_v30  ;;  %v478_v52 = vperm.slane %v447_v22, 0  ;;  %v463_v32 = vperm.slane %v430_v31, 1 }
  0xe7   : > { %1017 = vmatpush.bf16.msrb.mxu3 %v611_v35  ;;  %v593_v47 = vpack.c.bf16 %v543_v16, %v541_v51  ;;  %v573_v1 = vmul.f32 %v481_v34, %v4546_v55  ;;  %v575_v7 = vmul.f32 %v481_v34, %v4555_v44  ;;  %v479_v8 = vperm.slane %v447_v22, 1 }
  0xe8   : > { %979 = vmatpush.bf16.msrb.mxu0 %v592_v24  ;;  %v590_v26 = vpack.c.bf16 %v538_v58, %v536_v63  ;;  %v568_v4 = vmul.f32 %v478_v52, %v4537_v28  ;;  %v570_v37 = vmul.f32 %v478_v52, %v4550_v30  ;;  %v537_v18 = vmul.f32 %v463_v32, %v4546_v55 }
  0xe9   : > { %1005 = vmatpush.bf16.msrb.mxu2 %v593_v47  ;;  %v609_v3 = vpack.c.bf16 %v575_v7, %v573_v1  ;;  %v539_v12 = vmul.f32 %v463_v32, %v4555_v44  ;;  %v569_v31 = vmul.f32 %v479_v8, %v4546_v55  ;;  %v571_v49 = vmul.f32 %v479_v8, %v4555_v44 }
  0xea   : > { %992 = vmatpush.bf16.msrb.mxu1 %v608_v46  ;;  %v606_v38 = vpack.c.bf16 %v570_v37, %v568_v4  ;;  %v460_v36 = vperm.slane %v427_v9, 0  ;;  %v444_v24 = vsel %vm425_vm8, %v4869_v40, %v4878_v23  ;;  %v461_v22 = vperm.slane %v427_v9, 1 }
  0xeb   : > { %1018 = vmatpush.bf16.msrb.mxu3 %v609_v3  ;;  %v591_v51 = vpack.c.bf16 %v539_v12, %v537_v18  ;;  %v607_v35 = vpack.c.bf16 %v571_v49, %v569_v31  ;;  %v445_v16 = vrot.slane %v444_v24, 4  ;;  %v423_v34 = vsel %vm422_vm9, %v4859_v48, %v4867_v60 }
  0xec   : > { %980 = vmatpush.bf16.msrb.mxu0 %v590_v26  ;;  %v532_v63 = vmul.f32 %v460_v36, %v4537_v28  ;;  %v534_v46 = vmul.f32 %v460_v36, %v4550_v30  ;;  %v533_v58 = vmul.f32 %v461_v22, %v4546_v55  ;;  %v535_v52 = vmul.f32 %v461_v22, %v4555_v44 }
  0xed   : > { %1006 = vmatpush.bf16.msrb.mxu2 %v591_v51  ;;  %v476_v32 = vperm.slane %v445_v16, 0  ;;  %v477_v9 = vperm.slane %v445_v16, 1  ;;  %v424_v47 = vrot.slane %v423_v34, 3  ;;  %v442_v1 = vsel %vm422_vm9, %v4869_v40, %v4878_v23 }
  0xee   : > { %993 = vmatpush.bf16.msrb.mxu1 %v606_v38  ;;  %v588_v7 = vpack.c.bf16 %v534_v46, %v532_v63  ;;  %v589_v8 = vpack.c.bf16 %v535_v52, %v533_v58  ;;  %v443_v26 = vrot.slane %v442_v1, 3  ;;  %v420_v4 = vsel %vm419_vm10, %v4859_v48, %v4867_v60 }
  0xef   : > { %1019 = vmatpush.bf16.msrb.mxu3 %v607_v35  ;;  %v564_v37 = vmul.f32 %v476_v32, %v4537_v28  ;;  %v566_v18 = vmul.f32 %v476_v32, %v4550_v30  ;;  %v565_v3 = vmul.f32 %v477_v9, %v4546_v55  ;;  %v567_v12 = vmul.f32 %v477_v9, %v4555_v44 }
  0xf0   : > { %981 = vmatpush.bf16.msrb.mxu0 %v588_v7  ;;  %v458_v31 = vperm.slane %v424_v47, 0  ;;  %v474_v49 = vperm.slane %v443_v26, 0  ;;  %v459_v38 = vperm.slane %v424_v47, 1  ;;  %v475_v36 = vperm.slane %v443_v26, 1 }
  0xf1   : > { %v604_v24 = vpack.c.bf16 %v566_v18, %v564_v37  ;;  %1007 = vmatpush.bf16.msrb.mxu2 %v589_v8  ;;  %v605_v22 = vpack.c.bf16 %v567_v12, %v565_v3  ;;  %v421_v51 = vrot.slane %v420_v4, 2  ;;  %v440_v35 = vsel %vm419_vm10, %v4869_v40, %v4878_v23 }
  0xf2   : > { %v528_v16 = vmul.f32 %v458_v31, %v4537_v28  ;;  %v530_v34 = vmul.f32 %v458_v31, %v4550_v30  ;;  %v560_v63 = vmul.f32 %v474_v49, %v4537_v28  ;;  %v562_v46 = vmul.f32 %v474_v49, %v4550_v30 }
  0xf3   : > { %994 = vmatpush.bf16.msrb.mxu1 %v604_v24  ;;  %1020 = vmatpush.bf16.msrb.mxu3 %v605_v22  ;;  %v529_v58 = vmul.f32 %v459_v38, %v4546_v55  ;;  %v531_v52 = vmul.f32 %v459_v38, %v4555_v44  ;;  %v561_v32 = vmul.f32 %v475_v36, %v4546_v55  ;;  %v456_v9 = vperm.slane %v421_v51, 0 }
  0xf4   : > { %v586_v47 = vpack.c.bf16 %v530_v34, %v528_v16  ;;  %v602_v1 = vpack.c.bf16 %v562_v46, %v560_v63  ;;  %v563_v7 = vmul.f32 %v475_v36, %v4555_v44  ;;  %v441_v8 = vrot.slane %v440_v35, 2 }
  0xf5   : > { %v587_v26 = vpack.c.bf16 %v531_v52, %v529_v58  ;;  %v524_v4 = vmul.f32 %v456_v9, %v4537_v28  ;;  %v526_v37 = vmul.f32 %v456_v9, %v4550_v30  ;;  %v457_v18 = vperm.slane %v421_v51, 1 }
  0xf6   : > { %982 = vmatpush.bf16.msrb.mxu0 %v586_v47  ;;  %v603_v3 = vpack.c.bf16 %v563_v7, %v561_v32  ;;  %v472_v12 = vperm.slane %v441_v8, 0  ;;  %v473_v31 = vperm.slane %v441_v8, 1  ;;  %v417_v49 = vsel %vm416_vm11, %v4859_v48, %v4867_v60 }
  0xf7   : > { %995 = vmatpush.bf16.msrb.mxu1 %v602_v1  ;;  %1008 = vmatpush.bf16.msrb.mxu2 %v587_v26  ;;  %v584_v38 = vpack.c.bf16 %v526_v37, %v524_v4  ;;  %v525_v36 = vmul.f32 %v457_v18, %v4546_v55  ;;  %v527_v24 = vmul.f32 %v457_v18, %v4555_v44  ;;  %v418_v22 = vrot.slane %v417_v49, 1 }
  0xf8   : > { %vm4966_vm13 = vcmp.eq.f32.partialorder %v4106_v57, %v1040_v5  ;;  %vm4973_vm15 = vcmp.eq.f32.partialorder %v4106_v57, %v1041_v20  ;;  %1021 = vmatpush.bf16.msrb.mxu3 %v603_v3  ;;  %v556_v16 = vmul.f32 %v472_v12, %v4537_v28  ;;  %v558_v34 = vmul.f32 %v472_v12, %v4550_v30 }
  0xf9   : > { %v557_v63 = vmul.f32 %v473_v31, %v4546_v55  ;;  %v559_v46 = vmul.f32 %v473_v31, %v4555_v44  ;;  %v585_v58 = vpack.c.bf16 %v527_v24, %v525_v36  ;;  %v454_v52 = vperm.slane %v418_v22, 0 }
  0xfa   : > { %v438_v32 = vsel %vm416_vm11, %v4869_v40, %v4878_v23  ;;  %v455_v9 = vperm.slane %v418_v22, 1  ;;  %983 = vmatpush.bf16.msrb.mxu0 %v584_v38  ;;  %v600_v47 = vpack.c.bf16 %v558_v34, %v556_v16  ;;  %v415_v8 = vsel %vm414_vm12, %v4859_v48, %v4867_v60 }
  0xfb   : > { %v601_v1 = vpack.c.bf16 %v559_v46, %v557_v63  ;;  %v439_v7 = vrot.slane %v438_v32, 1  ;;  %1009 = vmatpush.bf16.msrb.mxu2 %v585_v58  ;;  %v520_v26 = vmul.f32 %v454_v52, %v4537_v28  ;;  %v522_v4 = vmul.f32 %v454_v52, %v4550_v30 }
  0xfc   : > { %v521_v37 = vmul.f32 %v455_v9, %v4546_v55  ;;  %v523_v18 = vmul.f32 %v455_v9, %v4555_v44  ;;  %996 = vmatpush.bf16.msrb.mxu1 %v600_v47  ;;  %v452_v31 = vperm.slane %v415_v8, 0  ;;  %v437_v49 = vsel %vm414_vm12, %v4869_v40, %v4878_v23 }
  0xfd   : > { %1022 = vmatpush.bf16.msrb.mxu3 %v601_v1  ;;  %v470_v3 = vperm.slane %v439_v7, 0  ;;  %v471_v12 = vperm.slane %v439_v7, 1  ;;  %v582_v38 = vpack.c.bf16 %v522_v4, %v520_v26  ;;  %v468_v60 = vperm.slane %v437_v49, 0 }
  0xfe   : > { %v583_v48 = vpack.c.bf16 %v523_v18, %v521_v37  ;;  %v453_v36 = vperm.slane %v415_v8, 1  ;;  %v516_v63 = vmul.f32 %v452_v31, %v4537_v28  ;;  %v518_v46 = vmul.f32 %v452_v31, %v4550_v30 }
  0xff   : > { %v552_v24 = vmul.f32 %v470_v3, %v4537_v28  ;;  %v554_v22 = vmul.f32 %v470_v3, %v4550_v30  ;;  %v553_v16 = vmul.f32 %v471_v12, %v4546_v55  ;;  %v555_v34 = vmul.f32 %v471_v12, %v4555_v44  ;;  %984 = vmatpush.bf16.msrb.mxu0 %v582_v38 }
 0x100   : > { %1010 = vmatpush.bf16.msrb.mxu2 %v583_v48  ;;  %v548_v40 = vmul.f32 %v468_v60, %v4537_v28  ;;  %v469_v23 = vperm.slane %v437_v49, 1  ;;  %v550_v32 = vmul.f32 %v468_v60, %v4550_v30  ;;  %v517_v9 = vmul.f32 %v453_v36, %v4546_v55 }
 0x101   : > { %v598_v58 = vpack.c.bf16 %v554_v22, %v552_v24  ;;  %v599_v52 = vpack.c.bf16 %v555_v34, %v553_v16  ;;  %v580_v47 = vpack.c.bf16 %v518_v46, %v516_v63  ;;  %v519_v1 = vmul.f32 %v453_v36, %v4555_v44 }
 0x102   : > { %v549_v7 = vmul.f32 %v469_v23, %v4546_v55  ;;  %v551_v8 = vmul.f32 %v469_v23, %v4555_v44  ;;  %v596_v26 = vpack.c.bf16 %v550_v32, %v548_v40  ;;  %v3697_v28 = vsel %vm4966_vm13, 1.0, %v6544_v43 }
 0x103   : > { %997 = vmatpush.bf16.msrb.mxu1 %v598_v58  ;;  %1023 = vmatpush.bf16.msrb.mxu3 %v599_v52  ;;  %v3698_v30 = vsel %vm4973_vm15, 1.0, %v6544_v43  ;;  %v1054_v4 = vperm.slane %v6598_v29, 2  ;;  %v581_v37 = vpack.c.bf16 %v519_v1, %v517_v9  ;;  %v1055_v55 = vperm.slane %v6600_v6, 2  ;;  %v228_v29 = vld [vmem:[%s4840_s7] sm:$0xff] }
 0x104   : > { %985 = vmatpush.bf16.msrb.mxu0 %v580_v47  ;;  %v597_v18 = vpack.c.bf16 %v551_v8, %v549_v7  ;;  %v1060_v44 = vperm.slane %v6602_v56, 2  ;;  %v1061_v12 = vperm.slane %v6604_v15, 2  ;;  %v1074_v51 = vperm.slane %v6608_v62, 2 }
 0x105   : > { %v1056_v3 = vmul.f32 %v3697_v28, %v1054_v4  ;;  %v1075_v31 = vperm.slane %v6614_v59, 2  ;;  %1011 = vmatpush.bf16.msrb.mxu2 %v581_v37  ;;  %v1057_v35 = vmul.f32 %v3698_v30, %v1055_v55  ;;  %vm1044_vm1 = vcmp.eq.f32.partialorder %v4113_v61, %v1040_v5 }
 0x106   : > { %vm1062_vm0 = vcmp.eq.f32.partialorder %v4106_v57, %v1060_v44  ;;  %vm1045_vm2 = vcmp.eq.f32.partialorder %v4113_v61, %v1041_v20  ;;  %vm1063_vm3 = vcmp.eq.f32.partialorder %v4106_v57, %v1061_v12  ;;  %v3699_v59 = vsel %vm1044_vm1, 1.0, %v6544_v43 }
 0x107   : > { %998 = vmatpush.bf16.msrb.mxu1 %v596_v26  ;;  %1024 = vmatpush.bf16.msrb.mxu3 %v597_v18  ;;  %v3701_v6 = vsel %vm1062_vm0, 1.0, %v6544_v43  ;;  %v3700_v56 = vsel %vm1045_vm2, 1.0, %v6544_v43  ;;  %v3702_v15 = vsel %vm1063_vm3, 1.0, %v6544_v43  ;;  %v1058_v62 = vmul.f32 %v3699_v59, %v1054_v4 }
 0x108   : > { %v1076_v27 = vmul.f32 %v3701_v6, %v1074_v51  ;;  %v1059_v5 = vmul.f32 %v3700_v56, %v1055_v55  ;;  %v1077_v49 = vmul.f32 %v3702_v15, %v1075_v31  ;;  %vm1064_vm4 = vcmp.eq.f32.partialorder %v4113_v61, %v1060_v44  ;;  %v6624_v56 = vld [vmem:[#allocation28_spill] sm:$0xff] }
 0x109   : > { %vm1065_vm5 = vcmp.eq.f32.partialorder %v4113_v61, %v1061_v12  ;;  %v972_v50 = vunpack.c.l.b16 %v228_v29  ;;  %v3703_v38 = vsel %vm1064_vm4, 1.0, %v6544_v43  ;;  %v973_v60 = vunpack.c.h.b16 %v228_v29 }
 0x10a   : > { %v5033_v20 = vadd.f32 %v1076_v27, %v1056_v3  ;;  %v3704_v48 = vsel %vm1065_vm5, 1.0, %v6544_v43  ;;  %v1081_v36 = vadd.f32 %v1077_v49, %v1057_v35  ;;  %v1078_v24 = vmul.f32 %v3703_v38, %v1074_v51  ;;  %v6625_v27 = vld [vmem:[#allocation29_spill] sm:$0xff] }
 0x10b   : > { %v1079_v22 = vmul.f32 %v3704_v48, %v1075_v31  ;;  %v974_v16 = vpack.c.b16 %v972_v50, %v972_v50  ;;  %v5040_v34 = vmul.f32 %v4642_v25, %v2873_v33  ;;  %v975_v63 = vpack.c.b16 %v973_v60, %v973_v60 }
 0x10c   : > { %v5044_v46 = vsub.f32 %v4571_v39, %v4605_v53  ;;  %v5048_v40 = vsub.f32 %v4587_v14, %v4608_v19  ;;  %v5053_v23 = vmul.f32 %v4653_v17, %v2873_v33  ;;  %v5055_v58 = vrot.slane %v1081_v36, 7 }
 0x10d   : > { %v5057_v52 = vadd.f32 %v1078_v24, %v1058_v62  ;;  %v1083_v25 = vadd.f32 %v1079_v22, %v1059_v5  ;;  %1012 = vmatmul.bf16.vlgmr.msrb.gmra.mxu2 %v974_v16  ;;  %986 = vmatmul.bf16.vlgmr.msrb.gmra.mxu0 %v974_v16  ;;  %v1402_v17 = vperm.slane %v4608_v19, 3  ;;  %vm5158_vm13 = vcmp.eq.f32.partialorder %v4106_v57, %v1401_v10 }
 0x10e   : > { %1025 = vmatmul.bf16.vlgmr.msrb.gmra.mxu3 %v975_v63  ;;  %999 = vmatmul.bf16.vlgmr.msrb.gmra.mxu1 %v975_v63  ;;  %v5060_v39 = vsub.f32 1.0, %v5044_v46  ;;  %v5063_v14 = vsub.f32 1.0, %v5048_v40  ;;  %v1153_v33 = vsel %vm434_vm14, %v5055_v58, %v5033_v20  ;;  %v1151_v9 = vsel %vm431_vm6, %v5033_v20, %v5055_v58 }
 0x10f   : > { %v5070_v32 = vrot.slane %v1083_v25, 7  ;;  %v1149_v47 = vsel %vm428_vm7, %v5033_v20, %v5055_v58  ;;  %v1154_v1 = vrot.slane %v1153_v33, 7  ;;  %v1152_v7 = vrot.slane %v1151_v9, 6 }
 0x110   : > { %v1150_v8 = vrot.slane %v1149_v47, 5  ;;  %v5081_v26 = vsel %vm425_vm8, %v5033_v20, %v5055_v58  ;;  %vm5194_vm15 = vcmp.eq.f32.partialorder %v4106_v57, %v2883_v42  ;;  %vm1404_vm0 = vcmp.eq.f32.partialorder %v4106_v57, %v1402_v17 }
 0x111   : > { %v1168_v28 = vsel %vm434_vm14, %v5070_v32, %v5057_v52  ;;  %v1166_v30 = vsel %vm431_vm6, %v5057_v52, %v5070_v32  ;;  %v1164_v4 = vsel %vm428_vm7, %v5057_v52, %v5070_v32  ;;  %v1148_v37 = vrot.slane %v5081_v26, 4 }
 0x112   : > { %v1184_v18 = vperm.slane %v1154_v1, 0  ;;  %v1169_v55 = vrot.slane %v1168_v28, 7  ;;  %v1185_v44 = vperm.slane %v1154_v1, 1  ;;  %v1182_v3 = vperm.slane %v1152_v7, 0 }
 0x113   : > { %v1167_v12 = vrot.slane %v1166_v30, 6  ;;  %v1183_v51 = vperm.slane %v1152_v7, 1  ;;  %v1180_v31 = vperm.slane %v1150_v8, 0  ;;  %v1165_v35 = vrot.slane %v1164_v4, 5 }
 0x114   : > { %v1262_v29 = vmul.f32 %v1184_v18, %v4401_v0  ;;  %v1264_v6 = vmul.f32 %v1184_v18, %v4403_v54  ;;  %v1200_v59 = vperm.slane %v1169_v55, 0  ;;  %v1263_v15 = vmul.f32 %v1185_v44, %v6624_v56 }
 0x115   : > { %v1265_v62 = vmul.f32 %v1185_v44, %v6625_v27  ;;  %v1201_v5 = vperm.slane %v1169_v55, 1  ;;  %v1258_v49 = vmul.f32 %v1182_v3, %v4401_v0  ;;  %v1260_v50 = vmul.f32 %v1182_v3, %v4403_v54 }
 0x116   : > { %v1312_v38 = vpack.c.bf16 %v1264_v6, %v1262_v29  ;;  %v1294_v48 = vmul.f32 %v1200_v59, %v4401_v0  ;;  %v1296_v60 = vmul.f32 %v1200_v59, %v4403_v54  ;;  %v1198_v36 = vperm.slane %v1167_v12, 0 }
 0x117   : > { %v1313_v24 = vpack.c.bf16 %v1265_v62, %v1263_v15  ;;  %v1295_v22 = vmul.f32 %v1201_v5, %v6624_v56  ;;  %v1297_v16 = vmul.f32 %v1201_v5, %v6625_v27  ;;  %v1310_v63 = vpack.c.bf16 %v1260_v50, %v1258_v49 }
 0x118   : > { %1337 = vmatpush.bf16.msra.mxu0 %v1312_v38  ;;  %v1328_v25 = vpack.c.bf16 %v1296_v60, %v1294_v48  ;;  %v1290_v33 = vmul.f32 %v1198_v36, %v4401_v0  ;;  %v1292_v9 = vmul.f32 %v1198_v36, %v4403_v54  ;;  %v1259_v47 = vmul.f32 %v1183_v51, %v6624_v56 }
 0x119   : > { %1363 = vmatpush.bf16.msra.mxu2 %v1313_v24  ;;  %v1329_v1 = vpack.c.bf16 %v1297_v16, %v1295_v22  ;;  %v1261_v7 = vmul.f32 %v1183_v51, %v6625_v27  ;;  %v1199_v26 = vperm.slane %v1167_v12, 1  ;;  %v1254_v28 = vmul.f32 %v1180_v31, %v4401_v0 }
 0x11a   : > { %1350 = vmatpush.bf16.msra.mxu1 %v1328_v25  ;;  %v1326_v30 = vpack.c.bf16 %v1292_v9, %v1290_v33  ;;  %v1256_v4 = vmul.f32 %v1180_v31, %v4403_v54  ;;  %v1196_v18 = vperm.slane %v1165_v35, 0  ;;  %v1181_v55 = vperm.slane %v1150_v8, 1 }
 0x11b   : > { %1376 = vmatpush.bf16.msra.mxu3 %v1329_v1  ;;  %v1311_v44 = vpack.c.bf16 %v1261_v7, %v1259_v47  ;;  %v1291_v3 = vmul.f32 %v1199_v26, %v6624_v56  ;;  %v1293_v29 = vmul.f32 %v1199_v26, %v6625_v27  ;;  %v1197_v6 = vperm.slane %v1165_v35, 1 }
 0x11c   : > { %1338 = vmatpush.bf16.msra.mxu0 %v1310_v63  ;;  %v1308_v59 = vpack.c.bf16 %v1256_v4, %v1254_v28  ;;  %v1286_v51 = vmul.f32 %v1196_v18, %v4401_v0  ;;  %v1288_v12 = vmul.f32 %v1196_v18, %v4403_v54  ;;  %v1255_v15 = vmul.f32 %v1181_v55, %v6624_v56 }
 0x11d   : > { %1364 = vmatpush.bf16.msra.mxu2 %v1311_v44  ;;  %v1327_v62 = vpack.c.bf16 %v1293_v29, %v1291_v3  ;;  %v1257_v31 = vmul.f32 %v1181_v55, %v6625_v27  ;;  %v1287_v8 = vmul.f32 %v1197_v6, %v6624_v56  ;;  %v1289_v5 = vmul.f32 %v1197_v6, %v6625_v27 }
 0x11e   : > { %1351 = vmatpush.bf16.msra.mxu1 %v1326_v30  ;;  %v1324_v49 = vpack.c.bf16 %v1288_v12, %v1286_v51  ;;  %v1178_v50 = vperm.slane %v1148_v37, 0  ;;  %v1162_v35 = vsel %vm425_vm8, %v5057_v52, %v5070_v32  ;;  %v1179_v38 = vperm.slane %v1148_v37, 1 }
 0x11f   : > { %1377 = vmatpush.bf16.msra.mxu3 %v1327_v62  ;;  %v1309_v48 = vpack.c.bf16 %v1257_v31, %v1255_v15  ;;  %v1325_v60 = vpack.c.bf16 %v1289_v5, %v1287_v8  ;;  %v1163_v36 = vrot.slane %v1162_v35, 4  ;;  %v1145_v24 = vsel %vm422_vm9, %v5033_v20, %v5055_v58 }
 0x120   : > { %1339 = vmatpush.bf16.msra.mxu0 %v1308_v59  ;;  %v1250_v22 = vmul.f32 %v1178_v50, %v4401_v0  ;;  %v1252_v16 = vmul.f32 %v1178_v50, %v4403_v54  ;;  %v1251_v63 = vmul.f32 %v1179_v38, %v6624_v56  ;;  %v1253_v25 = vmul.f32 %v1179_v38, %v6625_v27 }
 0x121   : > { %1365 = vmatpush.bf16.msra.mxu2 %v1309_v48  ;;  %v1194_v33 = vperm.slane %v1163_v36, 0  ;;  %v1195_v37 = vperm.slane %v1163_v36, 1  ;;  %v1146_v9 = vrot.slane %v1145_v24, 3  ;;  %v1160_v47 = vsel %vm422_vm9, %v5057_v52, %v5070_v32 }
 0x122   : > { %1352 = vmatpush.bf16.msra.mxu1 %v1324_v49  ;;  %v1306_v1 = vpack.c.bf16 %v1252_v16, %v1250_v22  ;;  %v1307_v7 = vpack.c.bf16 %v1253_v25, %v1251_v63  ;;  %v1161_v26 = vrot.slane %v1160_v47, 3  ;;  %v1143_v28 = vsel %vm419_vm10, %v5033_v20, %v5055_v58 }
 0x123   : > { %1378 = vmatpush.bf16.msra.mxu3 %v1325_v60  ;;  %v1282_v30 = vmul.f32 %v1194_v33, %v4401_v0  ;;  %v1284_v4 = vmul.f32 %v1194_v33, %v4403_v54  ;;  %v1283_v18 = vmul.f32 %v1195_v37, %v6624_v56  ;;  %v1285_v55 = vmul.f32 %v1195_v37, %v6625_v27 }
 0x124   : > { %1340 = vmatpush.bf16.msra.mxu0 %v1306_v1  ;;  %v1176_v44 = vperm.slane %v1146_v9, 0  ;;  %v1192_v3 = vperm.slane %v1161_v26, 0  ;;  %v1177_v29 = vperm.slane %v1146_v9, 1  ;;  %v1193_v6 = vperm.slane %v1161_v26, 1 }
 0x125   : > { %v1322_v59 = vpack.c.bf16 %v1284_v4, %v1282_v30  ;;  %1366 = vmatpush.bf16.msra.mxu2 %v1307_v7  ;;  %v1323_v51 = vpack.c.bf16 %v1285_v55, %v1283_v18  ;;  %v1144_v12 = vrot.slane %v1143_v28, 2  ;;  %v1158_v15 = vsel %vm419_vm10, %v5057_v52, %v5070_v32 }
 0x126   : > { %v1246_v62 = vmul.f32 %v1176_v44, %v4401_v0  ;;  %v1248_v31 = vmul.f32 %v1176_v44, %v4403_v54  ;;  %v1278_v8 = vmul.f32 %v1192_v3, %v4401_v0  ;;  %v1280_v5 = vmul.f32 %v1192_v3, %v4403_v54 }
 0x127   : > { %1353 = vmatpush.bf16.msra.mxu1 %v1322_v59  ;;  %1379 = vmatpush.bf16.msra.mxu3 %v1323_v51  ;;  %v1247_v49 = vmul.f32 %v1177_v29, %v6624_v56  ;;  %v1249_v50 = vmul.f32 %v1177_v29, %v6625_v27  ;;  %v1279_v35 = vmul.f32 %v1193_v6, %v6624_v56  ;;  %v1174_v38 = vperm.slane %v1144_v12, 0 }
 0x128   : > { %v1304_v48 = vpack.c.bf16 %v1248_v31, %v1246_v62  ;;  %v1320_v60 = vpack.c.bf16 %v1280_v5, %v1278_v8  ;;  %v1281_v36 = vmul.f32 %v1193_v6, %v6625_v27  ;;  %v1159_v24 = vrot.slane %v1158_v15, 2 }
 0x129   : > { %v1305_v22 = vpack.c.bf16 %v1249_v50, %v1247_v49  ;;  %v1242_v16 = vmul.f32 %v1174_v38, %v4401_v0  ;;  %v1244_v63 = vmul.f32 %v1174_v38, %v4403_v54  ;;  %v1175_v25 = vperm.slane %v1144_v12, 1 }
 0x12a   : > { %1341 = vmatpush.bf16.msra.mxu0 %v1304_v48  ;;  %v1321_v33 = vpack.c.bf16 %v1281_v36, %v1279_v35  ;;  %v1190_v37 = vperm.slane %v1159_v24, 0  ;;  %v1191_v9 = vperm.slane %v1159_v24, 1  ;;  %v1141_v47 = vsel %vm416_vm11, %v5033_v20, %v5055_v58 }
 0x12b   : > { %1354 = vmatpush.bf16.msra.mxu1 %v1320_v60  ;;  %1367 = vmatpush.bf16.msra.mxu2 %v1305_v22  ;;  %v1302_v1 = vpack.c.bf16 %v1244_v63, %v1242_v16  ;;  %v1243_v7 = vmul.f32 %v1175_v25, %v6624_v56  ;;  %v1245_v26 = vmul.f32 %v1175_v25, %v6625_v27  ;;  %v1142_v28 = vrot.slane %v1141_v47, 1 }
 0x12c   : > { %1380 = vmatpush.bf16.msra.mxu3 %v1321_v33  ;;  %v1274_v4 = vmul.f32 %v1190_v37, %v4401_v0  ;;  %v1276_v18 = vmul.f32 %v1190_v37, %v4403_v54  ;;  %v1275_v55 = vmul.f32 %v1191_v9, %v6624_v56  ;;  %v1277_v44 = vmul.f32 %v1191_v9, %v6625_v27 }
 0x12d   : > { %v1303_v3 = vpack.c.bf16 %v1245_v26, %v1243_v7  ;;  %v1172_v29 = vperm.slane %v1142_v28, 0  ;;  %v1156_v6 = vsel %vm416_vm11, %v5057_v52, %v5070_v32  ;;  %v1173_v59 = vperm.slane %v1142_v28, 1 }
 0x12e   : > { %1342 = vmatpush.bf16.msra.mxu0 %v1302_v1  ;;  %v1318_v51 = vpack.c.bf16 %v1276_v18, %v1274_v4  ;;  %v1319_v12 = vpack.c.bf16 %v1277_v44, %v1275_v55  ;;  %v1157_v15 = vrot.slane %v1156_v6, 1  ;;  %v1140_v62 = vsel %vm414_vm12, %v5033_v20, %v5055_v58 }
 0x12f   : > { %1368 = vmatpush.bf16.msra.mxu2 %v1303_v3  ;;  %v1238_v31 = vmul.f32 %v1172_v29, %v4401_v0  ;;  %v1240_v8 = vmul.f32 %v1172_v29, %v4403_v54  ;;  %v1239_v5 = vmul.f32 %v1173_v59, %v6624_v56  ;;  %v1241_v49 = vmul.f32 %v1173_v59, %v6625_v27 }
 0x130   : > { %1355 = vmatpush.bf16.msra.mxu1 %v1318_v51  ;;  %1381 = vmatpush.bf16.msra.mxu3 %v1319_v12  ;;  %v1188_v50 = vperm.slane %v1157_v15, 0  ;;  %v1189_v35 = vperm.slane %v1157_v15, 1  ;;  %v1170_v38 = vperm.slane %v1140_v62, 0  ;;  %v1155_v48 = vsel %vm414_vm12, %v5057_v52, %v5070_v32  ;;  %v230_v12 = vld [vmem:[%s4840_s7 + $0x10] sm:$0xff] }
 0x131   : > { %v1300_v60 = vpack.c.bf16 %v1240_v8, %v1238_v31  ;;  %v1301_v20 = vpack.c.bf16 %v1241_v49, %v1239_v5  ;;  %v1186_v58 = vperm.slane %v1155_v48, 0  ;;  %v1171_v36 = vperm.slane %v1140_v62, 1 }
 0x132   : > { %v1270_v24 = vmul.f32 %v1188_v50, %v4401_v0  ;;  %v1272_v22 = vmul.f32 %v1188_v50, %v4403_v54  ;;  %v1271_v16 = vmul.f32 %v1189_v35, %v6624_v56  ;;  %v1273_v63 = vmul.f32 %v1189_v35, %v6625_v27 }
 0x133   : > { %1343 = vmatpush.bf16.msra.mxu0 %v1300_v60  ;;  %1369 = vmatpush.bf16.msra.mxu2 %v1301_v20  ;;  %v1234_v25 = vmul.f32 %v1170_v38, %v4401_v0  ;;  %v1236_v33 = vmul.f32 %v1170_v38, %v4403_v54  ;;  %v1266_v52 = vmul.f32 %v1186_v58, %v4401_v0  ;;  %v1187_v32 = vperm.slane %v1155_v48, 1 }
 0x134   : > { %v1316_v37 = vpack.c.bf16 %v1272_v22, %v1270_v24  ;;  %v1317_v9 = vpack.c.bf16 %v1273_v63, %v1271_v16  ;;  %v1268_v47 = vmul.f32 %v1186_v58, %v4403_v54  ;;  %v1235_v1 = vmul.f32 %v1171_v36, %v6624_v56 }
 0x135   : > { %v1298_v7 = vpack.c.bf16 %v1236_v33, %v1234_v25  ;;  %v1237_v26 = vmul.f32 %v1171_v36, %v6625_v27  ;;  %v1267_v28 = vmul.f32 %v1187_v32, %v6624_v56  ;;  %v1269_v4 = vmul.f32 %v1187_v32, %v6625_v27 }
 0x136   : > { %1356 = vmatpush.bf16.msra.mxu1 %v1316_v37  ;;  %1382 = vmatpush.bf16.msra.mxu3 %v1317_v9  ;;  %v1314_v0 = vpack.c.bf16 %v1268_v47, %v1266_v52  ;;  %v3713_v54 = vsel %vm5158_vm13, 1.0, %v6544_v43  ;;  %v1415_v56 = vperm.slane %v5060_v39, 3  ;;  %vm5208_vm1 = vcmp.eq.f32.partialorder %v4106_v57, %v2884_v41  ;;  %v6633_v47 = vld [vmem:[#allocation13_spill] sm:$0xff] }
 0x137   : > { %1344 = vmatpush.bf16.msra.mxu0 %v1298_v7  ;;  %v1299_v55 = vpack.c.bf16 %v1237_v26, %v1235_v1  ;;  %v1315_v44 = vpack.c.bf16 %v1269_v4, %v1267_v28  ;;  %v3714_v3 = vsel %vm1404_vm0, 1.0, %v6544_v43  ;;  %v1416_v29 = vperm.slane %v5063_v14, 3 }
 0x138   : > { %v1417_v6 = vmul.f32 %v3713_v54, %v1415_v56  ;;  %v5215_v30 = vadd.f32 1.0, %v4605_v53  ;;  %v5218_v59 = vadd.f32 1.0, %v4608_v19  ;;  %v1437_v51 = vperm.slane %v5044_v46, 3 }
 0x139   : > { %1370 = vmatpush.bf16.msra.mxu2 %v1299_v55  ;;  %v1418_v15 = vmul.f32 %v3714_v3, %v1416_v29  ;;  %v1438_v62 = vperm.slane %v5048_v40, 3  ;;  %vm1405_vm2 = vcmp.eq.f32.partialorder %v4113_v61, %v1401_v10  ;;  %vm1406_vm3 = vcmp.eq.f32.partialorder %v4113_v61, %v1402_v17 }
 0x13a   : > { %1357 = vmatpush.bf16.msra.mxu1 %v1314_v0  ;;  %1383 = vmatpush.bf16.msra.mxu3 %v1315_v44  ;;  %v1423_v31 = vperm.slane %v5215_v30, 3  ;;  %v1424_v8 = vperm.slane %v5218_v59, 3  ;;  %v3715_v5 = vsel %vm1405_vm2, 1.0, %v6544_v43  ;;  %v3716_v49 = vsel %vm1406_vm3, 1.0, %v6544_v43 }
 0x13b   : > { %v1419_v50 = vmul.f32 %v3715_v5, %v1415_v56  ;;  %v1420_v35 = vmul.f32 %v3716_v49, %v1416_v29  ;;  %v1331_v38 = vunpack.c.l.b16 %v230_v12  ;;  %v1332_v48 = vunpack.c.h.b16 %v230_v12 }
 0x13c   : > { %vm1425_vm4 = vcmp.eq.f32.partialorder %v4106_v57, %v1423_v31  ;;  %vm1426_vm5 = vcmp.eq.f32.partialorder %v4106_v57, %v1424_v8  ;;  %vm1427_vm13 = vcmp.eq.f32.partialorder %v4113_v61, %v1423_v31  ;;  %vm1428_vm0 = vcmp.eq.f32.partialorder %v4113_v61, %v1424_v8 }
 0x13d   : > { %v3717_v10 = vsel %vm1425_vm4, 1.0, %v6544_v43  ;;  %v3718_v17 = vsel %vm1426_vm5, 1.0, %v6544_v43  ;;  %v3719_v60 = vsel %vm1427_vm13, 1.0, %v6544_v43  ;;  %v3720_v20 = vsel %vm1428_vm0, 1.0, %v6544_v43 }
 0x13e   : > { %v1439_v58 = vmul.f32 %v3717_v10, %v1437_v51  ;;  %v1440_v36 = vmul.f32 %v3718_v17, %v1438_v62  ;;  %v1441_v24 = vmul.f32 %v3719_v60, %v1437_v51  ;;  %v1442_v22 = vmul.f32 %v3720_v20, %v1438_v62  ;;  %v6636_v20 = vld [vmem:[#allocation30_spill] sm:$0xff] }
 0x13f   : > { %vm2887_vm2 = vcmp.eq.f32.partialorder %v4113_v61, %v2883_v42  ;;  %v1333_v16 = vpack.c.b16 %v1331_v38, %v1331_v38  ;;  %v1334_v63 = vpack.c.b16 %v1332_v48, %v1332_v48  ;;  %v1749_v25 = vperm.slane %v4608_v19, 4 }
 0x140   : > { %v5245_v33 = vadd.f32 %v1439_v58, %v1417_v6  ;;  %v1444_v52 = vadd.f32 %v1440_v36, %v1418_v15  ;;  %v5247_v32 = vadd.f32 %v1441_v24, %v1419_v50  ;;  %v1446_v37 = vadd.f32 %v1442_v22, %v1420_v35  ;;  %v6637_v36 = vld [vmem:[#allocation31_spill] sm:$0xff] }
 0x141   : > { %v6632_v9 = vperm.slane %v4662_v45, 0  ;;  %v5262_v42 = vsel %vm5194_vm15, 1.0, %v6544_v43  ;;  %1345 = vmatmul.bf16.vlgmr.msra.gmra.mxu0 %v1333_v16  ;;  %1358 = vmatmul.bf16.vlgmr.msra.gmra.mxu1 %v1334_v63  ;;  %vm1751_vm3 = vcmp.eq.f32.partialorder %v4106_v57, %v1749_v25  ;;  %v5270_v28 = vsel %vm5208_vm1, 1.0, %v6544_v43 }
 0x142   : > { %v5273_v45 = vsel %vm2887_vm2, 1.0, %v6544_v43  ;;  %v5275_v4 = vrot.slane %v1444_v52, 7  ;;  %v5277_v0 = vrot.slane %v1446_v37, 7  ;;  %1371 = vmatmul.bf16.vlgmr.msra.gmra.mxu2 %v1333_v16  ;;  %1384 = vmatmul.bf16.vlgmr.msra.gmra.mxu3 %v1334_v63  ;;  %v1748_v18 = vperm.slane %v4605_v53, 4  ;;  %v6638_v63 = vld [vmem:[#allocation32_spill] sm:$0xff]  ;;  %v6639_v37 = vld [vmem:[#allocation33_spill] sm:$0xff] }
 0x143   : > { %v5252_v1 = vmul.f32 %v6633_v47, %v6632_v9  ;;  %v6634_v7 = vmov %v6632_v9  ;;  %v5281_v54 = vsel %vm1751_vm3, 1.0, %v6544_v43  ;;  %v1762_v56 = vperm.slane %v5060_v39, 4 }
 0x144   : > { %v5257_v26 = vmul.f32 %v6635_v2, %v6634_v7  ;;  %v1763_v27 = vperm.slane %v5063_v14, 4  ;;  %v1510_v55 = vsel %vm434_vm14, %v5275_v4, %v5245_v33  ;;  %v1525_v44 = vsel %vm434_vm14, %v5277_v0, %v5247_v32 }
 0x145   : > { %v1508_v3 = vsel %vm431_vm6, %v5245_v33, %v5275_v4  ;;  %v1523_v29 = vsel %vm431_vm6, %v5247_v32, %v5277_v0  ;;  %v1511_v6 = vrot.slane %v1510_v55, 7  ;;  %v1526_v51 = vrot.slane %v1525_v44, 7 }
 0x146   : > { %v1509_v12 = vrot.slane %v1508_v3, 6  ;;  %v1524_v15 = vrot.slane %v1523_v29, 6  ;;  %v1506_v62 = vsel %vm428_vm7, %v5245_v33, %v5275_v4  ;;  %v1521_v31 = vsel %vm428_vm7, %v5247_v32, %v5277_v0 }
 0x147   : > { %v5306_v8 = vsel %vm425_vm8, %v5245_v33, %v5275_v4  ;;  %v5311_v5 = vsel %vm425_vm8, %v5247_v32, %v5277_v0  ;;  %v1541_v49 = vperm.slane %v1511_v6, 0  ;;  %v1557_v50 = vperm.slane %v1526_v51, 0 }
 0x148   : > { %v1542_v35 = vperm.slane %v1511_v6, 1  ;;  %v1558_v38 = vperm.slane %v1526_v51, 1  ;;  %v1539_v48 = vperm.slane %v1509_v12, 0  ;;  %v1555_v10 = vperm.slane %v1524_v15, 0 }
 0x149   : > { %v1540_v17 = vperm.slane %v1509_v12, 1  ;;  %v1556_v60 = vperm.slane %v1524_v15, 1  ;;  %v1619_v58 = vmul.f32 %v1541_v49, %v6636_v20  ;;  %v1621_v24 = vmul.f32 %v1541_v49, %v6637_v36 }
 0x14a   : > { %v1651_v22 = vmul.f32 %v1557_v50, %v6636_v20  ;;  %v1653_v16 = vmul.f32 %v1557_v50, %v6637_v36  ;;  %v1620_v52 = vmul.f32 %v1542_v35, %v6638_v63  ;;  %v1622_v9 = vmul.f32 %v1542_v35, %v6639_v37 }
 0x14b   : > { %v1652_v47 = vmul.f32 %v1558_v38, %v6638_v63  ;;  %v1654_v7 = vmul.f32 %v1558_v38, %v6639_v37  ;;  %v1669_v2 = vpack.c.bf16 %v1621_v24, %v1619_v58  ;;  %v1615_v44 = vmul.f32 %v1539_v48, %v6636_v20 }
 0x14c   : > { %v1685_v55 = vpack.c.bf16 %v1653_v16, %v1651_v22  ;;  %v1617_v3 = vmul.f32 %v1539_v48, %v6637_v36  ;;  %vm5326_vm15 = vcmp.eq.f32.partialorder %v4106_v57, %v1748_v18  ;;  %v1670_v6 = vpack.c.bf16 %v1622_v9, %v1620_v52 }
 0x14d   : > { %v1686_v51 = vpack.c.bf16 %v1654_v7, %v1652_v47  ;;  %v1647_v12 = vmul.f32 %v1555_v10, %v6636_v20  ;;  %v1649_v15 = vmul.f32 %v1555_v10, %v6637_v36  ;;  %1694 = vmatpush.bf16.msrb.mxu0 %v1669_v2  ;;  %v1616_v50 = vmul.f32 %v1540_v17, %v6638_v63 }
 0x14e   : > { %1707 = vmatpush.bf16.msrb.mxu1 %v1685_v55  ;;  %v1667_v49 = vpack.c.bf16 %v1617_v3, %v1615_v44  ;;  %v1618_v35 = vmul.f32 %v1540_v17, %v6639_v37  ;;  %v1507_v38 = vrot.slane %v1506_v62, 5  ;;  %1720 = vmatpush.bf16.msrb.mxu2 %v1670_v6  ;;  %v1648_v58 = vmul.f32 %v1556_v60, %v6638_v63 }
 0x14f   : > { %1733 = vmatpush.bf16.msrb.mxu3 %v1686_v51  ;;  %v1683_v48 = vpack.c.bf16 %v1649_v15, %v1647_v12  ;;  %v1650_v24 = vmul.f32 %v1556_v60, %v6639_v37  ;;  %v1522_v22 = vrot.slane %v1521_v31, 5  ;;  %v1505_v10 = vrot.slane %v5306_v8, 4 }
 0x150   : > { %v1668_v16 = vpack.c.bf16 %v1618_v35, %v1616_v50  ;;  %v1537_v52 = vperm.slane %v1507_v38, 0  ;;  %v1538_v9 = vperm.slane %v1507_v38, 1  ;;  %v1520_v55 = vrot.slane %v5311_v5, 4 }
 0x151   : > { %v1684_v47 = vpack.c.bf16 %v1650_v24, %v1648_v58  ;;  %v1553_v7 = vperm.slane %v1522_v22, 0  ;;  %v1554_v2 = vperm.slane %v1522_v22, 1  ;;  %1695 = vmatpush.bf16.msrb.mxu0 %v1667_v49  ;;  %v1535_v60 = vperm.slane %v1505_v10, 0 }
 0x152   : > { %1708 = vmatpush.bf16.msrb.mxu1 %v1683_v48  ;;  %v1611_v62 = vmul.f32 %v1537_v52, %v6636_v20  ;;  %v1613_v17 = vmul.f32 %v1537_v52, %v6637_v36  ;;  %v1612_v44 = vmul.f32 %v1538_v9, %v6638_v63  ;;  %1721 = vmatpush.bf16.msrb.mxu2 %v1668_v16  ;;  %v1551_v6 = vperm.slane %v1520_v55, 0 }
 0x153   : > { %1734 = vmatpush.bf16.msrb.mxu3 %v1684_v47  ;;  %v1643_v31 = vmul.f32 %v1553_v7, %v6636_v20  ;;  %v1645_v8 = vmul.f32 %v1553_v7, %v6637_v36  ;;  %v1614_v3 = vmul.f32 %v1538_v9, %v6639_v37  ;;  %v1644_v5 = vmul.f32 %v1554_v2, %v6638_v63 }
 0x154   : > { %v1665_v51 = vpack.c.bf16 %v1613_v17, %v1611_v62  ;;  %v1646_v12 = vmul.f32 %v1554_v2, %v6639_v37  ;;  %v1607_v15 = vmul.f32 %v1535_v60, %v6636_v20  ;;  %v1609_v35 = vmul.f32 %v1535_v60, %v6637_v36 }
 0x155   : > { %v1681_v49 = vpack.c.bf16 %v1645_v8, %v1643_v31  ;;  %v1666_v50 = vpack.c.bf16 %v1614_v3, %v1612_v44  ;;  %v1639_v38 = vmul.f32 %v1551_v6, %v6636_v20  ;;  %v1641_v58 = vmul.f32 %v1551_v6, %v6637_v36 }
 0x156   : > { %1696 = vmatpush.bf16.msrb.mxu0 %v1665_v51  ;;  %v1682_v48 = vpack.c.bf16 %v1646_v12, %v1644_v5  ;;  %v1536_v24 = vperm.slane %v1505_v10, 1  ;;  %v1552_v22 = vperm.slane %v1520_v55, 1  ;;  %v1663_v16 = vpack.c.bf16 %v1609_v35, %v1607_v15 }
 0x157   : > { %1709 = vmatpush.bf16.msrb.mxu1 %v1681_v49  ;;  %1722 = vmatpush.bf16.msrb.mxu2 %v1666_v50  ;;  %v1502_v52 = vsel %vm422_vm9, %v5245_v33, %v5275_v4  ;;  %v1517_v9 = vsel %vm422_vm9, %v5247_v32, %v5277_v0  ;;  %v5359_v47 = vsel %vm5326_vm15, 1.0, %v6544_v43  ;;  %v1679_v7 = vpack.c.bf16 %v1641_v58, %v1639_v38 }
 0x158   : > { %1735 = vmatpush.bf16.msrb.mxu3 %v1682_v48  ;;  %v1608_v10 = vmul.f32 %v1536_v24, %v6638_v63  ;;  %v1610_v2 = vmul.f32 %v1536_v24, %v6639_v37  ;;  %v1640_v55 = vmul.f32 %v1552_v22, %v6638_v63  ;;  %v1642_v62 = vmul.f32 %v1552_v22, %v6639_v37 }
 0x159   : > { %v1503_v17 = vrot.slane %v1502_v52, 3  ;;  %v1518_v44 = vrot.slane %v1517_v9, 3  ;;  %v1500_v60 = vsel %vm419_vm10, %v5245_v33, %v5275_v4  ;;  %v1515_v8 = vsel %vm419_vm10, %v5247_v32, %v5277_v0 }
 0x15a   : > { %1697 = vmatpush.bf16.msrb.mxu0 %v1663_v16  ;;  %v1664_v29 = vpack.c.bf16 %v1610_v2, %v1608_v10  ;;  %v1501_v31 = vrot.slane %v1500_v60, 2  ;;  %v1498_v3 = vsel %vm416_vm11, %v5245_v33, %v5275_v4  ;;  %v1680_v6 = vpack.c.bf16 %v1642_v62, %v1640_v55 }
 0x15b   : > { %1710 = vmatpush.bf16.msrb.mxu1 %v1679_v7  ;;  %v1533_v51 = vperm.slane %v1503_v17, 0  ;;  %v1549_v5 = vperm.slane %v1518_v44, 0  ;;  %v1534_v12 = vperm.slane %v1503_v17, 1  ;;  %v1550_v15 = vperm.slane %v1518_v44, 1 }
 0x15c   : > { %1723 = vmatpush.bf16.msrb.mxu2 %v1664_v29  ;;  %v1531_v49 = vperm.slane %v1501_v31, 0  ;;  %v1516_v50 = vrot.slane %v1515_v8, 2  ;;  %v1532_v35 = vperm.slane %v1501_v31, 1  ;;  %1736 = vmatpush.bf16.msrb.mxu3 %v1680_v6  ;;  %v1499_v6 = vrot.slane %v1498_v3, 1 }
 0x15d   : > { %v1603_v38 = vmul.f32 %v1533_v51, %v6636_v20  ;;  %v1605_v48 = vmul.f32 %v1533_v51, %v6637_v36  ;;  %v1635_v58 = vmul.f32 %v1549_v5, %v6636_v20  ;;  %v1637_v24 = vmul.f32 %v1549_v5, %v6637_v36 }
 0x15e   : > { %v1604_v22 = vmul.f32 %v1534_v12, %v6638_v63  ;;  %v1606_v16 = vmul.f32 %v1534_v12, %v6639_v37  ;;  %v1636_v52 = vmul.f32 %v1550_v15, %v6638_v63  ;;  %v1638_v9 = vmul.f32 %v1550_v15, %v6639_v37 }
 0x15f   : > { %v1661_v7 = vpack.c.bf16 %v1605_v48, %v1603_v38  ;;  %v1677_v10 = vpack.c.bf16 %v1637_v24, %v1635_v58  ;;  %v1599_v2 = vmul.f32 %v1531_v49, %v6636_v20  ;;  %v1601_v55 = vmul.f32 %v1531_v49, %v6637_v36 }
 0x160   : > { %v1662_v62 = vpack.c.bf16 %v1606_v16, %v1604_v22  ;;  %v1678_v17 = vpack.c.bf16 %v1638_v9, %v1636_v52  ;;  %v1547_v44 = vperm.slane %v1516_v50, 0  ;;  %v1600_v60 = vmul.f32 %v1532_v35, %v6638_v63 }
 0x161   : > { %1698 = vmatpush.bf16.msrb.mxu0 %v1661_v7  ;;  %1711 = vmatpush.bf16.msrb.mxu1 %v1677_v10  ;;  %v1659_v29 = vpack.c.bf16 %v1601_v55, %v1599_v2  ;;  %v1602_v31 = vmul.f32 %v1532_v35, %v6639_v37  ;;  %v1548_v8 = vperm.slane %v1516_v50, 1  ;;  %v1513_v12 = vsel %vm416_vm11, %v5247_v32, %v5277_v0 }
 0x162   : > { %1724 = vmatpush.bf16.msrb.mxu2 %v1662_v62  ;;  %1737 = vmatpush.bf16.msrb.mxu3 %v1678_v17  ;;  %v1631_v51 = vmul.f32 %v1547_v44, %v6636_v20  ;;  %v1633_v5 = vmul.f32 %v1547_v44, %v6637_v36  ;;  %v1768_v15 = vperm.slane %v5215_v30, 4  ;;  %v1529_v35 = vperm.slane %v1499_v6, 0 }
 0x163   : > { %v1660_v49 = vpack.c.bf16 %v1602_v31, %v1600_v60  ;;  %v1632_v38 = vmul.f32 %v1548_v8, %v6638_v63  ;;  %v1634_v48 = vmul.f32 %v1548_v8, %v6639_v37  ;;  %v1514_v3 = vrot.slane %v1513_v12, 1 }
 0x164   : > { %v1675_v50 = vpack.c.bf16 %v1633_v5, %v1631_v51  ;;  %v1530_v58 = vperm.slane %v1499_v6, 1  ;;  %v1497_v24 = vsel %vm414_vm12, %v5245_v33, %v5275_v4  ;;  %v1595_v16 = vmul.f32 %v1529_v35, %v6636_v20 }
 0x165   : > { %1699 = vmatpush.bf16.msrb.mxu0 %v1659_v29  ;;  %v1676_v22 = vpack.c.bf16 %v1634_v48, %v1632_v38  ;;  %v1597_v52 = vmul.f32 %v1529_v35, %v6637_v36  ;;  %v1527_v9 = vperm.slane %v1497_v24, 0  ;;  %v1545_v7 = vperm.slane %v1514_v3, 0 }
 0x166   : > { %1712 = vmatpush.bf16.msrb.mxu1 %v1675_v50  ;;  %1725 = vmatpush.bf16.msrb.mxu2 %v1660_v49  ;;  %v1596_v10 = vmul.f32 %v1530_v58, %v6638_v63  ;;  %v1598_v2 = vmul.f32 %v1530_v58, %v6639_v37  ;;  %v1546_v55 = vperm.slane %v1514_v3, 1  ;;  %v1512_v4 = vsel %vm414_vm12, %v5247_v32, %v5277_v0 }
 0x167   : > { %1738 = vmatpush.bf16.msrb.mxu3 %v1676_v22  ;;  %v1657_v62 = vpack.c.bf16 %v1597_v52, %v1595_v16  ;;  %v1591_v17 = vmul.f32 %v1527_v9, %v6636_v20  ;;  %v1593_v33 = vmul.f32 %v1527_v9, %v6637_v36  ;;  %vm5409_vm1 = vcmp.eq.f32.partialorder %v4113_v61, %v2884_v41  ;;  %v231_v52 = vld [vmem:[%s4840_s7 + $0x18] sm:$0xff] }
 0x168   : > { %v1627_v60 = vmul.f32 %v1545_v7, %v6636_v20  ;;  %v1629_v29 = vmul.f32 %v1545_v7, %v6637_v36  ;;  %v1658_v31 = vpack.c.bf16 %v1598_v2, %v1596_v10  ;;  %v1628_v8 = vmul.f32 %v1546_v55, %v6638_v63 }
 0x169   : > { %1700 = vmatpush.bf16.msrb.mxu0 %v1657_v62  ;;  %v1630_v6 = vmul.f32 %v1546_v55, %v6639_v37  ;;  %v1655_v51 = vpack.c.bf16 %v1593_v33, %v1591_v17  ;;  %v1543_v5 = vperm.slane %v1512_v4, 0  ;;  %v1528_v32 = vperm.slane %v1497_v24, 1 }
 0x16a   : > { %v1673_v0 = vpack.c.bf16 %v1629_v29, %v1627_v60  ;;  %1726 = vmatpush.bf16.msrb.mxu2 %v1658_v31  ;;  %v1544_v21 = vperm.slane %v1512_v4, 1  ;;  %v1764_v41 = vmul.f32 %v5359_v47, %v1762_v56  ;;  %v1765_v12 = vmul.f32 %v5281_v54, %v1763_v27 }
 0x16b   : > { %v1674_v49 = vpack.c.bf16 %v1630_v6, %v1628_v8  ;;  %v1623_v38 = vmul.f32 %v1543_v5, %v6636_v20  ;;  %v1625_v48 = vmul.f32 %v1543_v5, %v6637_v36  ;;  %v1592_v35 = vmul.f32 %v1528_v32, %v6638_v63 }
 0x16c   : > { %1713 = vmatpush.bf16.msrb.mxu1 %v1673_v0  ;;  %v1594_v50 = vmul.f32 %v1528_v32, %v6639_v37  ;;  %v1624_v3 = vmul.f32 %v1544_v21, %v6638_v63  ;;  %v1626_v58 = vmul.f32 %v1544_v21, %v6639_v37  ;;  %v1769_v47 = vperm.slane %v5218_v59, 4 }
 0x16d   : > { %1739 = vmatpush.bf16.msrb.mxu3 %v1674_v49  ;;  %1701 = vmatpush.bf16.msrb.mxu0 %v1655_v51  ;;  %v1671_v54 = vpack.c.bf16 %v1625_v48, %v1623_v38  ;;  %vm1770_vm4 = vcmp.eq.f32.partialorder %v4106_v57, %v1768_v15  ;;  %v1782_v20 = vperm.slane %v5044_v46, 4  ;;  %v1783_v36 = vperm.slane %v5048_v40, 4 }
 0x16e   : > { %v1656_v24 = vpack.c.bf16 %v1594_v50, %v1592_v35  ;;  %v1672_v22 = vpack.c.bf16 %v1626_v58, %v1624_v3  ;;  %vm1771_vm5 = vcmp.eq.f32.partialorder %v4106_v57, %v1769_v47  ;;  %v3733_v63 = vsel %vm1770_vm4, 1.0, %v6544_v43 }
 0x16f   : > { %v3734_v37 = vsel %vm1771_vm5, 1.0, %v6544_v43  ;;  %v1784_v16 = vmul.f32 %v3733_v63, %v1782_v20  ;;  %vm1752_vm13 = vcmp.eq.f32.partialorder %v4113_v61, %v1748_v18  ;;  %vm1753_vm0 = vcmp.eq.f32.partialorder %v4113_v61, %v1749_v25 }
 0x170   : > { %1714 = vmatpush.bf16.msrb.mxu1 %v1671_v54  ;;  %1727 = vmatpush.bf16.msrb.mxu2 %v1656_v24  ;;  %v1785_v9 = vmul.f32 %v3734_v37, %v1783_v36  ;;  %v3731_v7 = vsel %vm1752_vm13, 1.0, %v6544_v43  ;;  %v3732_v10 = vsel %vm1753_vm0, 1.0, %v6544_v43  ;;  %vm1772_vm2 = vcmp.eq.f32.partialorder %v4113_v61, %v1768_v15 }
 0x171   : > { %1740 = vmatpush.bf16.msrb.mxu3 %v1672_v22  ;;  %v5450_v2 = vadd.f32 %v1784_v16, %v1764_v41  ;;  %v1766_v18 = vmul.f32 %v3731_v7, %v1762_v56  ;;  %v1767_v25 = vmul.f32 %v3732_v10, %v1763_v27  ;;  %vm1773_vm3 = vcmp.eq.f32.partialorder %v4113_v61, %v1769_v47  ;;  %v6646_v16 = vld [vmem:[#allocation34_spill] sm:$0xff]  ;;  %v6648_v10 = vld [vmem:[#allocation36_spill] sm:$0xff] }
 0x172   : > { %v1789_v55 = vadd.f32 %v1785_v9, %v1765_v12  ;;  %v3735_v62 = vsel %vm1772_vm2, 1.0, %v6544_v43  ;;  %v3736_v17 = vsel %vm1773_vm3, 1.0, %v6544_v43  ;;  %v1688_v33 = vunpack.c.l.b16 %v231_v52  ;;  %v6647_v9 = vld [vmem:[#allocation35_spill] sm:$0xff] }
 0x173   : > { %v5462_v15 = vsel %vm5409_vm1, 1.0, %v6544_v43  ;;  %v1786_v4 = vmul.f32 %v3735_v62, %v1782_v20  ;;  %v1787_v60 = vmul.f32 %v3736_v17, %v1783_v36  ;;  %v1689_v29 = vunpack.c.h.b16 %v231_v52 }
 0x174   : > { %v6644_v56 = vperm.slane %v4645_v11, 0  ;;  %v6645_v31 = vperm.slane %v4659_v13, 0  ;;  %v5474_v6 = vrot.slane %v1789_v55, 7  ;;  %v1690_v51 = vpack.c.b16 %v1688_v33, %v1688_v33 }
 0x175   : > { %v5476_v5 = vadd.f32 %v1786_v4, %v1766_v18  ;;  %v1791_v44 = vadd.f32 %v1787_v60, %v1767_v25  ;;  %v1691_v32 = vpack.c.b16 %v1689_v29, %v1689_v29  ;;  %v2093_v0 = vperm.slane %v4605_v53, 5  ;;  %v6649_v25 = vld [vmem:[#allocation37_spill] sm:$0xff] }
 0x176   : > { %v5467_v27 = vmul.f32 %v5262_v42, %v6644_v56  ;;  %v5472_v8 = vmul.f32 %v5270_v28, %v6645_v31  ;;  %v1855_v21 = vsel %vm434_vm14, %v5474_v6, %v5450_v2  ;;  %1702 = vmatmul.bf16.vlgmr.msrb.gmra.mxu0 %v1690_v51  ;;  %1728 = vmatmul.bf16.vlgmr.msrb.gmra.mxu2 %v1690_v51  ;;  %v2094_v41 = vperm.slane %v4608_v19, 5 }
 0x177   : > { %v1853_v42 = vsel %vm431_vm6, %v5450_v2, %v5474_v6  ;;  %v1851_v28 = vsel %vm428_vm7, %v5450_v2, %v5474_v6  ;;  %v1856_v12 = vrot.slane %v1855_v21, 7  ;;  %v5489_v49 = vrot.slane %v1791_v44, 7  ;;  %1715 = vmatmul.bf16.vlgmr.msrb.gmra.mxu1 %v1691_v32  ;;  %1741 = vmatmul.bf16.vlgmr.msrb.gmra.mxu3 %v1691_v32 }
 0x178   : > { %v1854_v38 = vrot.slane %v1853_v42, 6  ;;  %v1852_v48 = vrot.slane %v1851_v28, 5  ;;  %v1849_v35 = vsel %vm425_vm8, %v5450_v2, %v5474_v6  ;;  %v5497_v50 = vsel %vm422_vm9, %v5450_v2, %v5474_v6 }
 0x179   : > { %v5502_v3 = vsel %vm419_vm10, %v5450_v2, %v5474_v6  ;;  %v5507_v58 = vsel %vm416_vm11, %v5450_v2, %v5474_v6  ;;  %v1886_v47 = vperm.slane %v1856_v12, 0  ;;  %v1870_v54 = vsel %vm434_vm14, %v5489_v49, %v5476_v5 }
 0x17a   : > { %v1887_v20 = vperm.slane %v1856_v12, 1  ;;  %v1884_v36 = vperm.slane %v1854_v38, 0  ;;  %v1871_v24 = vrot.slane %v1870_v54, 7  ;;  %v1868_v22 = vsel %vm431_vm6, %v5476_v5, %v5489_v49 }
 0x17b   : > { %v1885_v63 = vperm.slane %v1854_v38, 1  ;;  %v1882_v37 = vperm.slane %v1852_v48, 0  ;;  %v1964_v52 = vmul.f32 %v1886_v47, %v6646_v16  ;;  %v1966_v7 = vmul.f32 %v1886_v47, %v6647_v9 }
 0x17c   : > { %v1965_v18 = vmul.f32 %v1887_v20, %v6648_v10  ;;  %v1967_v55 = vmul.f32 %v1887_v20, %v6649_v25  ;;  %v1902_v62 = vperm.slane %v1871_v24, 0  ;;  %v1903_v17 = vperm.slane %v1871_v24, 1 }
 0x17d   : > { %v1960_v33 = vmul.f32 %v1884_v36, %v6646_v16  ;;  %v1962_v4 = vmul.f32 %v1884_v36, %v6647_v9  ;;  %v2014_v60 = vpack.c.bf16 %v1966_v7, %v1964_v52  ;;  %v1869_v56 = vrot.slane %v1868_v22, 6 }
 0x17e   : > { %v2015_v29 = vpack.c.bf16 %v1967_v55, %v1965_v18  ;;  %v1961_v31 = vmul.f32 %v1885_v63, %v6648_v10  ;;  %v1996_v51 = vmul.f32 %v1902_v62, %v6646_v16  ;;  %v1998_v44 = vmul.f32 %v1902_v62, %v6647_v9 }
 0x17f   : > { %v1997_v32 = vmul.f32 %v1903_v17, %v6648_v10  ;;  %v1999_v21 = vmul.f32 %v1903_v17, %v6649_v25  ;;  %2039 = vmatpush.bf16.msra.mxu0 %v2014_v60  ;;  %v2012_v42 = vpack.c.bf16 %v1962_v4, %v1960_v33  ;;  %v1900_v28 = vperm.slane %v1869_v56, 0 }
 0x180   : > { %2065 = vmatpush.bf16.msra.mxu2 %v2015_v29  ;;  %v1963_v12 = vmul.f32 %v1885_v63, %v6649_v25  ;;  %v1901_v38 = vperm.slane %v1869_v56, 1  ;;  %v2030_v47 = vpack.c.bf16 %v1998_v44, %v1996_v51  ;;  %v1956_v20 = vmul.f32 %v1882_v37, %v6646_v16 }
 0x181   : > { %v2031_v54 = vpack.c.bf16 %v1999_v21, %v1997_v32  ;;  %v1958_v36 = vmul.f32 %v1882_v37, %v6647_v9  ;;  %v1992_v24 = vmul.f32 %v1900_v28, %v6646_v16  ;;  %v1994_v22 = vmul.f32 %v1900_v28, %v6647_v9 }
 0x182   : > { %v2013_v52 = vpack.c.bf16 %v1963_v12, %v1961_v31  ;;  %v1993_v7 = vmul.f32 %v1901_v38, %v6648_v10  ;;  %2052 = vmatpush.bf16.msra.mxu1 %v2030_v47  ;;  %v1995_v18 = vmul.f32 %v1901_v38, %v6649_v25  ;;  %v1866_v63 = vsel %vm428_vm7, %v5476_v5, %v5489_v49 }
 0x183   : > { %2078 = vmatpush.bf16.msra.mxu3 %v2031_v54  ;;  %v2010_v55 = vpack.c.bf16 %v1958_v36, %v1956_v20  ;;  %v1883_v62 = vperm.slane %v1852_v48, 1  ;;  %2040 = vmatpush.bf16.msra.mxu0 %v2012_v42  ;;  %v2028_v17 = vpack.c.bf16 %v1994_v22, %v1992_v24  ;;  %v1867_v37 = vrot.slane %v1866_v63, 5 }
 0x184   : > { %2066 = vmatpush.bf16.msra.mxu2 %v2013_v52  ;;  %v1850_v33 = vrot.slane %v1849_v35, 4  ;;  %v1864_v4 = vsel %vm425_vm8, %v5476_v5, %v5489_v49  ;;  %v2029_v60 = vpack.c.bf16 %v1995_v18, %v1993_v7  ;;  %v1848_v35 = vrot.slane %v5497_v50, 3 }
 0x185   : > { %v1957_v29 = vmul.f32 %v1883_v62, %v6648_v10  ;;  %v1959_v56 = vmul.f32 %v1883_v62, %v6649_v25  ;;  %v1865_v31 = vrot.slane %v1864_v4, 4  ;;  %v1898_v51 = vperm.slane %v1867_v37, 0 }
 0x186   : > { %v1899_v44 = vperm.slane %v1867_v37, 1  ;;  %v1880_v32 = vperm.slane %v1850_v33, 0  ;;  %v1881_v21 = vperm.slane %v1850_v33, 1  ;;  %2053 = vmatpush.bf16.msra.mxu1 %v2028_v17  ;;  %v1878_v33 = vperm.slane %v1848_v35, 0 }
 0x187   : > { %2079 = vmatpush.bf16.msra.mxu3 %v2029_v60  ;;  %v2011_v48 = vpack.c.bf16 %v1959_v56, %v1957_v29  ;;  %v1896_v42 = vperm.slane %v1865_v31, 0  ;;  %v1897_v28 = vperm.slane %v1865_v31, 1  ;;  %2041 = vmatpush.bf16.msra.mxu0 %v2010_v55  ;;  %v1988_v12 = vmul.f32 %v1898_v51, %v6646_v16 }
 0x188   : > { %v1990_v38 = vmul.f32 %v1898_v51, %v6647_v9  ;;  %v1989_v47 = vmul.f32 %v1899_v44, %v6648_v10  ;;  %v1991_v54 = vmul.f32 %v1899_v44, %v6649_v25  ;;  %v1952_v20 = vmul.f32 %v1880_v32, %v6646_v16 }
 0x189   : > { %2067 = vmatpush.bf16.msra.mxu2 %v2011_v48  ;;  %v1954_v36 = vmul.f32 %v1880_v32, %v6647_v9  ;;  %v1984_v24 = vmul.f32 %v1896_v42, %v6646_v16  ;;  %v1986_v22 = vmul.f32 %v1896_v42, %v6647_v9  ;;  %v1953_v7 = vmul.f32 %v1881_v21, %v6648_v10 }
 0x18a   : > { %v2026_v52 = vpack.c.bf16 %v1990_v38, %v1988_v12  ;;  %v2027_v50 = vpack.c.bf16 %v1991_v54, %v1989_v47  ;;  %v1955_v18 = vmul.f32 %v1881_v21, %v6649_v25  ;;  %v1985_v62 = vmul.f32 %v1897_v28, %v6648_v10 }
 0x18b   : > { %v2008_v55 = vpack.c.bf16 %v1954_v36, %v1952_v20  ;;  %v2024_v63 = vpack.c.bf16 %v1986_v22, %v1984_v24  ;;  %v1987_v17 = vmul.f32 %v1897_v28, %v6649_v25  ;;  %v1862_v4 = vsel %vm422_vm9, %v5476_v5, %v5489_v49 }
 0x18c   : > { %2054 = vmatpush.bf16.msra.mxu1 %v2026_v52  ;;  %2080 = vmatpush.bf16.msra.mxu3 %v2027_v50  ;;  %v2009_v37 = vpack.c.bf16 %v1955_v18, %v1953_v7  ;;  %v1879_v60 = vperm.slane %v1848_v35, 1  ;;  %v1863_v56 = vrot.slane %v1862_v4, 3  ;;  %v1846_v31 = vrot.slane %v5502_v3, 2 }
 0x18d   : > { %2042 = vmatpush.bf16.msra.mxu0 %v2008_v55  ;;  %v2025_v29 = vpack.c.bf16 %v1987_v17, %v1985_v62  ;;  %v1860_v51 = vsel %vm419_vm10, %v5476_v5, %v5489_v49  ;;  %v1948_v44 = vmul.f32 %v1878_v33, %v6646_v16  ;;  %v1950_v32 = vmul.f32 %v1878_v33, %v6647_v9 }
 0x18e   : > { %2068 = vmatpush.bf16.msra.mxu2 %v2009_v37  ;;  %v1949_v21 = vmul.f32 %v1879_v60, %v6648_v10  ;;  %v1951_v48 = vmul.f32 %v1879_v60, %v6649_v25  ;;  %v1894_v42 = vperm.slane %v1863_v56, 0  ;;  %v1895_v28 = vperm.slane %v1863_v56, 1 }
 0x18f   : > { %v1876_v35 = vperm.slane %v1846_v31, 0  ;;  %v1861_v12 = vrot.slane %v1860_v51, 2  ;;  %vm5568_vm15 = vcmp.eq.f32.partialorder %v4106_v57, %v2093_v0  ;;  %v2006_v38 = vpack.c.bf16 %v1950_v32, %v1948_v44 }
 0x190   : > { %2055 = vmatpush.bf16.msra.mxu1 %v2024_v63  ;;  %2081 = vmatpush.bf16.msra.mxu3 %v2025_v29  ;;  %v2007_v47 = vpack.c.bf16 %v1951_v48, %v1949_v21  ;;  %v1877_v54 = vperm.slane %v1846_v31, 1  ;;  %v1844_v20 = vrot.slane %v5507_v58, 1  ;;  %v1980_v36 = vmul.f32 %v1894_v42, %v6646_v16 }
 0x191   : > { %v1982_v24 = vmul.f32 %v1894_v42, %v6647_v9  ;;  %v1981_v22 = vmul.f32 %v1895_v28, %v6648_v10  ;;  %v1983_v52 = vmul.f32 %v1895_v28, %v6649_v25  ;;  %2043 = vmatpush.bf16.msra.mxu0 %v2006_v38  ;;  %v1944_v50 = vmul.f32 %v1876_v35, %v6646_v16 }
 0x192   : > { %2069 = vmatpush.bf16.msra.mxu2 %v2007_v47  ;;  %v1946_v7 = vmul.f32 %v1876_v35, %v6647_v9  ;;  %v1892_v18 = vperm.slane %v1861_v12, 0  ;;  %v1945_v55 = vmul.f32 %v1877_v54, %v6648_v10  ;;  %v1947_v58 = vmul.f32 %v1877_v54, %v6649_v25 }
 0x193   : > { %v2022_v63 = vpack.c.bf16 %v1982_v24, %v1980_v36  ;;  %v2023_v62 = vpack.c.bf16 %v1983_v52, %v1981_v22  ;;  %v1893_v17 = vperm.slane %v1861_v12, 1  ;;  %v1874_v60 = vperm.slane %v1844_v20, 0 }
 0x194   : > { %v2004_v37 = vpack.c.bf16 %v1946_v7, %v1944_v50  ;;  %v1976_v33 = vmul.f32 %v1892_v18, %v6646_v16  ;;  %v1978_v4 = vmul.f32 %v1892_v18, %v6647_v9  ;;  %v2005_v29 = vpack.c.bf16 %v1947_v58, %v1945_v55 }
 0x195   : > { %2056 = vmatpush.bf16.msra.mxu1 %v2022_v63  ;;  %2082 = vmatpush.bf16.msra.mxu3 %v2023_v62  ;;  %v1977_v56 = vmul.f32 %v1893_v17, %v6648_v10  ;;  %v1979_v31 = vmul.f32 %v1893_v17, %v6649_v25  ;;  %v1875_v51 = vperm.slane %v1844_v20, 1  ;;  %v1940_v32 = vmul.f32 %v1874_v60, %v6646_v16 }
 0x196   : > { %2044 = vmatpush.bf16.msra.mxu0 %v2004_v37  ;;  %v2020_v44 = vpack.c.bf16 %v1978_v4, %v1976_v33  ;;  %v1942_v21 = vmul.f32 %v1874_v60, %v6647_v9  ;;  %v1858_v48 = vsel %vm416_vm11, %v5476_v5, %v5489_v49  ;;  %2070 = vmatpush.bf16.msra.mxu2 %v2005_v29 }
 0x197   : > { %v2021_v42 = vpack.c.bf16 %v1979_v31, %v1977_v56  ;;  %v1859_v28 = vrot.slane %v1858_v48, 1  ;;  %v1941_v35 = vmul.f32 %v1875_v51, %v6648_v10  ;;  %v1943_v12 = vmul.f32 %v1875_v51, %v6649_v25 }
 0x198   : > { %v2002_v38 = vpack.c.bf16 %v1942_v21, %v1940_v32  ;;  %v1842_v47 = vsel %vm414_vm12, %v5450_v2, %v5474_v6  ;;  %v1857_v54 = vsel %vm414_vm12, %v5476_v5, %v5489_v49  ;;  %vm5601_vm1 = vcmp.eq.f32.partialorder %v4106_v57, %v2094_v41 }
 0x199   : > { %2057 = vmatpush.bf16.msra.mxu1 %v2020_v44  ;;  %2083 = vmatpush.bf16.msra.mxu3 %v2021_v42  ;;  %v1890_v36 = vperm.slane %v1859_v28, 0  ;;  %v2003_v24 = vpack.c.bf16 %v1943_v12, %v1941_v35  ;;  %v1891_v22 = vperm.slane %v1859_v28, 1  ;;  %v1872_v52 = vperm.slane %v1842_v47, 0 }
 0x19a   : > { %2045 = vmatpush.bf16.msra.mxu0 %v2002_v38  ;;  %v1888_v50 = vperm.slane %v1857_v54, 0  ;;  %v1873_v2 = vperm.slane %v1842_v47, 1  ;;  %v1889_v6 = vperm.slane %v1857_v54, 1  ;;  %v3745_v5 = vsel %vm5568_vm15, 1.0, %v6544_v43 }
 0x19b   : > { %v1972_v49 = vmul.f32 %v1890_v36, %v6646_v16  ;;  %v1974_v7 = vmul.f32 %v1890_v36, %v6647_v9  ;;  %2071 = vmatpush.bf16.msra.mxu2 %v2003_v24  ;;  %v1973_v18 = vmul.f32 %v1891_v22, %v6648_v10  ;;  %v1975_v55 = vmul.f32 %v1891_v22, %v6649_v25 }
 0x19c   : > { %v1936_v63 = vmul.f32 %v1872_v52, %v6646_v16  ;;  %v1938_v62 = vmul.f32 %v1872_v52, %v6647_v9  ;;  %v1968_v58 = vmul.f32 %v1888_v50, %v6646_v16  ;;  %v1970_v17 = vmul.f32 %v1888_v50, %v6647_v9  ;;  %v6654_v52 = vld [vmem:[#allocation5_spill] sm:$0xff] }
 0x19d   : > { %v2018_v37 = vpack.c.bf16 %v1974_v7, %v1972_v49  ;;  %v2019_v3 = vpack.c.bf16 %v1975_v55, %v1973_v18  ;;  %v1937_v33 = vmul.f32 %v1873_v2, %v6648_v10  ;;  %v1939_v4 = vmul.f32 %v1873_v2, %v6649_v25 }
 0x19e   : > { %v2000_v60 = vpack.c.bf16 %v1938_v62, %v1936_v63  ;;  %v2016_v29 = vpack.c.bf16 %v1970_v17, %v1968_v58  ;;  %v1969_v56 = vmul.f32 %v1889_v6, %v6648_v10  ;;  %v1971_v31 = vmul.f32 %v1889_v6, %v6649_v25 }
 0x19f   : > { %2058 = vmatpush.bf16.msra.mxu1 %v2018_v37  ;;  %2084 = vmatpush.bf16.msra.mxu3 %v2019_v3  ;;  %v2001_v51 = vpack.c.bf16 %v1939_v4, %v1937_v33  ;;  %v3746_v16 = vsel %vm5601_vm1, 1.0, %v6544_v43  ;;  %v2107_v9 = vperm.slane %v5060_v39, 5  ;;  %v2108_v44 = vperm.slane %v5063_v14, 5 }
 0x1a0   : > { %2046 = vmatpush.bf16.msra.mxu0 %v2000_v60  ;;  %v2017_v32 = vpack.c.bf16 %v1971_v31, %v1969_v56  ;;  %v2113_v21 = vperm.slane %v5215_v30, 5  ;;  %v2114_v10 = vperm.slane %v5218_v59, 5  ;;  %v2127_v25 = vperm.slane %v5044_v46, 5  ;;  %v232_v46 = vld [vmem:[%s4840_s7 + $0x20] sm:$0xff] }
 0x1a1   : > { %2072 = vmatpush.bf16.msra.mxu2 %v2001_v51  ;;  %v2109_v48 = vmul.f32 %v3745_v5, %v2107_v9  ;;  %v2110_v42 = vmul.f32 %v3746_v16, %v2108_v44  ;;  %v2128_v28 = vperm.slane %v5048_v40, 5  ;;  %vm2097_vm4 = vcmp.eq.f32.partialorder %v4113_v61, %v2093_v0 }
 0x1a2   : > { %vm2115_vm5 = vcmp.eq.f32.partialorder %v4106_v57, %v2113_v21  ;;  %vm2116_vm13 = vcmp.eq.f32.partialorder %v4106_v57, %v2114_v10  ;;  %vm2098_vm0 = vcmp.eq.f32.partialorder %v4113_v61, %v2094_v41  ;;  %v3747_v39 = vsel %vm2097_vm4, 1.0, %v6544_v43 }
 0x1a3   : > { %2059 = vmatpush.bf16.msra.mxu1 %v2016_v29  ;;  %2085 = vmatpush.bf16.msra.mxu3 %v2017_v32  ;;  %v3749_v14 = vsel %vm2115_vm5, 1.0, %v6544_v43  ;;  %v3750_v40 = vsel %vm2116_vm13, 1.0, %v6544_v43  ;;  %v3748_v53 = vsel %vm2098_vm0, 1.0, %v6544_v43  ;;  %v2111_v30 = vmul.f32 %v3747_v39, %v2107_v9 }
 0x1a4   : > { %v2129_v59 = vmul.f32 %v3749_v14, %v2127_v25  ;;  %v2130_v0 = vmul.f32 %v3750_v40, %v2128_v28  ;;  %v2112_v35 = vmul.f32 %v3748_v53, %v2108_v44  ;;  %vm2117_vm2 = vcmp.eq.f32.partialorder %v4113_v61, %v2113_v21 }
 0x1a5   : > { %vm2118_vm3 = vcmp.eq.f32.partialorder %v4113_v61, %v2114_v10  ;;  %v3751_v19 = vsel %vm2117_vm2, 1.0, %v6544_v43  ;;  %v2033_v41 = vunpack.c.l.b16 %v232_v46  ;;  %v2034_v12 = vunpack.c.h.b16 %v232_v46  ;;  %v6658_v10 = vld [vmem:[#allocation38_spill] sm:$0xff]  ;;  %v6661_v46 = vld [vmem:[#allocation41_spill] sm:$0xff] }
 0x1a6   : > { %v5645_v38 = vadd.f32 %v2129_v59, %v2109_v48  ;;  %v2134_v47 = vadd.f32 %v2130_v0, %v2110_v42  ;;  %v3752_v54 = vsel %vm2118_vm3, 1.0, %v6544_v43  ;;  %v2131_v20 = vmul.f32 %v3751_v19, %v2127_v25  ;;  %v6659_v48 = vld [vmem:[#allocation40_spill] sm:$0xff] }
 0x1a7   : > { %v2132_v36 = vmul.f32 %v3752_v54, %v2128_v28  ;;  %v2035_v24 = vpack.c.b16 %v2033_v41, %v2033_v41  ;;  %v2036_v22 = vpack.c.b16 %v2034_v12, %v2034_v12  ;;  %v5649_v50 = vadd.f32 2.0, %v6654_v52  ;;  %v6660_v28 = vld [vmem:[#allocation39_spill] sm:$0xff] }
 0x1a8   : > { %v6655_v2 = vperm.slane %v4645_v11, 0  ;;  %v6656_v5 = vperm.slane %v4659_v13, 0  ;;  %v5663_v7 = vadd.f32 %v5467_v27, %v5040_v34  ;;  %v5665_v18 = vrot.slane %v2134_v47, 7  ;;  %v3878_v11 = vld [vmem:[%s4048_s30] sm:$0xff]  ;;  %v6657_v27 = vld [vmem:[#allocation7_spill] sm:$0xff] }
 0x1a9   : > { %v5667_v55 = vadd.f32 %v2131_v20, %v2111_v30  ;;  %v2136_v63 = vadd.f32 %v2132_v36, %v2112_v35  ;;  %2047 = vmatmul.bf16.vlgmr.msra.gmra.mxu0 %v2035_v24  ;;  %2060 = vmatmul.bf16.vlgmr.msra.gmra.mxu1 %v2036_v22  ;;  %v5683_v62 = vadd.f32 2.0, %v6657_v27 }
 0x1aa   : > { %v5654_v6 = vmul.f32 %v5273_v45, %v6655_v2  ;;  %v5659_v49 = vmul.f32 %v5462_v15, %v6656_v5  ;;  %v5671_v45 = vadd.f32 %v3878_v11, %v5649_v50  ;;  %v2200_v13 = vsel %vm434_vm14, %v5665_v18, %v5645_v38  ;;  %2073 = vmatmul.bf16.vlgmr.msra.gmra.mxu2 %v2035_v24 }
 0x1ab   : > { %2086 = vmatmul.bf16.vlgmr.msra.gmra.mxu3 %v2036_v22  ;;  %v2198_v34 = vsel %vm431_vm6, %v5645_v38, %v5665_v18  ;;  %v2196_v15 = vsel %vm428_vm7, %v5645_v38, %v5665_v18  ;;  %v2201_v58 = vrot.slane %v2200_v13, 7  ;;  %v5685_v17 = vrot.slane %v2136_v63, 7 }
 0x1ac   : > { %v2199_v37 = vrot.slane %v2198_v34, 6  ;;  %v2197_v3 = vrot.slane %v2196_v15, 5  ;;  %v2194_v33 = vsel %vm425_vm8, %v5645_v38, %v5665_v18  ;;  %v5693_v4 = vsel %vm422_vm9, %v5645_v38, %v5665_v18 }
 0x1ad   : > { %v5698_v60 = vsel %vm419_vm10, %v5645_v38, %v5665_v18  ;;  %v5703_v29 = vsel %vm416_vm11, %v5645_v38, %v5665_v18  ;;  %v2231_v56 = vperm.slane %v2201_v58, 0  ;;  %v2215_v31 = vsel %vm434_vm14, %v5685_v17, %v5667_v55 }
 0x1ae   : > { %v2232_v51 = vperm.slane %v2201_v58, 1  ;;  %v2229_v16 = vperm.slane %v2199_v37, 0  ;;  %v2216_v9 = vrot.slane %v2215_v31, 7  ;;  %v2213_v44 = vsel %vm431_vm6, %v5667_v55, %v5685_v17 }
 0x1af   : > { %v2230_v32 = vperm.slane %v2199_v37, 1  ;;  %v2227_v21 = vperm.slane %v2197_v3, 0  ;;  %v2309_v25 = vmul.f32 %v2231_v56, %v6658_v10  ;;  %v2311_v42 = vmul.f32 %v2231_v56, %v6659_v48 }
 0x1b0   : > { %v2310_v39 = vmul.f32 %v2232_v51, %v6660_v28  ;;  %v2312_v14 = vmul.f32 %v2232_v51, %v6661_v46  ;;  %v2247_v40 = vperm.slane %v2216_v9, 0  ;;  %v2248_v53 = vperm.slane %v2216_v9, 1 }
 0x1b1   : > { %v2305_v30 = vmul.f32 %v2229_v16, %v6658_v10  ;;  %v2307_v59 = vmul.f32 %v2229_v16, %v6659_v48  ;;  %v2359_v0 = vpack.c.bf16 %v2311_v42, %v2309_v25  ;;  %v2214_v19 = vrot.slane %v2213_v44, 6 }
 0x1b2   : > { %v2360_v35 = vpack.c.bf16 %v2312_v14, %v2310_v39  ;;  %v2306_v41 = vmul.f32 %v2230_v32, %v6660_v28  ;;  %v2341_v12 = vmul.f32 %v2247_v40, %v6658_v10  ;;  %v2343_v47 = vmul.f32 %v2247_v40, %v6659_v48 }
 0x1b3   : > { %v2342_v54 = vmul.f32 %v2248_v53, %v6660_v28  ;;  %v2344_v20 = vmul.f32 %v2248_v53, %v6661_v46  ;;  %2384 = vmatpush.bf16.msrb.mxu0 %v2359_v0  ;;  %v2357_v36 = vpack.c.bf16 %v2307_v59, %v2305_v30  ;;  %v2245_v24 = vperm.slane %v2214_v19, 0 }
 0x1b4   : > { %2410 = vmatpush.bf16.msrb.mxu2 %v2360_v35  ;;  %v2308_v22 = vmul.f32 %v2230_v32, %v6661_v46  ;;  %v2246_v52 = vperm.slane %v2214_v19, 1  ;;  %v2375_v2 = vpack.c.bf16 %v2343_v47, %v2341_v12  ;;  %v2301_v63 = vmul.f32 %v2227_v21, %v6658_v10 }
 0x1b5   : > { %v2376_v5 = vpack.c.bf16 %v2344_v20, %v2342_v54  ;;  %v2303_v11 = vmul.f32 %v2227_v21, %v6659_v48  ;;  %v2337_v13 = vmul.f32 %v2245_v24, %v6658_v10  ;;  %v2339_v34 = vmul.f32 %v2245_v24, %v6659_v48 }
 0x1b6   : > { %v2358_v15 = vpack.c.bf16 %v2308_v22, %v2306_v41  ;;  %v2338_v27 = vmul.f32 %v2246_v52, %v6660_v28  ;;  %2397 = vmatpush.bf16.msrb.mxu1 %v2375_v2  ;;  %v2340_v58 = vmul.f32 %v2246_v52, %v6661_v46  ;;  %v2211_v56 = vsel %vm428_vm7, %v5667_v55, %v5685_v17 }
 0x1b7   : > { %2423 = vmatpush.bf16.msrb.mxu3 %v2376_v5  ;;  %v2355_v37 = vpack.c.bf16 %v2303_v11, %v2301_v63  ;;  %v2228_v31 = vperm.slane %v2197_v3, 1  ;;  %2385 = vmatpush.bf16.msrb.mxu0 %v2357_v36  ;;  %v2373_v51 = vpack.c.bf16 %v2339_v34, %v2337_v13  ;;  %v2212_v16 = vrot.slane %v2211_v56, 5 }
 0x1b8   : > { %2411 = vmatpush.bf16.msrb.mxu2 %v2358_v15  ;;  %v2195_v9 = vrot.slane %v2194_v33, 4  ;;  %v2209_v44 = vsel %vm425_vm8, %v5667_v55, %v5685_v17  ;;  %v2374_v32 = vpack.c.bf16 %v2340_v58, %v2338_v27  ;;  %v2193_v33 = vrot.slane %v5693_v4, 3 }
 0x1b9   : > { %v2302_v21 = vmul.f32 %v2228_v31, %v6660_v28  ;;  %v2304_v25 = vmul.f32 %v2228_v31, %v6661_v46  ;;  %v2210_v42 = vrot.slane %v2209_v44, 4  ;;  %v2243_v39 = vperm.slane %v2212_v16, 0 }
 0x1ba   : > { %v2244_v14 = vperm.slane %v2212_v16, 1  ;;  %v2225_v40 = vperm.slane %v2195_v9, 0  ;;  %v2226_v53 = vperm.slane %v2195_v9, 1  ;;  %2398 = vmatpush.bf16.msrb.mxu1 %v2373_v51  ;;  %v2223_v13 = vperm.slane %v2193_v33, 0 }
 0x1bb   : > { %2424 = vmatpush.bf16.msrb.mxu3 %v2374_v32  ;;  %v2356_v3 = vpack.c.bf16 %v2304_v25, %v2302_v21  ;;  %v2241_v30 = vperm.slane %v2210_v42, 0  ;;  %v2242_v59 = vperm.slane %v2210_v42, 1  ;;  %2386 = vmatpush.bf16.msrb.mxu0 %v2355_v37  ;;  %v2333_v0 = vmul.f32 %v2243_v39, %v6658_v10 }
 0x1bc   : > { %v2335_v35 = vmul.f32 %v2243_v39, %v6659_v48  ;;  %v2334_v19 = vmul.f32 %v2244_v14, %v6660_v28  ;;  %v2336_v41 = vmul.f32 %v2244_v14, %v6661_v46  ;;  %v2297_v12 = vmul.f32 %v2225_v40, %v6658_v10 }
 0x1bd   : > { %2412 = vmatpush.bf16.msrb.mxu2 %v2356_v3  ;;  %v2299_v47 = vmul.f32 %v2225_v40, %v6659_v48  ;;  %v2329_v54 = vmul.f32 %v2241_v30, %v6658_v10  ;;  %v2331_v20 = vmul.f32 %v2241_v30, %v6659_v48  ;;  %v2298_v24 = vmul.f32 %v2226_v53, %v6660_v28 }
 0x1be   : > { %v2371_v36 = vpack.c.bf16 %v2335_v35, %v2333_v0  ;;  %v2372_v4 = vpack.c.bf16 %v2336_v41, %v2334_v19  ;;  %v2300_v22 = vmul.f32 %v2226_v53, %v6661_v46  ;;  %v2330_v5 = vmul.f32 %v2242_v59, %v6660_v28 }
 0x1bf   : > { %v2353_v52 = vpack.c.bf16 %v2299_v47, %v2297_v12  ;;  %v2369_v2 = vpack.c.bf16 %v2331_v20, %v2329_v54  ;;  %v2332_v63 = vmul.f32 %v2242_v59, %v6661_v46  ;;  %v2207_v34 = vsel %vm422_vm9, %v5667_v55, %v5685_v17 }
 0x1c0   : > { %2399 = vmatpush.bf16.msrb.mxu1 %v2371_v36  ;;  %2425 = vmatpush.bf16.msrb.mxu3 %v2372_v4  ;;  %v2354_v11 = vpack.c.bf16 %v2300_v22, %v2298_v24  ;;  %v2224_v15 = vperm.slane %v2193_v33, 1  ;;  %v2208_v58 = vrot.slane %v2207_v34, 3  ;;  %v2191_v37 = vrot.slane %v5698_v60, 2 }
 0x1c1   : > { %2387 = vmatpush.bf16.msrb.mxu0 %v2353_v52  ;;  %v2370_v27 = vpack.c.bf16 %v2332_v63, %v2330_v5  ;;  %v2205_v56 = vsel %vm419_vm10, %v5667_v55, %v5685_v17  ;;  %v2293_v31 = vmul.f32 %v2223_v13, %v6658_v10  ;;  %v2295_v51 = vmul.f32 %v2223_v13, %v6659_v48 }
 0x1c2   : > { %2413 = vmatpush.bf16.msrb.mxu2 %v2354_v11  ;;  %v2294_v16 = vmul.f32 %v2224_v15, %v6660_v28  ;;  %v2296_v9 = vmul.f32 %v2224_v15, %v6661_v46  ;;  %v2239_v44 = vperm.slane %v2208_v58, 0  ;;  %v2240_v32 = vperm.slane %v2208_v58, 1 }
 0x1c3   : > { %v2221_v21 = vperm.slane %v2191_v37, 0  ;;  %v2206_v25 = vrot.slane %v2205_v56, 2  ;;  %v2351_v60 = vpack.c.bf16 %v2295_v51, %v2293_v31  ;;  %v2222_v39 = vperm.slane %v2191_v37, 1  ;;  %v3879_v31 = vld [vmem:[%s4048_s30 + $0x8] sm:$0xff] }
 0x1c4   : > { %2400 = vmatpush.bf16.msrb.mxu1 %v2369_v2  ;;  %2426 = vmatpush.bf16.msrb.mxu3 %v2370_v27  ;;  %v2352_v42 = vpack.c.bf16 %v2296_v9, %v2294_v16  ;;  %v2189_v14 = vrot.slane %v5703_v29, 1  ;;  %v2325_v40 = vmul.f32 %v2239_v44, %v6658_v10  ;;  %v2327_v53 = vmul.f32 %v2239_v44, %v6659_v48 }
 0x1c5   : > { %v2326_v3 = vmul.f32 %v2240_v32, %v6660_v28  ;;  %v2328_v30 = vmul.f32 %v2240_v32, %v6661_v46  ;;  %2388 = vmatpush.bf16.msrb.mxu0 %v2351_v60  ;;  %v2289_v59 = vmul.f32 %v2221_v21, %v6658_v10  ;;  %v2291_v33 = vmul.f32 %v2221_v21, %v6659_v48 }
 0x1c6   : > { %2414 = vmatpush.bf16.msrb.mxu2 %v2352_v42  ;;  %v2237_v0 = vperm.slane %v2206_v25, 0  ;;  %v2290_v35 = vmul.f32 %v2222_v39, %v6660_v28  ;;  %v2367_v19 = vpack.c.bf16 %v2327_v53, %v2325_v40  ;;  %v2292_v29 = vmul.f32 %v2222_v39, %v6661_v46  ;;  %v5800_v40 = vpop.f32.mrf.mxu1  ;;  %v5802_v53 = vpop.f32.mrf.mxu3 }
 0x1c7   : > { %v2368_v41 = vpack.c.bf16 %v2328_v30, %v2326_v3  ;;  %v2238_v12 = vperm.slane %v2206_v25, 1  ;;  %v2349_v47 = vpack.c.bf16 %v2291_v33, %v2289_v59  ;;  %v2219_v36 = vperm.slane %v2189_v14, 0 }
 0x1c8   : > { %v2321_v54 = vmul.f32 %v2237_v0, %v6658_v10  ;;  %v2323_v20 = vmul.f32 %v2237_v0, %v6659_v48  ;;  %2401 = vmatpush.bf16.msrb.mxu1 %v2367_v19  ;;  %v2350_v4 = vpack.c.bf16 %v2292_v29, %v2290_v35  ;;  %v2220_v52 = vperm.slane %v2189_v14, 1  ;;  %v233_v29 = vld [vmem:[%s4840_s7 + $0x28] sm:$0xff] }
 0x1c9   : > { %2427 = vmatpush.bf16.msrb.mxu3 %v2368_v41  ;;  %v2322_v24 = vmul.f32 %v2238_v12, %v6660_v28  ;;  %v2324_v22 = vmul.f32 %v2238_v12, %v6661_v46  ;;  %2389 = vmatpush.bf16.msrb.mxu0 %v2349_v47  ;;  %v2285_v5 = vmul.f32 %v2219_v36, %v6658_v10  ;;  %v5790_v42 = vfloor.f32 %v5671_v45 }
 0x1ca   : > { %v2365_v2 = vpack.c.bf16 %v2323_v20, %v2321_v54  ;;  %v2287_v63 = vmul.f32 %v2219_v36, %v6659_v48  ;;  %v2203_v11 = vsel %vm416_vm11, %v5667_v55, %v5685_v17  ;;  %2415 = vmatpush.bf16.msrb.mxu2 %v2350_v4  ;;  %v2286_v15 = vmul.f32 %v2220_v52, %v6660_v28 }
 0x1cb   : > { %v2366_v13 = vpack.c.bf16 %v2324_v22, %v2322_v24  ;;  %v2204_v34 = vrot.slane %v2203_v11, 1  ;;  %v2288_v27 = vmul.f32 %v2220_v52, %v6661_v46  ;;  %v2187_v37 = vsel %vm414_vm12, %v5645_v38, %v5665_v18  ;;  %v5792_v38 = vpop.f32.mrf.mxu0  ;;  %v5794_v18 = vpop.f32.mrf.mxu2 }
 0x1cc   : > { %v2347_v58 = vpack.c.bf16 %v2287_v63, %v2285_v5  ;;  %v2202_v56 = vsel %vm414_vm12, %v5667_v55, %v5685_v17  ;;  %v2441_v51 = vadd.f32 %v3879_v31, %v5683_v62  ;;  %2402 = vmatpush.bf16.msrb.mxu1 %v2365_v2  ;;  %v2217_v32 = vperm.slane %v2187_v37, 0 }
 0x1cd   : > { %2428 = vmatpush.bf16.msrb.mxu3 %v2366_v13  ;;  %v2235_v16 = vperm.slane %v2204_v34, 0  ;;  %v2348_v9 = vpack.c.bf16 %v2288_v27, %v2286_v15  ;;  %v2236_v44 = vperm.slane %v2204_v34, 1  ;;  %v2233_v21 = vperm.slane %v2202_v56, 0 }
 0x1ce   : > { %2390 = vmatpush.bf16.msrb.mxu0 %v2347_v58  ;;  %v2218_v25 = vperm.slane %v2187_v37, 1  ;;  %v2234_v60 = vperm.slane %v2202_v56, 1  ;;  %v2281_v3 = vmul.f32 %v2217_v32, %v6658_v10  ;;  %v2283_v30 = vmul.f32 %v2217_v32, %v6659_v48  ;;  %v943_v56 = vpop.f32.mrf.mxu1  ;;  %v969_v31 = vpop.f32.mrf.mxu3 }
 0x1cf   : > { %v2317_v55 = vmul.f32 %v2235_v16, %v6658_v10  ;;  %v2319_v17 = vmul.f32 %v2235_v16, %v6659_v48  ;;  %2416 = vmatpush.bf16.msrb.mxu2 %v2348_v9  ;;  %v2318_v39 = vmul.f32 %v2236_v44, %v6660_v28  ;;  %v2320_v14 = vmul.f32 %v2236_v44, %v6661_v46 }
 0x1d0   : > { %v2313_v59 = vmul.f32 %v2233_v21, %v6658_v10  ;;  %v2315_v33 = vmul.f32 %v2233_v21, %v6659_v48  ;;  %v2282_v19 = vmul.f32 %v2218_v25, %v6660_v28  ;;  %v2284_v41 = vmul.f32 %v2218_v25, %v6661_v46 }
 0x1d1   : > { %v2363_v0 = vpack.c.bf16 %v2319_v17, %v2317_v55  ;;  %v2364_v35 = vpack.c.bf16 %v2320_v14, %v2318_v39  ;;  %v2345_v12 = vpack.c.bf16 %v2283_v30, %v2281_v3  ;;  %v2314_v54 = vmul.f32 %v2234_v60, %v6660_v28 }
 0x1d2   : > { %v2361_v47 = vpack.c.bf16 %v2315_v33, %v2313_v59  ;;  %v2316_v20 = vmul.f32 %v2234_v60, %v6661_v46  ;;  %v2346_v36 = vpack.c.bf16 %v2284_v41, %v2282_v19  ;;  %v5813_v4 = vfloor.f32 %v2441_v51 }
 0x1d3   : > { %2403 = vmatpush.bf16.msrb.mxu1 %v2363_v0  ;;  %2429 = vmatpush.bf16.msrb.mxu3 %v2364_v35  ;;  %v5817_v10 = vsub.f32 %v5671_v45, %v5790_v42  ;;  %v2448_v48 = vperm.slane %v5790_v42, 6  ;;  %v5821_v22 = vadd.f32 1.0, %v5790_v42  ;;  %v2378_v52 = vunpack.c.l.b16 %v233_v29  ;;  %v930_v34 = vpop.f32.mrf.mxu0  ;;  %v956_v15 = vpop.f32.mrf.mxu2 }
 0x1d4   : > { %2391 = vmatpush.bf16.msrb.mxu0 %v2345_v12  ;;  %v2362_v24 = vpack.c.bf16 %v2316_v20, %v2314_v54  ;;  %v2379_v28 = vunpack.c.h.b16 %v233_v29  ;;  %2417 = vmatpush.bf16.msrb.mxu2 %v2346_v36  ;;  %v5824_v46 = vsub.f32 %v2441_v51, %v5813_v4  ;;  %v2449_v5 = vperm.slane %v5813_v4, 6 }
 0x1d5   : > { %v2446_v2 = vsub.f32 1.0, %v5817_v10  ;;  %vm2450_vm15 = vcmp.eq.f32.partialorder %v4106_v57, %v2448_v48  ;;  %v5831_v63 = vadd.f32 1.0, %v5813_v4  ;;  %v2470_v11 = vperm.slane %v5821_v22, 6 }
 0x1d6   : > { %v3761_v45 = vsel %vm2450_vm15, 1.0, %v6544_v43  ;;  %v2484_v13 = vperm.slane %v5817_v10, 6  ;;  %v2447_v27 = vsub.f32 1.0, %v5824_v46  ;;  %vm2451_vm1 = vcmp.eq.f32.partialorder %v4106_v57, %v2449_v5 }
 0x1d7   : > { %2404 = vmatpush.bf16.msrb.mxu1 %v2361_v47  ;;  %2430 = vmatpush.bf16.msrb.mxu3 %v2362_v24  ;;  %v2462_v58 = vperm.slane %v2446_v2, 6  ;;  %v2485_v37 = vperm.slane %v5824_v46, 6  ;;  %v3762_v51 = vsel %vm2451_vm1, 1.0, %v6544_v43  ;;  %v2471_v16 = vperm.slane %v5831_v63, 6 }
 0x1d8   : > { %vm2472_vm4 = vcmp.eq.f32.partialorder %v4106_v57, %v2470_v11  ;;  %vm2452_vm5 = vcmp.eq.f32.partialorder %v4113_v61, %v2448_v48  ;;  %v2463_v9 = vperm.slane %v2447_v27, 6  ;;  %vm2453_vm13 = vcmp.eq.f32.partialorder %v4113_v61, %v2449_v5 }
 0x1d9   : > { %v2464_v44 = vmul.f32 %v3761_v45, %v2462_v58  ;;  %v3765_v32 = vsel %vm2472_vm4, 1.0, %v6544_v43  ;;  %vm2473_vm0 = vcmp.eq.f32.partialorder %v4106_v57, %v2471_v16  ;;  %v3763_v25 = vsel %vm2452_vm5, 1.0, %v6544_v43 }
 0x1da   : > { %v2486_v21 = vmul.f32 %v3765_v32, %v2484_v13  ;;  %v3764_v60 = vsel %vm2453_vm13, 1.0, %v6544_v43  ;;  %v2465_v55 = vmul.f32 %v3762_v51, %v2463_v9  ;;  %v3766_v17 = vsel %vm2473_vm0, 1.0, %v6544_v43 }
 0x1db   : > { %v2466_v39 = vmul.f32 %v3763_v25, %v2462_v58  ;;  %v2467_v14 = vmul.f32 %v3764_v60, %v2463_v9  ;;  %v2487_v3 = vmul.f32 %v3766_v17, %v2485_v37  ;;  %vm2474_vm2 = vcmp.eq.f32.partialorder %v4113_v61, %v2470_v11  ;;  %v987_v36 = vpop.f32.mrf.mxu0  ;;  %v1013_v48 = vpop.f32.mrf.mxu2  ;;  %v6662_v60 = vld [vmem:[#allocation12_spill] sm:$0xff]  ;;  %v6663_v17 = vld [vmem:[#allocation6_spill] sm:$0xff] }
 0x1dc   : > { %v5852_v30 = vadd.f32 %v2486_v21, %v2464_v44  ;;  %vm2475_vm3 = vcmp.eq.f32.partialorder %v4113_v61, %v2471_v16  ;;  %v3767_v59 = vsel %vm2474_vm2, 1.0, %v6544_v43  ;;  %v2380_v0 = vpack.c.b16 %v2378_v52, %v2378_v52 }
 0x1dd   : > { %v3768_v33 = vsel %vm2475_vm3, 1.0, %v6544_v43  ;;  %v2381_v35 = vpack.c.b16 %v2379_v28, %v2379_v28  ;;  %v2491_v19 = vadd.f32 %v2487_v3, %v2465_v55  ;;  %v2488_v41 = vmul.f32 %v3767_v59, %v2484_v13  ;;  %v6664_v3 = vld [vmem:[#allocation9_spill] sm:$0xff] }
 0x1de   : > { %v2489_v29 = vmul.f32 %v3768_v33, %v2485_v37  ;;  %v942_v12 = vadd.f32 %v5800_v40, %v5792_v38  ;;  %v5862_v47 = vadd.f32 %v5472_v8, %v5252_v1  ;;  %v5866_v54 = vadd.f32 %v5654_v6, %v5053_v23  ;;  %2392 = vmatmul.bf16.vlgmr.msrb.gmra.mxu0 %v2380_v0  ;;  %v5876_v8 = vpop.f32.mrf.mxu1  ;;  %v5878_v23 = vpop.f32.mrf.mxu3 }
 0x1df   : > { %2405 = vmatmul.bf16.vlgmr.msrb.gmra.mxu1 %v2381_v35  ;;  %v968_v20 = vadd.f32 %v5802_v53, %v5794_v18  ;;  %v5870_v24 = vrot.slane %v2491_v19, 7  ;;  %v5872_v52 = vadd.f32 %v2488_v41, %v2466_v39  ;;  %2418 = vmatmul.bf16.vlgmr.msrb.gmra.mxu2 %v2380_v0  ;;  %v5882_v6 = vadd.f32 %v5659_v49, %v5257_v26 }
 0x1e0   : > { %v2493_v38 = vadd.f32 %v2489_v29, %v2467_v14  ;;  %2431 = vmatmul.bf16.vlgmr.msrb.gmra.mxu3 %v2381_v35  ;;  %v5874_v1 = vadd.f32 %v987_v36, %v942_v12  ;;  %v2813_v40 = vperm.slane %v5790_v42, 7  ;;  %v2814_v53 = vperm.slane %v5813_v4, 7  ;;  %v6665_v35 = vld [vmem:[#allocation14_spill] sm:$0xff] }
 0x1e1   : > { %v5884_v18 = vadd.f32 %v1013_v48, %v968_v20  ;;  %v2567_v28 = vsel %vm434_vm14, %v5870_v24, %v5852_v30  ;;  %v2565_v45 = vsel %vm431_vm6, %v5852_v30, %v5870_v24  ;;  %v2563_v26 = vsel %vm428_vm7, %v5852_v30, %v5870_v24 }
 0x1e2   : > { %v5891_v5 = vrot.slane %v2493_v38, 7  ;;  %v2568_v49 = vrot.slane %v2567_v28, 7  ;;  %v2566_v11 = vrot.slane %v2565_v45, 6  ;;  %v2564_v13 = vrot.slane %v2563_v26, 5 }
 0x1e3   : > { %v5902_v34 = vsel %vm425_vm8, %v5852_v30, %v5870_v24  ;;  %v989_v33 = vpop.f32.mrf.mxu0  ;;  %v1015_v0 = vpop.f32.mrf.mxu2  ;;  %vm5993_vm15 = vcmp.eq.f32.partialorder %v4106_v57, %v2813_v40  ;;  %vm6000_vm1 = vcmp.eq.f32.partialorder %v4106_v57, %v2814_v53  ;;  %vm2817_vm13 = vcmp.eq.f32.partialorder %v4113_v61, %v2813_v40 }
 0x1e4   : > { %v2582_v15 = vsel %vm434_vm14, %v5891_v5, %v5872_v52  ;;  %v2580_v58 = vsel %vm431_vm6, %v5872_v52, %v5891_v5  ;;  %v2578_v37 = vsel %vm428_vm7, %v5872_v52, %v5891_v5  ;;  %v2562_v56 = vrot.slane %v5902_v34, 4 }
 0x1e5   : > { %v2598_v31 = vperm.slane %v2568_v49, 0  ;;  %v2583_v51 = vrot.slane %v2582_v15, 7  ;;  %v2599_v16 = vperm.slane %v2568_v49, 1  ;;  %v2596_v9 = vperm.slane %v2566_v11, 0 }
 0x1e6   : > { %v2581_v44 = vrot.slane %v2580_v58, 6  ;;  %v2597_v32 = vperm.slane %v2566_v11, 1  ;;  %v2594_v21 = vperm.slane %v2564_v13, 0  ;;  %v2579_v25 = vrot.slane %v2578_v37, 5  ;;  %v1002_v20 = vpop.f32.mrf.mxu1  ;;  %v1028_v36 = vpop.f32.mrf.mxu3 }
 0x1e7   : > { %v2676_v55 = vmul.f32 %v2598_v31, %v6662_v60  ;;  %v2678_v39 = vmul.f32 %v2598_v31, %v6663_v17  ;;  %v2614_v14 = vperm.slane %v2583_v51, 0  ;;  %v2677_v59 = vmul.f32 %v2599_v16, %v6664_v3 }
 0x1e8   : > { %v2679_v19 = vmul.f32 %v2599_v16, %v6665_v35  ;;  %v2615_v41 = vperm.slane %v2583_v51, 1  ;;  %v2672_v29 = vmul.f32 %v2596_v9, %v6662_v60  ;;  %v2674_v12 = vmul.f32 %v2596_v9, %v6663_v17 }
 0x1e9   : > { %v2726_v48 = vpack.c.bf16 %v2678_v39, %v2676_v55  ;;  %v2708_v38 = vmul.f32 %v2614_v14, %v6662_v60  ;;  %v2710_v28 = vmul.f32 %v2614_v14, %v6663_v17  ;;  %v2612_v45 = vperm.slane %v2581_v44, 0 }
 0x1ea   : > { %v2727_v26 = vpack.c.bf16 %v2679_v19, %v2677_v59  ;;  %v2709_v49 = vmul.f32 %v2615_v41, %v6664_v3  ;;  %v2711_v11 = vmul.f32 %v2615_v41, %v6665_v35  ;;  %v2724_v15 = vpack.c.bf16 %v2674_v12, %v2672_v29 }
 0x1eb   : > { %2751 = vmatpush.bf16.msra.mxu0 %v2726_v48  ;;  %v2742_v58 = vpack.c.bf16 %v2710_v28, %v2708_v38  ;;  %v2704_v37 = vmul.f32 %v2612_v45, %v6662_v60  ;;  %v2706_v31 = vmul.f32 %v2612_v45, %v6663_v17  ;;  %v2673_v51 = vmul.f32 %v2597_v32, %v6664_v3 }
 0x1ec   : > { %2777 = vmatpush.bf16.msra.mxu2 %v2727_v26  ;;  %v2743_v16 = vpack.c.bf16 %v2711_v11, %v2709_v49  ;;  %v2675_v9 = vmul.f32 %v2597_v32, %v6665_v35  ;;  %v2613_v55 = vperm.slane %v2581_v44, 1  ;;  %v2668_v39 = vmul.f32 %v2594_v21, %v6662_v60 }
 0x1ed   : > { %2764 = vmatpush.bf16.msra.mxu1 %v2742_v58  ;;  %v2740_v14 = vpack.c.bf16 %v2706_v31, %v2704_v37  ;;  %v2670_v59 = vmul.f32 %v2594_v21, %v6663_v17  ;;  %v2610_v33 = vperm.slane %v2579_v25, 0  ;;  %v2595_v0 = vperm.slane %v2564_v13, 1 }
 0x1ee   : > { %2790 = vmatpush.bf16.msra.mxu3 %v2743_v16  ;;  %v2725_v19 = vpack.c.bf16 %v2675_v9, %v2673_v51  ;;  %v2705_v41 = vmul.f32 %v2613_v55, %v6664_v3  ;;  %v2707_v29 = vmul.f32 %v2613_v55, %v6665_v35  ;;  %v2611_v12 = vperm.slane %v2579_v25, 1 }
 0x1ef   : > { %2752 = vmatpush.bf16.msra.mxu0 %v2724_v15  ;;  %v2722_v20 = vpack.c.bf16 %v2670_v59, %v2668_v39  ;;  %v2700_v32 = vmul.f32 %v2610_v33, %v6662_v60  ;;  %v2702_v44 = vmul.f32 %v2610_v33, %v6663_v17  ;;  %v2669_v36 = vmul.f32 %v2595_v0, %v6664_v3 }
 0x1f0   : > { %2778 = vmatpush.bf16.msra.mxu2 %v2725_v19  ;;  %v2741_v48 = vpack.c.bf16 %v2707_v29, %v2705_v41  ;;  %v2671_v21 = vmul.f32 %v2595_v0, %v6665_v35  ;;  %v2701_v13 = vmul.f32 %v2611_v12, %v6664_v3  ;;  %v2703_v38 = vmul.f32 %v2611_v12, %v6665_v35 }
 0x1f1   : > { %2765 = vmatpush.bf16.msra.mxu1 %v2740_v14  ;;  %v2738_v28 = vpack.c.bf16 %v2702_v44, %v2700_v32  ;;  %v2592_v25 = vperm.slane %v2562_v56, 0  ;;  %v2576_v45 = vsel %vm425_vm8, %v5872_v52, %v5891_v5  ;;  %v2593_v26 = vperm.slane %v2562_v56, 1 }
 0x1f2   : > { %2791 = vmatpush.bf16.msra.mxu3 %v2741_v48  ;;  %v2723_v49 = vpack.c.bf16 %v2671_v21, %v2669_v36  ;;  %v2739_v11 = vpack.c.bf16 %v2703_v38, %v2701_v13  ;;  %v2577_v15 = vrot.slane %v2576_v45, 4  ;;  %v2559_v58 = vsel %vm422_vm9, %v5852_v30, %v5870_v24 }
 0x1f3   : > { %2753 = vmatpush.bf16.msra.mxu0 %v2722_v20  ;;  %v2664_v37 = vmul.f32 %v2592_v25, %v6662_v60  ;;  %v2666_v31 = vmul.f32 %v2592_v25, %v6663_v17  ;;  %v2665_v51 = vmul.f32 %v2593_v26, %v6664_v3  ;;  %v2667_v16 = vmul.f32 %v2593_v26, %v6665_v35 }
 0x1f4   : > { %2779 = vmatpush.bf16.msra.mxu2 %v2723_v49  ;;  %v2608_v34 = vperm.slane %v2577_v15, 0  ;;  %v2609_v56 = vperm.slane %v2577_v15, 1  ;;  %v2560_v9 = vrot.slane %v2559_v58, 3  ;;  %v2574_v55 = vsel %vm422_vm9, %v5872_v52, %v5891_v5 }
 0x1f5   : > { %2766 = vmatpush.bf16.msra.mxu1 %v2738_v28  ;;  %v2720_v39 = vpack.c.bf16 %v2666_v31, %v2664_v37  ;;  %v2721_v14 = vpack.c.bf16 %v2667_v16, %v2665_v51  ;;  %v2575_v59 = vrot.slane %v2574_v55, 3  ;;  %v5957_v33 = vadd.f32 %v5876_v8, %v5874_v1 }
 0x1f6   : > { %2792 = vmatpush.bf16.msra.mxu3 %v2739_v11  ;;  %v2696_v0 = vmul.f32 %v2608_v34, %v6662_v60  ;;  %v2698_v19 = vmul.f32 %v2608_v34, %v6663_v17  ;;  %v2697_v41 = vmul.f32 %v2609_v56, %v6664_v3  ;;  %v2699_v29 = vmul.f32 %v2609_v56, %v6665_v35 }
 0x1f7   : > { %2754 = vmatpush.bf16.msra.mxu0 %v2720_v39  ;;  %v2590_v12 = vperm.slane %v2560_v9, 0  ;;  %v2606_v20 = vperm.slane %v2575_v59, 0  ;;  %v2591_v32 = vperm.slane %v2560_v9, 1  ;;  %v2607_v44 = vperm.slane %v2575_v59, 1  ;;  %v1346_v39 = vpop.f32.mrf.mxu0 }
 0x1f8   : > { %v2736_v36 = vpack.c.bf16 %v2698_v19, %v2696_v0  ;;  %2780 = vmatpush.bf16.msra.mxu2 %v2721_v14  ;;  %v2737_v48 = vpack.c.bf16 %v2699_v29, %v2697_v41  ;;  %v5965_v1 = vadd.f32 %v5878_v23, %v5884_v18  ;;  %v2557_v8 = vsel %vm419_vm10, %v5852_v30, %v5870_v24 }
 0x1f9   : > { %v2660_v21 = vmul.f32 %v2590_v12, %v6662_v60  ;;  %v2662_v13 = vmul.f32 %v2590_v12, %v6663_v17  ;;  %v2692_v38 = vmul.f32 %v2606_v20, %v6662_v60  ;;  %v2694_v28 = vmul.f32 %v2606_v20, %v6663_v17 }
 0x1fa   : > { %2767 = vmatpush.bf16.msra.mxu1 %v2736_v36  ;;  %2793 = vmatpush.bf16.msra.mxu3 %v2737_v48  ;;  %v2661_v25 = vmul.f32 %v2591_v32, %v6664_v3  ;;  %v2663_v45 = vmul.f32 %v2591_v32, %v6665_v35  ;;  %v2693_v23 = vmul.f32 %v2607_v44, %v6664_v3  ;;  %v2558_v18 = vrot.slane %v2557_v8, 2 }
 0x1fb   : > { %v2718_v26 = vpack.c.bf16 %v2662_v13, %v2660_v21  ;;  %v2734_v49 = vpack.c.bf16 %v2694_v28, %v2692_v38  ;;  %v2695_v11 = vmul.f32 %v2607_v44, %v6665_v35  ;;  %v2572_v15 = vsel %vm419_vm10, %v5872_v52, %v5891_v5 }
 0x1fc   : > { %v2719_v58 = vpack.c.bf16 %v2663_v45, %v2661_v25  ;;  %v2588_v37 = vperm.slane %v2558_v18, 0  ;;  %v2573_v31 = vrot.slane %v2572_v15, 2  ;;  %v2589_v51 = vperm.slane %v2558_v18, 1 }
 0x1fd   : > { %2755 = vmatpush.bf16.msra.mxu0 %v2718_v26  ;;  %v2735_v16 = vpack.c.bf16 %v2695_v11, %v2693_v23  ;;  %v2555_v34 = vsel %vm416_vm11, %v5852_v30, %v5870_v24  ;;  %v2570_v56 = vsel %vm416_vm11, %v5872_v52, %v5891_v5  ;;  %v2554_v9 = vsel %vm414_vm12, %v5852_v30, %v5870_v24 }
 0x1fe   : > { %2768 = vmatpush.bf16.msra.mxu1 %v2734_v49  ;;  %2781 = vmatpush.bf16.msra.mxu2 %v2719_v58  ;;  %v2656_v14 = vmul.f32 %v2588_v37, %v6662_v60  ;;  %v2658_v30 = vmul.f32 %v2588_v37, %v6663_v17  ;;  %v2604_v24 = vperm.slane %v2573_v31, 0  ;;  %v2657_v59 = vmul.f32 %v2589_v51, %v6664_v3 }
 0x1ff   : > { %2794 = vmatpush.bf16.msra.mxu3 %v2735_v16  ;;  %v2659_v0 = vmul.f32 %v2589_v51, %v6665_v35  ;;  %v2605_v19 = vperm.slane %v2573_v31, 1  ;;  %v2556_v41 = vrot.slane %v2555_v34, 1  ;;  %v2571_v29 = vrot.slane %v2570_v56, 1 }
 0x200   : > { %v2716_v12 = vpack.c.bf16 %v2658_v30, %v2656_v14  ;;  %v2688_v20 = vmul.f32 %v2604_v24, %v6662_v60  ;;  %v2690_v32 = vmul.f32 %v2604_v24, %v6663_v17  ;;  %v2584_v44 = vperm.slane %v2554_v9, 0 }
 0x201   : > { %v2717_v36 = vpack.c.bf16 %v2659_v0, %v2657_v59  ;;  %v2689_v48 = vmul.f32 %v2605_v19, %v6664_v3  ;;  %v2691_v8 = vmul.f32 %v2605_v19, %v6665_v35  ;;  %v2586_v21 = vperm.slane %v2556_v41, 0 }
 0x202   : > { %2756 = vmatpush.bf16.msra.mxu0 %v2716_v12  ;;  %v2732_v13 = vpack.c.bf16 %v2690_v32, %v2688_v20  ;;  %v2602_v38 = vperm.slane %v2571_v29, 0  ;;  %v2587_v28 = vperm.slane %v2556_v41, 1  ;;  %v2603_v25 = vperm.slane %v2571_v29, 1 }
 0x203   : > { %2782 = vmatpush.bf16.msra.mxu2 %v2717_v36  ;;  %v2733_v45 = vpack.c.bf16 %v2691_v8, %v2689_v48  ;;  %v2652_v23 = vmul.f32 %v2586_v21, %v6662_v60  ;;  %v2654_v18 = vmul.f32 %v2586_v21, %v6663_v17  ;;  %v2648_v26 = vmul.f32 %v2584_v44, %v6662_v60  ;;  %v1359_v8 = vpop.f32.mrf.mxu1 }
 0x204   : > { %2769 = vmatpush.bf16.msra.mxu1 %v2732_v13  ;;  %v2684_v49 = vmul.f32 %v2602_v38, %v6662_v60  ;;  %v2686_v11 = vmul.f32 %v2602_v38, %v6663_v17  ;;  %v2653_v15 = vmul.f32 %v2587_v28, %v6664_v3  ;;  %v2655_v58 = vmul.f32 %v2587_v28, %v6665_v35 }
 0x205   : > { %2795 = vmatpush.bf16.msra.mxu3 %v2733_v45  ;;  %v2714_v37 = vpack.c.bf16 %v2654_v18, %v2652_v23  ;;  %v2685_v31 = vmul.f32 %v2603_v25, %v6664_v3  ;;  %v2687_v51 = vmul.f32 %v2603_v25, %v6665_v35  ;;  %v2650_v16 = vmul.f32 %v2584_v44, %v6663_v17 }
 0x206   : > { %v2730_v34 = vpack.c.bf16 %v2686_v11, %v2684_v49  ;;  %v2715_v56 = vpack.c.bf16 %v2655_v58, %v2653_v15  ;;  %v2569_v14 = vsel %vm414_vm12, %v5872_v52, %v5891_v5  ;;  %v2585_v30 = vperm.slane %v2554_v9, 1  ;;  %v3880_v58 = vld [vmem:[%s4048_s30 + $0x10] sm:$0xff] }
 0x207   : > { %2757 = vmatpush.bf16.msra.mxu0 %v2714_v37  ;;  %v2731_v24 = vpack.c.bf16 %v2687_v51, %v2685_v31  ;;  %v2712_v59 = vpack.c.bf16 %v2650_v16, %v2648_v26  ;;  %v2600_v0 = vperm.slane %v2569_v14, 0  ;;  %v2601_v19 = vperm.slane %v2569_v14, 1  ;;  %v1348_v31 = vpop.f32.mrf.mxu0  ;;  %v1372_v14 = vpop.f32.mrf.mxu2 }
 0x208   : > { %2770 = vmatpush.bf16.msra.mxu1 %v2730_v34  ;;  %2783 = vmatpush.bf16.msra.mxu2 %v2715_v56  ;;  %v2649_v41 = vmul.f32 %v2585_v30, %v6664_v3  ;;  %v2651_v29 = vmul.f32 %v2585_v30, %v6665_v35  ;;  %v3777_v12 = vsel %vm5993_vm15, 1.0, %v6544_v43  ;;  %v3778_v52 = vsel %vm6000_vm1, 1.0, %v6544_v43  ;;  %v1385_v30 = vpop.f32.mrf.mxu3 }
 0x209   : > { %2796 = vmatpush.bf16.msra.mxu3 %v2731_v24  ;;  %v2680_v5 = vmul.f32 %v2600_v0, %v6662_v60  ;;  %v2682_v9 = vmul.f32 %v2600_v0, %v6663_v17  ;;  %v2681_v20 = vmul.f32 %v2601_v19, %v6664_v3  ;;  %v2683_v32 = vmul.f32 %v2601_v19, %v6665_v35  ;;  %v3881_v24 = vld [vmem:[%s4048_s30 + $0x18] sm:$0xff]  ;;  %s3898_s30 = scalar_lea.hbm %s3897_s29, 16 }
 0x20a   : > { %v2713_v44 = vpack.c.bf16 %v2651_v29, %v2649_v41  ;;  %v2827_v36 = vperm.slane %v2446_v2, 7  ;;  %v2828_v55 = vperm.slane %v2447_v27, 7  ;;  %v2833_v48 = vperm.slane %v5821_v22, 7  ;;  %p3899_p12 = scmp.ne.s32.totalorder %s3897_s29, %s3898_s30  ;;  %p3904_p2 = scmp.lt.s32.totalorder %s3902_s6, %s3898_s30 }
 0x20b   : > { %2758 = vmatpush.bf16.msra.mxu0 %v2712_v59  ;;  %v2728_v60 = vpack.c.bf16 %v2682_v9, %v2680_v5  ;;  %v2729_v21 = vpack.c.bf16 %v2683_v32, %v2681_v20  ;;  %v2834_v17 = vperm.slane %v5831_v63, 7  ;;  %v2847_v3 = vperm.slane %v5817_v10, 7  ;;  %v234_v10 = vld [vmem:[%s4840_s7 + $0x30] sm:$0xff]  ;;  %v1361_v51 = vpop.f32.mrf.mxu1 }
 0x20c   : > { %2784 = vmatpush.bf16.msra.mxu2 %v2713_v44  ;;  %v2829_v35 = vmul.f32 %v3777_v12, %v2827_v36  ;;  %v2830_v13 = vmul.f32 %v3778_v52, %v2828_v55  ;;  %vm2835_vm4 = vcmp.eq.f32.partialorder %v4106_v57, %v2833_v48  ;;  %v2848_v2 = vperm.slane %v5824_v46, 7  ;;  %p3900_p13 = pnand %p3899_p12, %p4025_p4  ;;  %p3905_p3 = por %p3904_p2, %p3903_p1 }
 0x20d   : > { %2771 = vmatpush.bf16.msra.mxu1 %v2728_v60  ;;  %2797 = vmatpush.bf16.msra.mxu3 %v2729_v21  ;;  %vm2836_vm5 = vcmp.eq.f32.partialorder %v4106_v57, %v2834_v17  ;;  %v3781_v22 = vsel %vm2835_vm4, 1.0, %v6544_v43  ;;  %vm2818_vm0 = vcmp.eq.f32.partialorder %v4113_v61, %v2814_v53  ;;  %v3779_v46 = vsel %vm2817_vm13, 1.0, %v6544_v43 }
 0x20e   : > { %v3782_v63 = vsel %vm2836_vm5, 1.0, %v6544_v43  ;;  %v2849_v27 = vmul.f32 %v3781_v22, %v2847_v3  ;;  %v3780_v38 = vsel %vm2818_vm0, 1.0, %v6544_v43  ;;  %v2831_v25 = vmul.f32 %v3779_v46, %v2827_v36  ;;  %p3901_p0 = pneg %p3900_p13 }
 0x20f   : > { %v2850_v28 = vmul.f32 %v3782_v63, %v2848_v2  ;;  %v2832_v45 = vmul.f32 %v3780_v38, %v2828_v55  ;;  %vm2837_vm2 = vcmp.eq.f32.partialorder %v4113_v61, %v2833_v48  ;;  %vm2838_vm3 = vcmp.eq.f32.partialorder %v4113_v61, %v2834_v17  ;;  %v1374_v38 = vpop.f32.mrf.mxu2 }
 0x210   : > { %v6059_v42 = vadd.f32 %v2849_v27, %v2829_v35  ;;  %v3783_v4 = vsel %vm2837_vm2, 1.0, %v6544_v43  ;;  %v2745_v40 = vunpack.c.l.b16 %v234_v10  ;;  %v3784_v23 = vsel %vm2838_vm3, 1.0, %v6544_v43  ;;  %p3906_p5 = pnand %p3905_p3, %p3901_p0 }
 0x211   : > { %v2854_v53 = vadd.f32 %v2850_v28, %v2830_v13  ;;  %v2851_v18 = vmul.f32 %v3783_v4, %v2847_v3  ;;  %v2746_v26 = vunpack.c.h.b16 %v234_v10  ;;  %v2852_v49 = vmul.f32 %v3784_v23, %v2848_v2  ;;  %v1387_v28 = vpop.f32.mrf.mxu3 }
 0x212   : > { %v2747_v11 = vpack.c.b16 %v2745_v40, %v2745_v40  ;;  %v1360_v15 = vadd.f32 %v1359_v8, %v1346_v39  ;;  %v6066_v37 = vadd.f32 %v3880_v58, %v5649_v50  ;;  %v6074_v59 = vadd.f32 %v3881_v24, %v5683_v62 }
 0x213   : > { %v6068_v16 = vrot.slane %v2854_v53, 7  ;;  %v6070_v34 = vadd.f32 %v2851_v18, %v2831_v25  ;;  %v2748_v56 = vpack.c.b16 %v2746_v26, %v2746_v26  ;;  %v2856_v0 = vadd.f32 %v2852_v49, %v2832_v45 }
 0x214   : > { %2759 = vmatmul.bf16.vlgmr.msra.gmra.mxu0 %v2747_v11  ;;  %2785 = vmatmul.bf16.vlgmr.msra.gmra.mxu2 %v2747_v11  ;;  %v6077_v19 = vadd.f32 %v1360_v15, %v5957_v33  ;;  %v1386_v50 = vadd.f32 %v1385_v30, %v1372_v14  ;;  %v6080_v41 = vfloor.f32 %v6066_v37  ;;  %v6092_v33 = vfloor.f32 %v6074_v59 }
 0x215   : > { %v2926_v29 = vsel %vm434_vm14, %v6068_v16, %v6059_v42  ;;  %2772 = vmatmul.bf16.vlgmr.msra.gmra.mxu1 %v2748_v56  ;;  %2798 = vmatmul.bf16.vlgmr.msra.gmra.mxu3 %v2748_v56  ;;  %v2924_v62 = vsel %vm431_vm6, %v6059_v42, %v6068_v16  ;;  %v2922_v12 = vsel %vm428_vm7, %v6059_v42, %v6068_v16  ;;  %v6094_v5 = vrot.slane %v2856_v0, 7 }
 0x216   : > { %v2927_v52 = vrot.slane %v2926_v29, 7  ;;  %v2925_v9 = vrot.slane %v2924_v62, 6  ;;  %v2923_v20 = vrot.slane %v2922_v12, 5  ;;  %v6099_v32 = vsel %vm425_vm8, %v6059_v42, %v6068_v16 }
 0x217   : > { %v6104_v44 = vsel %vm422_vm9, %v6059_v42, %v6068_v16  ;;  %v6107_v36 = vadd.f32 %v1386_v50, %v5965_v1  ;;  %v6112_v55 = vsel %vm419_vm10, %v6059_v42, %v6068_v16  ;;  %v2941_v39 = vsel %vm434_vm14, %v6094_v5, %v6070_v34 }
 0x218   : > { %v2957_v48 = vperm.slane %v2927_v52, 0  ;;  %v2958_v8 = vperm.slane %v2927_v52, 1  ;;  %v2955_v60 = vperm.slane %v2925_v9, 0  ;;  %v2942_v21 = vrot.slane %v2941_v39, 7 }
 0x219   : > { %v2939_v17 = vsel %vm431_vm6, %v6070_v34, %v6094_v5  ;;  %v2956_v3 = vperm.slane %v2925_v9, 1  ;;  %v2953_v1 = vperm.slane %v2923_v20, 0  ;;  %v2937_v12 = vsel %vm428_vm7, %v6070_v34, %v6094_v5 }
 0x21a   : > { %v3035_v35 = vmul.f32 %v2957_v48, %v5663_v7  ;;  %v3037_v13 = vmul.f32 %v2957_v48, %v5866_v54  ;;  %v3036_v2 = vmul.f32 %v2958_v8, %v5862_v47  ;;  %v3038_v22 = vmul.f32 %v2958_v8, %v5882_v6 }
 0x21b   : > { %v2973_v10 = vperm.slane %v2942_v21, 0  ;;  %v2974_v63 = vperm.slane %v2942_v21, 1  ;;  %v3031_v27 = vmul.f32 %v2955_v60, %v5663_v7  ;;  %v3033_v46 = vmul.f32 %v2955_v60, %v5866_v54 }
 0x21c   : > { %v3085_v25 = vpack.c.bf16 %v3037_v13, %v3035_v35  ;;  %v3086_v45 = vpack.c.bf16 %v3038_v22, %v3036_v2  ;;  %v2940_v4 = vrot.slane %v2939_v17, 6  ;;  %v3032_v40 = vmul.f32 %v2956_v3, %v5862_v47 }
 0x21d   : > { %v3067_v53 = vmul.f32 %v2973_v10, %v5663_v7  ;;  %v3069_v23 = vmul.f32 %v2973_v10, %v5866_v54  ;;  %v3068_v18 = vmul.f32 %v2974_v63, %v5862_v47  ;;  %v3070_v26 = vmul.f32 %v2974_v63, %v5882_v6 }
 0x21e   : > { %3110 = vmatpush.bf16.msrb.mxu0 %v3085_v25  ;;  %3136 = vmatpush.bf16.msrb.mxu2 %v3086_v45  ;;  %v3083_v49 = vpack.c.bf16 %v3033_v46, %v3031_v27  ;;  %v2971_v11 = vperm.slane %v2940_v4, 0  ;;  %v3034_v15 = vmul.f32 %v2956_v3, %v5882_v6  ;;  %v2972_v58 = vperm.slane %v2940_v4, 1 }
 0x21f   : > { %v3101_v31 = vpack.c.bf16 %v3069_v23, %v3067_v53  ;;  %v3102_v51 = vpack.c.bf16 %v3070_v26, %v3068_v18  ;;  %v3027_v56 = vmul.f32 %v2953_v1, %v5663_v7  ;;  %v3029_v14 = vmul.f32 %v2953_v1, %v5866_v54 }
 0x220   : > { %v3063_v30 = vmul.f32 %v2971_v11, %v5663_v7  ;;  %v3065_v24 = vmul.f32 %v2971_v11, %v5866_v54  ;;  %v3084_v0 = vpack.c.bf16 %v3034_v15, %v3032_v40  ;;  %v3064_v50 = vmul.f32 %v2972_v58, %v5862_v47 }
 0x221   : > { %3123 = vmatpush.bf16.msrb.mxu1 %v3101_v31  ;;  %3149 = vmatpush.bf16.msrb.mxu3 %v3102_v51  ;;  %v3066_v29 = vmul.f32 %v2972_v58, %v5882_v6  ;;  %v3081_v62 = vpack.c.bf16 %v3029_v14, %v3027_v56  ;;  %v2954_v52 = vperm.slane %v2923_v20, 1  ;;  %v2938_v48 = vrot.slane %v2937_v12, 5 }
 0x222   : > { %3111 = vmatpush.bf16.msrb.mxu0 %v3083_v49  ;;  %v3099_v9 = vpack.c.bf16 %v3065_v24, %v3063_v30  ;;  %3137 = vmatpush.bf16.msrb.mxu2 %v3084_v0  ;;  %v2921_v39 = vrot.slane %v6099_v32, 4  ;;  %v2935_v8 = vsel %vm425_vm8, %v6070_v34, %v6094_v5  ;;  %v2919_v32 = vrot.slane %v6104_v44, 3 }
 0x223   : > { %v3100_v60 = vpack.c.bf16 %v3066_v29, %v3064_v50  ;;  %v3028_v21 = vmul.f32 %v2954_v52, %v5862_v47  ;;  %v3030_v17 = vmul.f32 %v2954_v52, %v5882_v6  ;;  %v2936_v3 = vrot.slane %v2935_v8, 4 }
 0x224   : > { %v2969_v1 = vperm.slane %v2938_v48, 0  ;;  %v2970_v35 = vperm.slane %v2938_v48, 1  ;;  %v2951_v13 = vperm.slane %v2921_v39, 0  ;;  %v2952_v20 = vperm.slane %v2921_v39, 1 }
 0x225   : > { %3124 = vmatpush.bf16.msrb.mxu1 %v3099_v9  ;;  %3150 = vmatpush.bf16.msrb.mxu3 %v3100_v60  ;;  %v3082_v2 = vpack.c.bf16 %v3030_v17, %v3028_v21  ;;  %v2967_v22 = vperm.slane %v2936_v3, 0  ;;  %v2968_v10 = vperm.slane %v2936_v3, 1  ;;  %v2949_v58 = vperm.slane %v2919_v32, 0 }
 0x226   : > { %3112 = vmatpush.bf16.msrb.mxu0 %v3081_v62  ;;  %v3059_v63 = vmul.f32 %v2969_v1, %v5663_v7  ;;  %v3061_v27 = vmul.f32 %v2969_v1, %v5866_v54  ;;  %v3060_v46 = vmul.f32 %v2970_v35, %v5862_v47  ;;  %v3062_v38 = vmul.f32 %v2970_v35, %v5882_v6 }
 0x227   : > { %3138 = vmatpush.bf16.msrb.mxu2 %v3082_v2  ;;  %v3023_v28 = vmul.f32 %v2951_v13, %v5663_v7  ;;  %v3025_v25 = vmul.f32 %v2951_v13, %v5866_v54  ;;  %v3055_v45 = vmul.f32 %v2967_v22, %v5663_v7  ;;  %v3057_v4 = vmul.f32 %v2967_v22, %v5866_v54 }
 0x228   : > { %v3097_v40 = vpack.c.bf16 %v3061_v27, %v3059_v63  ;;  %v3098_v44 = vpack.c.bf16 %v3062_v38, %v3060_v46  ;;  %v3024_v53 = vmul.f32 %v2952_v20, %v5862_v47  ;;  %v3026_v23 = vmul.f32 %v2952_v20, %v5882_v6 }
 0x229   : > { %v3079_v18 = vpack.c.bf16 %v3025_v25, %v3023_v28  ;;  %v3095_v26 = vpack.c.bf16 %v3057_v4, %v3055_v45  ;;  %v3056_v49 = vmul.f32 %v2968_v10, %v5862_v47  ;;  %v3058_v11 = vmul.f32 %v2968_v10, %v5882_v6 }
 0x22a   : > { %3125 = vmatpush.bf16.msrb.mxu1 %v3097_v40  ;;  %3151 = vmatpush.bf16.msrb.mxu3 %v3098_v44  ;;  %v3080_v15 = vpack.c.bf16 %v3026_v23, %v3024_v53  ;;  %v2933_v31 = vsel %vm422_vm9, %v6070_v34, %v6094_v5  ;;  %v2950_v51 = vperm.slane %v2919_v32, 1  ;;  %v2917_v30 = vrot.slane %v6112_v55, 2 }
 0x22b   : > { %3113 = vmatpush.bf16.msrb.mxu0 %v3079_v18  ;;  %v3096_v56 = vpack.c.bf16 %v3058_v11, %v3056_v49  ;;  %v2934_v14 = vrot.slane %v2933_v31, 3  ;;  %v2931_v24 = vsel %vm419_vm10, %v6070_v34, %v6094_v5  ;;  %v3019_v0 = vmul.f32 %v2949_v58, %v5663_v7 }
 0x22c   : > { %3139 = vmatpush.bf16.msrb.mxu2 %v3080_v15  ;;  %v3021_v50 = vmul.f32 %v2949_v58, %v5866_v54  ;;  %v3020_v29 = vmul.f32 %v2950_v51, %v5862_v47  ;;  %v3022_v62 = vmul.f32 %v2950_v51, %v5882_v6  ;;  %v2947_v9 = vperm.slane %v2917_v30, 0 }
 0x22d   : > { %v2965_v12 = vperm.slane %v2934_v14, 0  ;;  %v2966_v52 = vperm.slane %v2934_v14, 1  ;;  %v2932_v48 = vrot.slane %v2931_v24, 2  ;;  %v2948_v8 = vperm.slane %v2917_v30, 1 }
 0x22e   : > { %3126 = vmatpush.bf16.msrb.mxu1 %v3095_v26  ;;  %3152 = vmatpush.bf16.msrb.mxu3 %v3096_v56  ;;  %v3077_v55 = vpack.c.bf16 %v3021_v50, %v3019_v0  ;;  %v3078_v39 = vpack.c.bf16 %v3022_v62, %v3020_v29  ;;  %v2914_v60 = vsel %vm416_vm11, %v6059_v42, %v6068_v16  ;;  %v3180_v40 = vperm.slane %v6080_v41, 0 }
 0x22f   : > { %v3051_v21 = vmul.f32 %v2965_v12, %v5663_v7  ;;  %v3053_v17 = vmul.f32 %v2965_v12, %v5866_v54  ;;  %v3052_v3 = vmul.f32 %v2966_v52, %v5862_v47  ;;  %v3054_v1 = vmul.f32 %v2966_v52, %v5882_v6 }
 0x230   : > { %3114 = vmatpush.bf16.msrb.mxu0 %v3077_v55  ;;  %3140 = vmatpush.bf16.msrb.mxu2 %v3078_v39  ;;  %v3015_v35 = vmul.f32 %v2947_v9, %v5663_v7  ;;  %v3017_v13 = vmul.f32 %v2947_v9, %v5866_v54  ;;  %v2963_v20 = vperm.slane %v2932_v48, 0  ;;  %v3016_v2 = vmul.f32 %v2948_v8, %v5862_v47 }
 0x231   : > { %v3093_v22 = vpack.c.bf16 %v3053_v17, %v3051_v21  ;;  %v3094_v10 = vpack.c.bf16 %v3054_v1, %v3052_v3  ;;  %v3018_v32 = vmul.f32 %v2948_v8, %v5882_v6  ;;  %v2964_v63 = vperm.slane %v2932_v48, 1 }
 0x232   : > { %v3075_v27 = vpack.c.bf16 %v3017_v13, %v3015_v35  ;;  %v3047_v46 = vmul.f32 %v2963_v20, %v5663_v7  ;;  %v3049_v38 = vmul.f32 %v2963_v20, %v5866_v54  ;;  %v2915_v28 = vrot.slane %v2914_v60, 1 }
 0x233   : > { %3127 = vmatpush.bf16.msrb.mxu1 %v3093_v22  ;;  %3153 = vmatpush.bf16.msrb.mxu3 %v3094_v10  ;;  %v3076_v25 = vpack.c.bf16 %v3018_v32, %v3016_v2  ;;  %v3048_v45 = vmul.f32 %v2964_v63, %v5862_v47  ;;  %v3050_v4 = vmul.f32 %v2964_v63, %v5882_v6  ;;  %v3181_v55 = vperm.slane %v6092_v33, 0  ;;  %v1703_v32 = vpop.f32.mrf.mxu0  ;;  %v1716_v63 = vpop.f32.mrf.mxu1 }
 0x234   : > { %3115 = vmatpush.bf16.msrb.mxu0 %v3075_v27  ;;  %v3091_v44 = vpack.c.bf16 %v3049_v38, %v3047_v46  ;;  %v2945_v53 = vperm.slane %v2915_v28, 0  ;;  %v2929_v23 = vsel %vm416_vm11, %v6070_v34, %v6094_v5  ;;  %v2946_v18 = vperm.slane %v2915_v28, 1 }
 0x235   : > { %3141 = vmatpush.bf16.msrb.mxu2 %v3076_v25  ;;  %v3092_v26 = vpack.c.bf16 %v3050_v4, %v3048_v45  ;;  %v2930_v49 = vrot.slane %v2929_v23, 1  ;;  %v2913_v11 = vsel %vm414_vm12, %v6059_v42, %v6068_v16  ;;  %v2928_v15 = vsel %vm414_vm12, %v6070_v34, %v6094_v5 }
 0x236   : > { %v3011_v58 = vmul.f32 %v2945_v53, %v5663_v7  ;;  %v3013_v31 = vmul.f32 %v2945_v53, %v5866_v54  ;;  %v3012_v51 = vmul.f32 %v2946_v18, %v5862_v47  ;;  %v3014_v56 = vmul.f32 %v2946_v18, %v5882_v6 }
 0x237   : > { %3128 = vmatpush.bf16.msrb.mxu1 %v3091_v44  ;;  %3154 = vmatpush.bf16.msrb.mxu3 %v3092_v26  ;;  %v2961_v14 = vperm.slane %v2930_v49, 0  ;;  %v2962_v30 = vperm.slane %v2930_v49, 1  ;;  %v2943_v24 = vperm.slane %v2913_v11, 0  ;;  %v2959_v0 = vperm.slane %v2928_v15, 0  ;;  %v235_v44 = vld [vmem:[%s4840_s7 + $0x38] sm:$0xff] }
 0x238   : > { %v3073_v50 = vpack.c.bf16 %v3013_v31, %v3011_v58  ;;  %v3074_v42 = vpack.c.bf16 %v3014_v56, %v3012_v51  ;;  %v2944_v16 = vperm.slane %v2913_v11, 1  ;;  %v2960_v29 = vperm.slane %v2928_v15, 1 }
 0x239   : > { %v3043_v34 = vmul.f32 %v2961_v14, %v5663_v7  ;;  %v3045_v5 = vmul.f32 %v2961_v14, %v5866_v54  ;;  %v3044_v62 = vmul.f32 %v2962_v30, %v5862_v47  ;;  %v3046_v12 = vmul.f32 %v2962_v30, %v5882_v6 }
 0x23a   : > { %3116 = vmatpush.bf16.msrb.mxu0 %v3073_v50  ;;  %3142 = vmatpush.bf16.msrb.mxu2 %v3074_v42  ;;  %v3007_v52 = vmul.f32 %v2943_v24, %v5663_v7  ;;  %v3009_v9 = vmul.f32 %v2943_v24, %v5866_v54  ;;  %v3039_v48 = vmul.f32 %v2959_v0, %v5663_v7  ;;  %v3104_v15 = vunpack.c.l.b16 %v235_v44 }
 0x23b   : > { %v3089_v39 = vpack.c.bf16 %v3045_v5, %v3043_v34  ;;  %v3090_v8 = vpack.c.bf16 %v3046_v12, %v3044_v62  ;;  %v3041_v60 = vmul.f32 %v2959_v0, %v5866_v54  ;;  %v3008_v21 = vmul.f32 %v2944_v16, %v5862_v47  ;;  %v1718_v0 = vpop.f32.mrf.mxu1  ;;  %v1729_v5 = vpop.f32.mrf.mxu2 }
 0x23c   : > { %v3071_v17 = vpack.c.bf16 %v3009_v9, %v3007_v52  ;;  %v3010_v3 = vmul.f32 %v2944_v16, %v5882_v6  ;;  %v3040_v1 = vmul.f32 %v2960_v29, %v5862_v47  ;;  %v3042_v35 = vmul.f32 %v2960_v29, %v5882_v6  ;;  %v1742_v62 = vpop.f32.mrf.mxu3 }
 0x23d   : > { %3129 = vmatpush.bf16.msrb.mxu1 %v3089_v39  ;;  %3155 = vmatpush.bf16.msrb.mxu3 %v3090_v8  ;;  %v3087_v13 = vpack.c.bf16 %v3041_v60, %v3039_v48  ;;  %v3172_v7 = vsub.f32 %v6066_v37, %v6080_v41  ;;  %v3173_v20 = vsub.f32 %v6074_v59, %v6092_v33  ;;  %v3200_v54 = vadd.f32 1.0, %v6080_v41 }
 0x23e   : > { %3117 = vmatpush.bf16.msrb.mxu0 %v3071_v17  ;;  %v3072_v2 = vpack.c.bf16 %v3010_v3, %v3008_v21  ;;  %v3088_v22 = vpack.c.bf16 %v3042_v35, %v3040_v1  ;;  %vm3182_vm15 = vcmp.eq.f32.partialorder %v4106_v57, %v3180_v40  ;;  %vm3183_vm1 = vcmp.eq.f32.partialorder %v4106_v57, %v3181_v55 }
 0x23f   : > { %v3176_v47 = vsub.f32 1.0, %v3172_v7  ;;  %v3177_v6 = vsub.f32 1.0, %v3173_v20  ;;  %v3793_v10 = vsel %vm3182_vm15, 1.0, %v6544_v43  ;;  %v3794_v37 = vsel %vm3183_vm1, 1.0, %v6544_v43 }
 0x240   : > { %3143 = vmatpush.bf16.msrb.mxu2 %v3072_v2  ;;  %v3201_v59 = vadd.f32 1.0, %v6092_v33  ;;  %v3202_v27 = vperm.slane %v3200_v54, 0  ;;  %v3216_v46 = vperm.slane %v3172_v7, 0  ;;  %v3217_v38 = vperm.slane %v3173_v20, 0 }
 0x241   : > { %3130 = vmatpush.bf16.msrb.mxu1 %v3087_v13  ;;  %3156 = vmatpush.bf16.msrb.mxu3 %v3088_v22  ;;  %v3194_v28 = vperm.slane %v3176_v47, 0  ;;  %v3195_v25 = vperm.slane %v3177_v6, 0  ;;  %vm3184_vm4 = vcmp.eq.f32.partialorder %v4113_v61, %v3180_v40  ;;  %vm3185_vm5 = vcmp.eq.f32.partialorder %v4113_v61, %v3181_v55 }
 0x242   : > { %v3203_v45 = vperm.slane %v3201_v59, 0  ;;  %vm3204_vm13 = vcmp.eq.f32.partialorder %v4106_v57, %v3202_v27  ;;  %v3795_v4 = vsel %vm3184_vm4, 1.0, %v6544_v43  ;;  %v3796_v33 = vsel %vm3185_vm5, 1.0, %v6544_v43  ;;  %v6672_v59 = vld [vmem:[#allocation10_spill] sm:$0xff] }
 0x243   : > { %v3196_v53 = vmul.f32 %v3793_v10, %v3194_v28  ;;  %v3197_v23 = vmul.f32 %v3794_v37, %v3195_v25  ;;  %v3797_v18 = vsel %vm3204_vm13, 1.0, %v6544_v43  ;;  %v3198_v26 = vmul.f32 %v3795_v4, %v3194_v28  ;;  %v6670_v10 = vld [vmem:[#allocation23_spill] sm:$0xff] }
 0x244   : > { %vm3205_vm0 = vcmp.eq.f32.partialorder %v4106_v57, %v3203_v45  ;;  %v3218_v41 = vmul.f32 %v3797_v18, %v3216_v46  ;;  %v3199_v49 = vmul.f32 %v3796_v33, %v3195_v25  ;;  %vm3206_vm2 = vcmp.eq.f32.partialorder %v4113_v61, %v3202_v27  ;;  %v1705_v57 = vpop.f32.mrf.mxu0  ;;  %v1731_v33 = vpop.f32.mrf.mxu2 }
 0x245   : > { %v3798_v40 = vsel %vm3205_vm0, 1.0, %v6544_v43  ;;  %vm3207_vm3 = vcmp.eq.f32.partialorder %v4113_v61, %v3203_v45  ;;  %v3799_v11 = vsel %vm3206_vm2, 1.0, %v6544_v43  ;;  %v3106_v14 = vpack.c.b16 %v3104_v15, %v3104_v15 }
 0x246   : > { %v3219_v58 = vmul.f32 %v3798_v40, %v3217_v38  ;;  %v3800_v31 = vsel %vm3207_vm3, 1.0, %v6544_v43  ;;  %v3220_v51 = vmul.f32 %v3799_v11, %v3216_v46  ;;  %v3105_v30 = vunpack.c.h.b16 %v235_v44  ;;  %v6673_v46 = vld [vmem:[#allocation11_spill] sm:$0xff]  ;;  %v1744_v44 = vpop.f32.mrf.mxu3 }
 0x247   : > { %v3221_v56 = vmul.f32 %v3800_v31, %v3217_v38  ;;  %v1717_v24 = vadd.f32 %v1716_v63, %v1703_v32  ;;  %v6240_v50 = vadd.f32 %v3218_v41, %v3196_v53  ;;  %3118 = vmatmul.bf16.vlgmr.msrb.gmra.mxu0 %v3106_v14  ;;  %3144 = vmatmul.bf16.vlgmr.msrb.gmra.mxu2 %v3106_v14  ;;  %v6671_v32 = vld [vmem:[#allocation24_spill] sm:$0xff] }
 0x248   : > { %v3223_v42 = vadd.f32 %v3219_v58, %v3197_v23  ;;  %v6242_v16 = vadd.f32 %v3220_v51, %v3198_v26  ;;  %v3107_v61 = vpack.c.b16 %v3105_v30, %v3105_v30  ;;  %v6251_v52 = vadd.f32 %v1742_v62, %v1729_v5 }
 0x249   : > { %v3225_v29 = vadd.f32 %v3221_v56, %v3199_v49  ;;  %v6245_v34 = vadd.f32 %v1717_v24, %v6077_v19 }
 0x24a   : > { %v6247_v43 = vrot.slane %v3223_v42, 7  ;;  %3131 = vmatmul.bf16.vlgmr.msrb.gmra.mxu1 %v3107_v61  ;;  %3157 = vmatmul.bf16.vlgmr.msrb.gmra.mxu3 %v3107_v61 }
 0x24b   : > { %v6249_v12 = vrot.slane %v3225_v29, 7 }
 0x24c   : > { %v3295_v9 = vsel %vm434_vm14, %v6247_v43, %v6240_v50  ;;  %v3293_v48 = vsel %vm431_vm6, %v6240_v50, %v6247_v43  ;;  %v3291_v19 = vsel %vm428_vm7, %v6240_v50, %v6247_v43  ;;  %v6265_v55 = vsel %vm425_vm8, %v6240_v50, %v6247_v43 }
 0x24d   : > { %v3296_v39 = vrot.slane %v3295_v9, 7  ;;  %v3310_v8 = vsel %vm434_vm14, %v6249_v12, %v6242_v16  ;;  %v3294_v60 = vrot.slane %v3293_v48, 6  ;;  %v3308_v21 = vsel %vm431_vm6, %v6242_v16, %v6249_v12 }
 0x24e   : > { %v3311_v17 = vrot.slane %v3310_v8, 7  ;;  %v3309_v3 = vrot.slane %v3308_v21, 6  ;;  %v3292_v1 = vrot.slane %v3291_v19, 5  ;;  %v3306_v35 = vsel %vm428_vm7, %v6242_v16, %v6249_v12 }
 0x24f   : > { %v3326_v13 = vperm.slane %v3296_v39, 0  ;;  %v3327_v7 = vperm.slane %v3296_v39, 1  ;;  %v3324_v20 = vperm.slane %v3294_v60, 0  ;;  %v3325_v54 = vperm.slane %v3294_v60, 1 }
 0x250   : > { %v3342_v2 = vperm.slane %v3311_v17, 0  ;;  %v3343_v22 = vperm.slane %v3311_v17, 1  ;;  %v3340_v47 = vperm.slane %v3309_v3, 0  ;;  %v3341_v6 = vperm.slane %v3309_v3, 1  ;;  %v6301_v3 = vld [vmem:[%s4840_s7 + $0x40] sm:$0xff] }
 0x251   : > { %v3404_v37 = vmul.f32 %v3326_v13, %v6670_v10  ;;  %v3406_v63 = vmul.f32 %v3326_v13, %v6671_v32  ;;  %v3405_v27 = vmul.f32 %v3327_v7, %v6672_v59  ;;  %v3407_v38 = vmul.f32 %v3327_v7, %v6673_v46  ;;  %v6307_v7 = vpop.f32.mrf.mxu0 }
 0x252   : > { %v3436_v28 = vmul.f32 %v3342_v2, %v6670_v10  ;;  %v3438_v25 = vmul.f32 %v3342_v2, %v6671_v32  ;;  %v3437_v45 = vmul.f32 %v3343_v22, %v6672_v59  ;;  %v3439_v4 = vmul.f32 %v3343_v22, %v6673_v46 }
 0x253   : > { %v3454_v53 = vpack.c.bf16 %v3406_v63, %v3404_v37  ;;  %v3455_v23 = vpack.c.bf16 %v3407_v38, %v3405_v27  ;;  %v3400_v18 = vmul.f32 %v3324_v20, %v6670_v10  ;;  %v3402_v26 = vmul.f32 %v3324_v20, %v6671_v32  ;;  %v6309_v20 = vpop.f32.mrf.mxu1  ;;  %v6315_v37 = vpop.f32.mrf.mxu3 }
 0x254   : > { %v3470_v41 = vpack.c.bf16 %v3438_v25, %v3436_v28  ;;  %v3471_v49 = vpack.c.bf16 %v3439_v4, %v3437_v45  ;;  %v3432_v40 = vmul.f32 %v3340_v47, %v6670_v10  ;;  %v3434_v11 = vmul.f32 %v3340_v47, %v6671_v32 }
 0x255   : > { %3479 = vmatpush.bf16.msra.mxu0 %v3454_v53  ;;  %3505 = vmatpush.bf16.msra.mxu2 %v3455_v23  ;;  %v3452_v15 = vpack.c.bf16 %v3402_v26, %v3400_v18  ;;  %v3401_v58 = vmul.f32 %v3325_v54, %v6672_v59  ;;  %v3403_v31 = vmul.f32 %v3325_v54, %v6673_v46  ;;  %v3322_v51 = vperm.slane %v3292_v1, 0 }
 0x256   : > { %3492 = vmatpush.bf16.msra.mxu1 %v3470_v41  ;;  %3518 = vmatpush.bf16.msra.mxu3 %v3471_v49  ;;  %v3468_v56 = vpack.c.bf16 %v3434_v11, %v3432_v40  ;;  %v3433_v14 = vmul.f32 %v3341_v6, %v6672_v59  ;;  %v3435_v30 = vmul.f32 %v3341_v6, %v6673_v46  ;;  %v3307_v24 = vrot.slane %v3306_v35, 5  ;;  %v6313_v6 = vpop.f32.mrf.mxu2 }
 0x257   : > { %v3453_v57 = vpack.c.bf16 %v3403_v31, %v3401_v58  ;;  %v3396_v0 = vmul.f32 %v3322_v51, %v6670_v10  ;;  %v3398_v42 = vmul.f32 %v3322_v51, %v6671_v32  ;;  %v3323_v29 = vperm.slane %v3292_v1, 1 }
 0x258   : > { %v3469_v61 = vpack.c.bf16 %v3435_v30, %v3433_v14  ;;  %v3338_v5 = vperm.slane %v3307_v24, 0  ;;  %v3339_v62 = vperm.slane %v3307_v24, 1  ;;  %v3290_v9 = vrot.slane %v6265_v55, 4 }
 0x259   : > { %3480 = vmatpush.bf16.msra.mxu0 %v3452_v15  ;;  %3506 = vmatpush.bf16.msra.mxu2 %v3453_v57  ;;  %v3450_v48 = vpack.c.bf16 %v3398_v42, %v3396_v0  ;;  %v3397_v19 = vmul.f32 %v3323_v29, %v6672_v59  ;;  %v3399_v39 = vmul.f32 %v3323_v29, %v6673_v46  ;;  %v3473_v28 = vunpack.c.l.b16 %v6301_v3  ;;  %v2050_v0 = vpop.f32.mrf.mxu0 }
 0x25a   : > { %3493 = vmatpush.bf16.msra.mxu1 %v3468_v56  ;;  %3519 = vmatpush.bf16.msra.mxu3 %v3469_v61  ;;  %v3428_v8 = vmul.f32 %v3338_v5, %v6670_v10  ;;  %v3430_v60 = vmul.f32 %v3338_v5, %v6671_v32  ;;  %v3429_v21 = vmul.f32 %v3339_v62, %v6672_v59  ;;  %v3320_v17 = vperm.slane %v3290_v9, 0 }
 0x25b   : > { %v3451_v1 = vpack.c.bf16 %v3399_v39, %v3397_v19  ;;  %v3431_v55 = vmul.f32 %v3339_v62, %v6673_v46  ;;  %v3304_v35 = vsel %vm425_vm8, %v6242_v16, %v6249_v12  ;;  %v3321_v13 = vperm.slane %v3290_v9, 1  ;;  %v2063_v42 = vpop.f32.mrf.mxu1 }
 0x25c   : > { %v3466_v54 = vpack.c.bf16 %v3430_v60, %v3428_v8  ;;  %v3392_v2 = vmul.f32 %v3320_v17, %v6670_v10  ;;  %v3394_v22 = vmul.f32 %v3320_v17, %v6671_v32  ;;  %v3305_v47 = vrot.slane %v3304_v35, 4 }
 0x25d   : > { %3481 = vmatpush.bf16.msra.mxu0 %v3450_v48  ;;  %3507 = vmatpush.bf16.msra.mxu2 %v3451_v1  ;;  %v3467_v63 = vpack.c.bf16 %v3431_v55, %v3429_v21  ;;  %v3393_v27 = vmul.f32 %v3321_v13, %v6672_v59  ;;  %v3395_v38 = vmul.f32 %v3321_v13, %v6673_v46  ;;  %v2089_v48 = vpop.f32.mrf.mxu3 }
 0x25e   : > { %3494 = vmatpush.bf16.msra.mxu1 %v3466_v54  ;;  %v3448_v25 = vpack.c.bf16 %v3394_v22, %v3392_v2  ;;  %v3336_v45 = vperm.slane %v3305_v47, 0  ;;  %v3337_v4 = vperm.slane %v3305_v47, 1  ;;  %v3287_v33 = vsel %vm422_vm9, %v6240_v50, %v6247_v43  ;;  %v2076_v9 = vpop.f32.mrf.mxu2 }
 0x25f   : > { %3520 = vmatpush.bf16.msra.mxu3 %v3467_v63  ;;  %v3449_v44 = vpack.c.bf16 %v3395_v38, %v3393_v27  ;;  %v3288_v53 = vrot.slane %v3287_v33, 3  ;;  %v3302_v23 = vsel %vm422_vm9, %v6242_v16, %v6249_v12  ;;  %v6328_v18 = vadd.f32 %v6251_v52, %v6107_v36 }
 0x260   : > { %v3424_v26 = vmul.f32 %v3336_v45, %v6670_v10  ;;  %v3426_v41 = vmul.f32 %v3336_v45, %v6671_v32  ;;  %v3425_v49 = vmul.f32 %v3337_v4, %v6672_v59  ;;  %v3427_v40 = vmul.f32 %v3337_v4, %v6673_v46 }
 0x261   : > { %3482 = vmatpush.bf16.msra.mxu0 %v3448_v25  ;;  %3508 = vmatpush.bf16.msra.mxu2 %v3449_v44  ;;  %v3318_v11 = vperm.slane %v3288_v53, 0  ;;  %v3303_v15 = vrot.slane %v3302_v23, 3  ;;  %v3319_v58 = vperm.slane %v3288_v53, 1  ;;  %v3285_v31 = vsel %vm419_vm10, %v6240_v50, %v6247_v43 }
 0x262   : > { %v3464_v51 = vpack.c.bf16 %v3426_v41, %v3424_v26  ;;  %v3465_v36 = vpack.c.bf16 %v3427_v40, %v3425_v49  ;;  %v3286_v52 = vrot.slane %v3285_v31, 2  ;;  %v3300_v56 = vsel %vm419_vm10, %v6242_v16, %v6249_v12 }
 0x263   : > { %v3388_v14 = vmul.f32 %v3318_v11, %v6670_v10  ;;  %v3390_v30 = vmul.f32 %v3318_v11, %v6671_v32  ;;  %v3334_v24 = vperm.slane %v3303_v15, 0  ;;  %v3389_v57 = vmul.f32 %v3319_v58, %v6672_v59  ;;  %v2393_v11 = vpop.f32.mrf.mxu0 }
 0x264   : > { %3495 = vmatpush.bf16.msra.mxu1 %v3464_v51  ;;  %3521 = vmatpush.bf16.msra.mxu3 %v3465_v36  ;;  %v3391_v29 = vmul.f32 %v3319_v58, %v6673_v46  ;;  %v3335_v61 = vperm.slane %v3303_v15, 1  ;;  %v3316_v5 = vperm.slane %v3286_v52, 0  ;;  %v3301_v62 = vrot.slane %v3300_v56, 2  ;;  %v2406_v15 = vpop.f32.mrf.mxu1 }
 0x265   : > { %v3446_v19 = vpack.c.bf16 %v3390_v30, %v3388_v14  ;;  %v3420_v39 = vmul.f32 %v3334_v24, %v6670_v10  ;;  %v3422_v8 = vmul.f32 %v3334_v24, %v6671_v32  ;;  %v3317_v60 = vperm.slane %v3286_v52, 1  ;;  %v2432_v56 = vpop.f32.mrf.mxu3 }
 0x266   : > { %v3447_v21 = vpack.c.bf16 %v3391_v29, %v3389_v57  ;;  %v3421_v17 = vmul.f32 %v3335_v61, %v6672_v59  ;;  %v3423_v1 = vmul.f32 %v3335_v61, %v6673_v46  ;;  %v3384_v55 = vmul.f32 %v3316_v5, %v6670_v10  ;;  %v2419_v52 = vpop.f32.mrf.mxu2 }
 0x267   : > { %3483 = vmatpush.bf16.msra.mxu0 %v3446_v19  ;;  %v3462_v35 = vpack.c.bf16 %v3422_v8, %v3420_v39  ;;  %v3386_v13 = vmul.f32 %v3316_v5, %v6671_v32  ;;  %v3332_v54 = vperm.slane %v3301_v62, 0  ;;  %v3385_v2 = vmul.f32 %v3317_v60, %v6672_v59 }
 0x268   : > { %3509 = vmatpush.bf16.msra.mxu2 %v3447_v21  ;;  %v3463_v22 = vpack.c.bf16 %v3423_v1, %v3421_v17  ;;  %v3387_v47 = vmul.f32 %v3317_v60, %v6673_v46  ;;  %v3333_v63 = vperm.slane %v3301_v62, 1  ;;  %v3283_v27 = vsel %vm416_vm11, %v6240_v50, %v6247_v43 }
 0x269   : > { %3496 = vmatpush.bf16.msra.mxu1 %v3462_v35  ;;  %v3444_v38 = vpack.c.bf16 %v3386_v13, %v3384_v55  ;;  %v3416_v25 = vmul.f32 %v3332_v54, %v6670_v10  ;;  %v3418_v45 = vmul.f32 %v3332_v54, %v6671_v32  ;;  %v3284_v4 = vrot.slane %v3283_v27, 1 }
 0x26a   : > { %3522 = vmatpush.bf16.msra.mxu3 %v3463_v22  ;;  %v3445_v33 = vpack.c.bf16 %v3387_v47, %v3385_v2  ;;  %v3417_v44 = vmul.f32 %v3333_v63, %v6672_v59  ;;  %v3419_v53 = vmul.f32 %v3333_v63, %v6673_v46  ;;  %v3298_v23 = vsel %vm416_vm11, %v6242_v16, %v6249_v12 }
 0x26b   : > { %3484 = vmatpush.bf16.msra.mxu0 %v3444_v38  ;;  %v3460_v26 = vpack.c.bf16 %v3418_v45, %v3416_v25  ;;  %v3314_v41 = vperm.slane %v3284_v4, 0  ;;  %v3299_v49 = vrot.slane %v3298_v23, 1  ;;  %v3315_v40 = vperm.slane %v3284_v4, 1 }
 0x26c   : > { %3510 = vmatpush.bf16.msra.mxu2 %v3445_v33  ;;  %v3461_v58 = vpack.c.bf16 %v3419_v53, %v3417_v44  ;;  %v3282_v31 = vsel %vm414_vm12, %v6240_v50, %v6247_v43  ;;  %v3297_v51 = vsel %vm414_vm12, %v6242_v16, %v6249_v12  ;;  %v3474_v36 = vunpack.c.h.b16 %v6301_v3  ;;  %v2408_v22 = vpop.f32.mrf.mxu1 }
 0x26d   : > { %3497 = vmatpush.bf16.msra.mxu1 %v3460_v26  ;;  %v3380_v14 = vmul.f32 %v3314_v41, %v6670_v10  ;;  %v3382_v30 = vmul.f32 %v3314_v41, %v6671_v32  ;;  %v3330_v24 = vperm.slane %v3299_v49, 0  ;;  %v3381_v57 = vmul.f32 %v3315_v40, %v6672_v59  ;;  %v2434_v25 = vpop.f32.mrf.mxu3 }
 0x26e   : > { %3523 = vmatpush.bf16.msra.mxu3 %v3461_v58  ;;  %v3383_v0 = vmul.f32 %v3315_v40, %v6673_v46  ;;  %v3331_v50 = vperm.slane %v3299_v49, 1  ;;  %v3312_v43 = vperm.slane %v3282_v31, 0  ;;  %v3328_v42 = vperm.slane %v3297_v51, 0  ;;  %v2421_v38 = vpop.f32.mrf.mxu2 }
 0x26f   : > { %v3442_v29 = vpack.c.bf16 %v3382_v30, %v3380_v14  ;;  %v3412_v16 = vmul.f32 %v3330_v24, %v6670_v10  ;;  %v3414_v12 = vmul.f32 %v3330_v24, %v6671_v32  ;;  %v3313_v61 = vperm.slane %v3282_v31, 1 }
 0x270   : > { %v3443_v5 = vpack.c.bf16 %v3383_v0, %v3381_v57  ;;  %v3413_v62 = vmul.f32 %v3331_v50, %v6672_v59  ;;  %v3415_v9 = vmul.f32 %v3331_v50, %v6673_v46  ;;  %v3376_v48 = vmul.f32 %v3312_v43, %v6670_v10 }
 0x271   : > { %3485 = vmatpush.bf16.msra.mxu0 %v3442_v29  ;;  %v3458_v19 = vpack.c.bf16 %v3414_v12, %v3412_v16  ;;  %v3378_v39 = vmul.f32 %v3312_v43, %v6671_v32  ;;  %v3408_v8 = vmul.f32 %v3328_v42, %v6670_v10  ;;  %v3410_v60 = vmul.f32 %v3328_v42, %v6671_v32  ;;  %v3533_v10 = vld [vmem:[%s6436_s2] sm:$0xff]  ;;  %v2395_v32 = vpop.f32.mrf.mxu0 }
 0x272   : > { %3511 = vmatpush.bf16.msra.mxu2 %v3443_v5  ;;  %v3459_v21 = vpack.c.bf16 %v3415_v9, %v3413_v62  ;;  %v3377_v17 = vmul.f32 %v3313_v61, %v6672_v59  ;;  %v3379_v1 = vmul.f32 %v3313_v61, %v6673_v46  ;;  %v3329_v55 = vperm.slane %v3297_v51, 1 }
 0x273   : > { %3498 = vmatpush.bf16.msra.mxu1 %v3458_v19  ;;  %v3440_v35 = vpack.c.bf16 %v3378_v39, %v3376_v48  ;;  %v3456_v13 = vpack.c.bf16 %v3410_v60, %v3408_v8  ;;  %v3475_v54 = vpack.c.b16 %v3473_v28, %v3473_v28  ;;  %v2062_v2 = vadd.f32 %v6309_v20, %v6307_v7 }
 0x274   : > { %3524 = vmatpush.bf16.msra.mxu3 %v3459_v21  ;;  %v3441_v47 = vpack.c.bf16 %v3379_v1, %v3377_v17  ;;  %v3409_v63 = vmul.f32 %v3329_v55, %v6672_v59  ;;  %v3411_v27 = vmul.f32 %v3329_v55, %v6673_v46  ;;  %v3964_v28 = vmov 0  }
 0x275   : > { %3486 = vmatpush.bf16.msra.mxu0 %v3440_v35  ;;  %v2091_v3 = vadd.f32 %v2062_v2, %v6245_v34  ;;  %3875 = vset.pattern.permute.xlu0 %v3964_v28  ;;  %v2088_v7 = vadd.f32 %v6315_v37, %v6313_v6  ;;  %v2407_v20 = vadd.f32 %v2406_v15, %v2393_v11 }
 0x276   : > { %3512 = vmatpush.bf16.msra.mxu2 %v3441_v47  ;;  %v3457_v45 = vpack.c.bf16 %v3411_v27, %v3409_v63  ;;  %v3476_v4 = vpack.c.b16 %v3474_v36, %v3474_v36  ;;  %3536 = vperm.xlu0 %3875, %v3533_v10   ;;  %v2433_v33 = vadd.f32 %v2432_v56, %v2419_v52 }
 0x277   : > { %3499 = vmatpush.bf16.msra.mxu1 %v3456_v13  ;;  %v2092_v59 = vadd.f32 %v2088_v7, %v6328_v18  ;;  %v2436_v46 = vadd.f32 %v2407_v20, %v2091_v3 }
 0x278   : > { %3525 = vmatpush.bf16.msra.mxu3 %v3457_v45  ;;  %3487 = vmatmul.bf16.vlgmr.msra.gmra.mxu0 %v3475_v54 }
 0x279   : > { %3513 = vmatmul.bf16.vlgmr.msra.gmra.mxu2 %v3475_v54  ;;  %v2437_v44 = vadd.f32 %v2433_v33, %v2092_v59 }
 0x27a   : > { %3500 = vmatmul.bf16.vlgmr.msra.gmra.mxu1 %v3476_v4 }
 0x27b   : > { %3526 = vmatmul.bf16.vlgmr.msra.gmra.mxu3 %v3476_v4 }
 0x291   : > { %v2760_v34 = vpop.f32.mrf.mxu0 }
 0x292   : > { %v2773_v53 = vpop.f32.mrf.mxu1 }
 0x293   : > { %v2774_v23 = vadd.f32 %v2773_v53, %v2760_v34 }
 0x295   : > { %v2803_v6 = vadd.f32 %v2774_v23, %v2436_v46 }
 0x297   : > { %v2786_v37 = vpop.f32.mrf.mxu2 }
 0x298   : > { %v2799_v26 = vpop.f32.mrf.mxu3 }
 0x299   : > { %v2800_v41 = vadd.f32 %v2799_v26, %v2786_v37  ;;  %v2762_v49 = vpop.f32.mrf.mxu0 }
 0x29a   : > { %v2775_v40 = vpop.f32.mrf.mxu1 }
 0x29b   : > { %v2804_v11 = vadd.f32 %v2800_v41, %v2437_v44 }
 0x29f   : > { %v2788_v15 = vpop.f32.mrf.mxu2 }
 0x2a0   : > { %v2801_v18 = vpop.f32.mrf.mxu3 }
 0x2c4   : > { %v3119_v58 = vpop.f32.mrf.mxu0 }
 0x2c7   : > { %v3132_v31 = vpop.f32.mrf.mxu1 }
 0x2c8   : > { %v3133_v24 = vadd.f32 %v3132_v31, %v3119_v58 }
 0x2ca   : > { %v3145_v51 = vpop.f32.mrf.mxu2  ;;  %v3162_v50 = vadd.f32 %v3133_v24, %v2803_v6 }
 0x2cc   : > { %v3121_v52 = vpop.f32.mrf.mxu0 }
 0x2cd   : > { %v3158_v36 = vpop.f32.mrf.mxu3 }
 0x2ce   : > { %v3159_v16 = vadd.f32 %v3158_v36, %v3145_v51 }
 0x2cf   : > { %v3134_v56 = vpop.f32.mrf.mxu1 }
 0x2d0   : > { %v3163_v9 = vadd.f32 %v3159_v16, %v2804_v11 }
 0x2d2   : > { %v3147_v14 = vpop.f32.mrf.mxu2 }
 0x2d5   : > { %v3160_v30 = vpop.f32.mrf.mxu3 }
 0x2e8   : > { %v3537_v42 = vpop.permute.xlu0 %3536 }
 0x2f5   : > { %v3488_v57 = vpop.f32.mrf.mxu0 }
 0x2f7   : > { %v3501_v0 = vpop.f32.mrf.mxu1 }
 0x2f8   : > { %v3502_v43 = vadd.f32 %v3501_v0, %v3488_v57 }
 0x2fa   : > { %v3531_v29 = vadd.f32 %v3502_v43, %v3162_v50 }
 0x2fc   : > { %v3539_v12 = vadd.f32 %v3537_v42, %v3531_v29  ;;  %v3514_v61 = vpop.f32.mrf.mxu2 }
 0x2fd   : > { %v3490_v5 = vpop.f32.mrf.mxu0 }
 0x2fe   : > { %3541 = vst [vmem:[%s203_s26] sm:$0xff] %v3539_v12  ;;  %v3527_v62 = vpop.f32.mrf.mxu3 }
 0x2ff   : > { %v3528_v48 = vadd.f32 %v3527_v62, %v3514_v61  ;;  %v3503_v19 = vpop.f32.mrf.mxu1 }
 0x301   : > { %v3532_v39 = vadd.f32 %v3528_v48, %v3163_v9 }
 0x303   : > { %v3540_v8 = vadd.f32 %v3537_v42, %v3532_v39 }
 0x304   : > { %v3516_v60 = vpop.f32.mrf.mxu2 }
 0x305   : > { %3542 = vst [vmem:[%s203_s26 + $0x8] sm:$0xff] %v3540_v8 }
 0x306   : > { %v3529_v21 = vpop.f32.mrf.mxu3 }
 0x307   : > { %3909 = shalt.err (!%p3906_p5)
}
 0x308   : > { %3817 = dma.vmem_to_hbm [thread:$0]  (%p4025_p4), %s3560_s27, 256, %s3562_s28, %s3544_s15  }
 0x309 PF: > { %p3823_p6 = scmp.ge.s32.totalorder %s3960_s17, 2  ;;  %s3573_s9 = sand.u32 1, %s3940_s12  }
 0x30a   : > { %s3574_s10 = scalar_lea.sflag [#allocation3], %s3573_s9 }
 0x30b   : > { %p3820_p7 = pnand %p3823_p6, %p4032_p8 }
 0x30d   : > { %p3821_p9 = pneg %p3820_p7 }
 0x30f   : > { %3935 = dma.done.wait (%p3821_p9), %s3574_s10, 256  }
 0x310   : > { %3937 = vsyncadd (%p3821_p9), %s3574_s10, 4294967040  ;;  %s16_s17 = sadd.s32 1, %s3960_s17   ;;  %s6674_s12 = smov %s3944_s13 }
 0x311   : > { %p13_p10 = scmp.ge.s32.totalorder %s16_s17, 4   ;;  %s6675_s13 = smov %s3948_s14 }
 0x312   : > { %s6676_s14 = smov %s4038_s25  ;;  %s6677_s15 = smov %s3956_s16 }
 0x313   : > { %s6678_s16 = smov %s6680_s20  ;;  %15 = sbr.rel (!%p13_p10) target bundleno = 4 (0x4), region = 70 }
 0x318   :  { %3580 = vsyncpa [#allocation3], 1 }
 0x319   :  { %3582 = vsyncpa [#allocation3 + $0x1], 1 }

</bundles_post_ra>
